<compile_context>
chip_gen: v5e
topology: v5e:2x2
jax: 0.10.0
libtpu: 0.0.40
codegen_flags: <defaults>
</compile_context>

<pallas_src>
import math
import numpy as np
import jax
import jax.numpy as jnp
from jax import lax
from jax.experimental import pallas as pl
from jax.experimental.pallas import tpu as pltpu


# ---------------------------------------------------------------------------
# Packed-parameter slab layout (every table starts on an 8-row boundary).
# ---------------------------------------------------------------------------
def _round_up(x, m):
    return ((x + m - 1) // m) * m


def _param_layout(num_sensors, hidden, n_qubits):
    I, H, nq = num_sensors, hidden, n_qubits
    dim = 2 ** nq
    entries = [
        ("WxAll",   I,   4 * H),
        ("WhAll",   H,   4 * H),
        ("bAll",    1,   4 * H),
        ("Pin",     H,   nq),
        ("bpin",    1,   nq),
        ("PoutEff", dim, H),
        ("bpout",   1,   H),
        ("UtCat",   dim, 2 * dim),
        ("bits",    nq,  dim),
        ("WlinRow", 1,   H),
        ("blin",    1,   1),
    ]
    layout = {}
    row, max_cols = 0, 0
    for name, r, c in entries:
        layout[name] = (row, r, c)
        row = _round_up(row + r, 8)       # keep every table 8-row aligned
        max_cols = max(max_cols, c)
    return layout, _round_up(row, 8), _round_up(max_cols, 128)


# ---------------------------------------------------------------------------
# Pallas kernel factory: one grid step == the whole sequence.
# ---------------------------------------------------------------------------
def _make_kernel(T, B, H, nq, layout):
    dim = 2 ** nq

    def kernel(x_ref, slab_ref, out_ref):
        def tbl(name):
            r0, r, c = layout[name]
            # full-width (128-lane) aligned load, then static lane slice
            return slab_ref[r0:r0 + r, :][:, :c]

        wx = tbl("WxAll")            # [I, 4H]  (g columns pre-scaled x2)
        wh = tbl("WhAll")            # [H, 4H]
        b = tbl("bAll")              # [1, 4H]
        pin = tbl("Pin")             # [H, nq]
        bpin = tbl("bpin")           # [1, nq]
        pout_eff = tbl("PoutEff")    # [dim, H]   (PauliZ folded into Pout)
        bpout = tbl("bpout")         # [1, H]
        ut_cat = tbl("UtCat")        # [dim, 2*dim]  ([Re | Im] of U^T)
        bits = tbl("bits")           # [nq, dim]
        wlin_row = tbl("WlinRow")    # [1, H]
        blin = tbl("blin")           # [1, 1]

        # Hoisted input projection for ALL timesteps: one [T*B, I]x[I, 4H]
        # matmul (8x better MXU row occupancy than per-step [B, I] matmuls).
        x_pre = jnp.dot(x_ref[...], wx, preferred_element_type=jnp.float32) + b

        # Loop-invariant qubit-basis rows (hoisted so the broadcasts are
        # traced once, not nq*T times).
        bits_rows = [bits[q:q + 1, :] for q in range(nq)]

        h = jnp.zeros((B, H), jnp.float32)
        c = jnp.zeros((B, H), jnp.float32)

        for t in range(T):                      # static T=8, fully unrolled
            pre = x_pre[t * B:(t + 1) * B, :] + jnp.dot(
                h, wh, preferred_element_type=jnp.float32)        # [B, 4H]

            # single sigmoid over i|f|g; g gate via tanh(z) = 2*sig(2z) - 1
            sg = jax.nn.sigmoid(pre[:, :3 * H])
            i_g = sg[:, :H]
            f_g = sg[:, H:2 * H]
            g_g = 2.0 * sg[:, 2 * H:3 * H] - 1.0
            o_pre = pre[:, 3 * H:]

            c = f_g * c + i_g * g_g                               # [B, H]

            # ---- quantum circuit (exact statevector, 2**nq amplitudes) ----
            q_in = jnp.dot(c, pin, preferred_element_type=jnp.float32) + bpin
            half = (0.5 * math.pi) * jnp.tanh(q_in)               # [B, nq]
            cth = jnp.cos(half)
            sth = jnp.sin(half)

            # RY product state on |0...0>, pairwise multiply tree (depth 2)
            sel = [cth[:, q:q + 1]
                   + (sth[:, q:q + 1] - cth[:, q:q + 1]) * bits_rows[q]
                   for q in range(nq)]
            while len(sel) > 1:
                nxt = [sel[i] * sel[i + 1] for i in range(0, len(sel) - 1, 2)]
                if len(sel) % 2:
                    nxt.append(sel[-1])
                sel = nxt
            psi0 = sel[0]                                         # [B, dim]

            # one matmul for real+imag parts of psi = psi0 @ U^T
            psi = jnp.dot(psi0, ut_cat, preferred_element_type=jnp.float32)
            probs = (psi[:, :dim] * psi[:, :dim]
                     + psi[:, dim:] * psi[:, dim:])               # [B, dim]

            # qc = (probs @ Z) @ Pout == probs @ PoutEff (Z folded host-side)
            qc = jnp.dot(probs, pout_eff,
                         preferred_element_type=jnp.float32) + bpout

            o_g = jax.nn.sigmoid(o_pre + qc)
            h = o_g * jnp.tanh(c)

        # Regression head: VPU multiply + lane reduce (no N=1 MXU matmul),
        # broadcast across 128 lanes for an unmasked store.
        val = jnp.sum(h * wlin_row, axis=-1, keepdims=True) + blin   # [B, 1]
        out_ref[...] = jnp.broadcast_to(val, out_ref.shape)

    return kernel


# ---------------------------------------------------------------------------
# Host-side: fold the fixed PennyLane circuit layers into one 2^nq x 2^nq
# unitary; deterministic parameter init; slab packing.
# ---------------------------------------------------------------------------
def _build_circuit_unitary(rx, ry, rz, ent, n_qubits, n_layers):
    rx, ry, rz, ent = (np.asarray(a, np.float64) for a in (rx, ry, rz, ent))

    def RX(t):
        c, s = np.cos(t / 2), np.sin(t / 2)
        return np.array([[c, -1j * s], [-1j * s, c]], np.complex128)

    def RY(t):
        c, s = np.cos(t / 2), np.sin(t / 2)
        return np.array([[c, -s], [s, c]], np.complex128)

    def RZ(t):
        return np.array([[np.exp(-1j * t / 2), 0], [0, np.exp(1j * t / 2)]],
                        np.complex128)

    def single(g, w):   # wire 0 = most-significant bit (PennyLane convention)
        return np.kron(np.kron(np.eye(2 ** w), g),
                       np.eye(2 ** (n_qubits - 1 - w)))

    CNOT4 = np.array([[1, 0, 0, 0], [0, 1, 0, 0],
                      [0, 0, 0, 1], [0, 0, 1, 0]], np.complex128)

    def cnot(w):        # adjacent CNOT(control=w, target=w+1)
        return np.kron(np.kron(np.eye(2 ** w), CNOT4),
                       np.eye(2 ** (n_qubits - 2 - w)))

    U = np.eye(2 ** n_qubits, dtype=np.complex128)
    for layer in range(n_layers):
        for i in range(n_qubits):
            U = single(RX(rx[layer, i]), i) @ U
            U = single(RY(ry[layer, i]), i) @ U
            U = single(RZ(rz[layer, i]), i) @ U
        for i in range(n_qubits - 1):
            U = cnot(i) @ U
            U = single(RZ(ent[layer, i]), i + 1) @ U
    return U


def init_params(key, num_sensors, hidden, n_qubits=4, n_layers_q=2):
    ks = jax.random.split(key, 16)

    def lin(k, fan_in, fan_out):
        lim = 1.0 / math.sqrt(fan_in)
        kw, kb = jax.random.split(k)
        W = jax.random.uniform(kw, (fan_in, fan_out), jnp.float32, -lim, lim)
        b = jax.random.uniform(kb, (1, fan_out), jnp.float32, -lim, lim)
        return W, b

    Wx, Wh, bsum = [], [], []
    for g in range(4):  # i, f, g, o
        Wxi, bxi = lin(ks[g], num_sensors, hidden)
        Whi, bhi = lin(ks[4 + g], hidden, hidden)
        Wx.append(Wxi); Wh.append(Whi); bsum.append(bxi + bhi)

    Pin, bpin = lin(ks[8], hidden, n_qubits)
    Pout, bpout = lin(ks[9], n_qubits, hidden)
    Wlin, blin = lin(ks[10], hidden, 1)

    rx = jax.random.normal(ks[11], (n_layers_q, n_qubits))
    ry = jax.random.normal(ks[12], (n_layers_q, n_qubits))
    rz = jax.random.normal(ks[13], (n_layers_q, n_qubits))
    ent = jax.random.normal(ks[14], (n_layers_q, n_qubits - 1))

    U = _build_circuit_unitary(rx, ry, rz, ent, n_qubits, n_layers_q)
    Ut = U.T  # psi_row = psi0_row @ U^T

    dim = 2 ** n_qubits
    basis = np.arange(dim)
    bits = np.stack([(basis >> (n_qubits - 1 - i)) & 1
                     for i in range(n_qubits)]).astype(np.float32)  # [nq,dim]
    Zmat = (1.0 - 2.0 * bits.T).astype(np.float32)                  # [dim,nq]

    WxAll = jnp.concatenate(Wx, axis=1)                 # [I, 4H]
    WhAll = jnp.concatenate(Wh, axis=1)                 # [H, 4H]
    bAll = jnp.concatenate(bsum, axis=1)                # [1, 4H]
    Ut_re = jnp.asarray(Ut.real, jnp.float32)
    Ut_im = jnp.asarray(Ut.imag, jnp.float32)
    UtCat = jnp.concatenate([Ut_re, Ut_im], axis=1)     # [dim, 2*dim]
    Zj = jnp.asarray(Zmat)
    PoutEff = Zj @ Pout                                 # [dim, H]

    return {
        # fused pieces (used to build the packed slab)
        "WxAll": WxAll, "WhAll": WhAll, "bAll": bAll,
        "Pin": Pin, "bpin": bpin,
        "PoutEff": PoutEff, "bpout": bpout,
        "UtCat": UtCat, "bits": jnp.asarray(bits),
        "Wlin": Wlin, "blin": blin,
        # unfused pieces kept for the pure-JAX reference
        "Wx": jnp.stack(Wx), "Wh": jnp.stack(Wh),
        "b": jnp.stack(bsum).reshape(4, 1, hidden),
        "Pout": Pout, "Ut_re": Ut_re, "Ut_im": Ut_im, "Z": Zj,
    }


def pack_params(params, num_sensors, hidden, n_qubits):
    """Pack all kernel constants into one lane-padded f32 slab (one DMA)."""
    layout, n_rows, n_cols = _param_layout(num_sensors, hidden, n_qubits)
    H = hidden

    def scale_g(a):  # fold the x2 g-gate scale (tanh via sigmoid) host-side
        a = np.asarray(a, np.float32).copy()
        a[:, 2 * H:3 * H] *= 2.0
        return a

    tables = {
        "WxAll": scale_g(params["WxAll"]),
        "WhAll": scale_g(params["WhAll"]),
        "bAll": scale_g(params["bAll"]),
        "Pin": params["Pin"], "bpin": params["bpin"],
        "PoutEff": params["PoutEff"], "bpout": params["bpout"],
        "UtCat": params["UtCat"], "bits": params["bits"],
        "WlinRow": np.asarray(params["Wlin"], np.float32).T,   # [1, H]
        "blin": params["blin"],
    }
    slab = np.zeros((n_rows, n_cols), np.float32)
    for name, (r0, r, c) in layout.items():
        arr = np.asarray(tables[name], np.float32)
        assert arr.shape == (r, c), (name, arr.shape, (r, c))
        slab[r0:r0 + r, :c] = arr
    return {"slab": jnp.asarray(slab), "layout": layout,
            "dims": (num_sensors, hidden, n_qubits)}


# ---------------------------------------------------------------------------
# Wrapper
# ---------------------------------------------------------------------------
def forward_pallas(x, packed):
    """x: [B, T, num_sensors] float32 -> predictions [B]."""
    slab, layout = packed["slab"], packed["layout"]
    _, H, nq = packed["dims"]
    B, T, I = x.shape
    # time-major, flattened to [T*B, I] so the input projection is one matmul
    x_2d = jnp.transpose(x, (1, 0, 2)).reshape(T * B, I).astype(jnp.float32)
    R, C = slab.shape

    kernel = _make_kernel(T, B, H, nq, layout)
    out = pl.pallas_call(
        kernel,
        out_shape=jax.ShapeDtypeStruct((B, 128), jnp.float32),
        grid_spec=pltpu.PrefetchScalarGridSpec(
            num_scalar_prefetch=0,
            grid=(1,),                       # whole sequence in one grid step
            in_specs=[pl.BlockSpec((T * B, I), lambda i: (0, 0)),
                      pl.BlockSpec((R, C), lambda i: (0, 0))],
            out_specs=pl.BlockSpec((B, 128), lambda i: (0, 0)),
        ),
        compiler_params=pltpu.CompilerParams(
            dimension_semantics=("arbitrary",)),
    )(x_2d, slab)
    return out[:, 0]


# Pure-JAX reference using the UNFUSED parameters (original op ordering):
# separate gate matmuls, tanh g-gate, separate Ut_re/Ut_im matmuls, explicit
# Z then Pout, MXU-style final linear.  Validates every in-kernel fold.
def forward_ref(x, params):
    B, T, I = x.shape
    H = params["Wh"].shape[-1]
    nq = params["Pin"].shape[-1]
    dim = params["Ut_re"].shape[0]
    h = jnp.zeros((B, H), jnp.float32)
    c = jnp.zeros((B, H), jnp.float32)
    for t in range(T):
        xt = x[:, t, :]
        g = [xt @ params["Wx"][k] + h @ params["Wh"][k] + params["b"][k]
             for k in range(4)]
        i_g, f_g = jax.nn.sigmoid(g[0]), jax.nn.sigmoid(g[1])
        g_g, o_pre = jnp.tanh(g[2]), g[3]
        c_next = f_g * c + i_g * g_g
        theta = jnp.tanh(c_next @ params["Pin"] + params["bpin"]) * math.pi
        cth, sth = jnp.cos(theta / 2), jnp.sin(theta / 2)
        bits = params["bits"]
        psi0 = jnp.ones((B, dim), jnp.float32)
        for q in range(nq):
            psi0 = psi0 * (cth[:, q:q + 1] * (1.0 - bits[q:q + 1, :])
                           + sth[:, q:q + 1] * bits[q:q + 1, :])
        psi_re = psi0 @ params["Ut_re"]
        psi_im = psi0 @ params["Ut_im"]
        q_out = (psi_re ** 2 + psi_im ** 2) @ params["Z"]
        qc = q_out @ params["Pout"] + params["bpout"]
        o_g = jax.nn.sigmoid(o_pre + qc)
        h = o_g * jnp.tanh(c_next)
        c = c_next
    return (h @ params["Wlin"] + params["blin"]).reshape(-1)


if __name__ == "__main__":
    B, T, NUM_SENSORS, HIDDEN, NQ = 2, 8, 8, 32, 4
    key = jax.random.PRNGKey(0)
    kx, kp = jax.random.split(key)
    x = jax.random.normal(kx, (B, T, NUM_SENSORS), jnp.float32)
    params = init_params(kp, NUM_SENSORS, HIDDEN, NQ)
    packed = pack_params(params, NUM_SENSORS, HIDDEN, NQ)

    out = forward_pallas(x, packed)
    out = jax.block_until_ready(out)
    assert out.shape == (B,)

    ref = forward_ref(x, params)
    np.testing.assert_allclose(np.asarray(out), np.asarray(ref),
                               rtol=1e-4, atol=1e-4)
    print("KERNEL_OK")
</pallas_src>

<mosaic_0001>
module attributes {stable_mosaic.version = 11 : i64} {
  func.func @kernel(%arg0: i32, %arg1: memref<16x8xf32, #tpu.memory_space<vmem>>, %arg2: memref<152x128xf32, #tpu.memory_space<vmem>>, %arg3: memref<2x128xf32, #tpu.memory_space<vmem>>) attributes {dimension_semantics = [#tpu.dimension_semantics<arbitrary>], iteration_bounds = array<i64: 1>, scalar_prefetch = 0 : i64, scratch_operands = 0 : i64, tpu.core_type = #tpu.core_type<tc>, window_params = [{pipeline_mode = #tpu.pipeline_mode<synchronous>, transform_indices = @transform_0, window_bounds = array<i64: 16, 8>}, {pipeline_mode = #tpu.pipeline_mode<synchronous>, transform_indices = @transform_1, window_bounds = array<i64: 152, 128>}, {pipeline_mode = #tpu.pipeline_mode<synchronous>, transform_indices = @transform_2, window_bounds = array<i64: 2, 128>}]} {
    %c0 = arith.constant 0 : index
    %c0_0 = arith.constant 0 : index
    %0 = vector.load %arg2[%c0, %c0_0] : memref<152x128xf32, #tpu.memory_space<vmem>>, vector<8x128xf32>
    %c8 = arith.constant 8 : index
    %c0_1 = arith.constant 0 : index
    %1 = vector.load %arg2[%c8, %c0_1] : memref<152x128xf32, #tpu.memory_space<vmem>>, vector<32x128xf32>
    %c40 = arith.constant 40 : index
    %c0_2 = arith.constant 0 : index
    %2 = vector.load %arg2[%c40, %c0_2] : memref<152x128xf32, #tpu.memory_space<vmem>>, vector<1x128xf32>
    %c48 = arith.constant 48 : index
    %c0_3 = arith.constant 0 : index
    %3 = vector.load %arg2[%c48, %c0_3] : memref<152x128xf32, #tpu.memory_space<vmem>>, vector<32x128xf32>
    %4 = vector.extract_strided_slice %3 {offsets = [0, 0], sizes = [32, 4], strides = [1, 1]} : vector<32x128xf32> to vector<32x4xf32>
    %c80 = arith.constant 80 : index
    %c0_4 = arith.constant 0 : index
    %5 = vector.load %arg2[%c80, %c0_4] : memref<152x128xf32, #tpu.memory_space<vmem>>, vector<1x128xf32>
    %6 = vector.extract_strided_slice %5 {offsets = [0, 0], sizes = [1, 4], strides = [1, 1]} : vector<1x128xf32> to vector<1x4xf32>
    %c88 = arith.constant 88 : index
    %c0_5 = arith.constant 0 : index
    %7 = vector.load %arg2[%c88, %c0_5] : memref<152x128xf32, #tpu.memory_space<vmem>>, vector<16x128xf32>
    %8 = vector.extract_strided_slice %7 {offsets = [0, 0], sizes = [16, 32], strides = [1, 1]} : vector<16x128xf32> to vector<16x32xf32>
    %c104 = arith.constant 104 : index
    %c0_6 = arith.constant 0 : index
    %9 = vector.load %arg2[%c104, %c0_6] : memref<152x128xf32, #tpu.memory_space<vmem>>, vector<1x128xf32>
    %10 = vector.extract_strided_slice %9 {offsets = [0, 0], sizes = [1, 32], strides = [1, 1]} : vector<1x128xf32> to vector<1x32xf32>
    %c112 = arith.constant 112 : index
    %c0_7 = arith.constant 0 : index
    %11 = vector.load %arg2[%c112, %c0_7] : memref<152x128xf32, #tpu.memory_space<vmem>>, vector<16x128xf32>
    %12 = vector.extract_strided_slice %11 {offsets = [0, 0], sizes = [16, 32], strides = [1, 1]} : vector<16x128xf32> to vector<16x32xf32>
    %c128 = arith.constant 128 : index
    %c0_8 = arith.constant 0 : index
    %13 = vector.load %arg2[%c128, %c0_8] : memref<152x128xf32, #tpu.memory_space<vmem>>, vector<4x128xf32>
    %14 = vector.extract_strided_slice %13 {offsets = [0, 0], sizes = [4, 16], strides = [1, 1]} : vector<4x128xf32> to vector<4x16xf32>
    %c136 = arith.constant 136 : index
    %c0_9 = arith.constant 0 : index
    %15 = vector.load %arg2[%c136, %c0_9] : memref<152x128xf32, #tpu.memory_space<vmem>>, vector<1x128xf32>
    %16 = vector.extract_strided_slice %15 {offsets = [0, 0], sizes = [1, 32], strides = [1, 1]} : vector<1x128xf32> to vector<1x32xf32>
    %c144 = arith.constant 144 : index
    %c0_10 = arith.constant 0 : index
    %17 = vector.load %arg2[%c144, %c0_10] : memref<152x128xf32, #tpu.memory_space<vmem>>, vector<1x128xf32>
    %18 = vector.extract_strided_slice %17 {offsets = [0, 0], sizes = [1, 1], strides = [1, 1]} : vector<1x128xf32> to vector<1x1xf32>
    %c0_11 = arith.constant 0 : index
    %c0_12 = arith.constant 0 : index
    %19 = vector.load %arg1[%c0_11, %c0_12] : memref<16x8xf32, #tpu.memory_space<vmem>>, vector<16x8xf32>
    %cst = arith.constant dense<0.000000e+00> : vector<16x128xf32>
    %20 = tpu.matmul %19, %0, %cst {dimension_numbers = #tpu.dot_dimension_numbers<[1], [0], [0], [1], [0, 0, 1, 1], [], []>} : vector<16x8xf32>, vector<8x128xf32>, vector<16x128xf32> -> vector<16x128xf32>
    %21 = vector.broadcast %2 : vector<1x128xf32> to vector<16x128xf32>
    %22 = arith.addf %20, %21 : vector<16x128xf32>
    %23 = vector.extract_strided_slice %14 {offsets = [0, 0], sizes = [1, 16], strides = [1, 1]} : vector<4x16xf32> to vector<1x16xf32>
    %24 = vector.extract_strided_slice %14 {offsets = [1, 0], sizes = [1, 16], strides = [1, 1]} : vector<4x16xf32> to vector<1x16xf32>
    %25 = vector.extract_strided_slice %14 {offsets = [2, 0], sizes = [1, 16], strides = [1, 1]} : vector<4x16xf32> to vector<1x16xf32>
    %26 = vector.extract_strided_slice %14 {offsets = [3, 0], sizes = [1, 16], strides = [1, 1]} : vector<4x16xf32> to vector<1x16xf32>
    %cst_13 = arith.constant 0.000000e+00 : f32
    %27 = vector.broadcast %cst_13 : f32 to vector<2x32xf32>
    %cst_14 = arith.constant 0.000000e+00 : f32
    %28 = vector.broadcast %cst_14 : f32 to vector<2x32xf32>
    %29 = vector.extract_strided_slice %22 {offsets = [0, 0], sizes = [2, 128], strides = [1, 1]} : vector<16x128xf32> to vector<2x128xf32>
    %cst_15 = arith.constant dense<0.000000e+00> : vector<2x128xf32>
    %30 = tpu.matmul %27, %1, %cst_15 {dimension_numbers = #tpu.dot_dimension_numbers<[1], [0], [0], [1], [0, 0, 1, 1], [], []>} : vector<2x32xf32>, vector<32x128xf32>, vector<2x128xf32> -> vector<2x128xf32>
    %31 = arith.addf %29, %30 : vector<2x128xf32>
    %32 = vector.extract_strided_slice %31 {offsets = [0, 0], sizes = [2, 96], strides = [1, 1]} : vector<2x128xf32> to vector<2x96xf32>
    %33 = arith.negf %32 : vector<2x96xf32>
    %34 = math.exp %33 : vector<2x96xf32>
    %cst_16 = arith.constant 1.000000e+00 : f32
    %35 = vector.broadcast %cst_16 : f32 to vector<2x96xf32>
    %36 = arith.addf %35, %34 : vector<2x96xf32>
    %37 = arith.divf %35, %36 : vector<2x96xf32>
    %38 = vector.extract_strided_slice %37 {offsets = [0, 0], sizes = [2, 32], strides = [1, 1]} : vector<2x96xf32> to vector<2x32xf32>
    %39 = vector.extract_strided_slice %37 {offsets = [0, 32], sizes = [2, 32], strides = [1, 1]} : vector<2x96xf32> to vector<2x32xf32>
    %40 = vector.extract_strided_slice %37 {offsets = [0, 64], sizes = [2, 32], strides = [1, 1]} : vector<2x96xf32> to vector<2x32xf32>
    %cst_17 = arith.constant 2.000000e+00 : f32
    %41 = vector.broadcast %cst_17 : f32 to vector<2x32xf32>
    %42 = arith.mulf %41, %40 : vector<2x32xf32>
    %cst_18 = arith.constant 1.000000e+00 : f32
    %43 = vector.broadcast %cst_18 : f32 to vector<2x32xf32>
    %44 = arith.subf %42, %43 : vector<2x32xf32>
    %45 = vector.extract_strided_slice %31 {offsets = [0, 96], sizes = [2, 32], strides = [1, 1]} : vector<2x128xf32> to vector<2x32xf32>
    %46 = arith.mulf %39, %28 : vector<2x32xf32>
    %47 = arith.mulf %38, %44 : vector<2x32xf32>
    %48 = arith.addf %46, %47 : vector<2x32xf32>
    %cst_19 = arith.constant dense<0.000000e+00> : vector<2x4xf32>
    %49 = tpu.matmul %48, %4, %cst_19 {dimension_numbers = #tpu.dot_dimension_numbers<[1], [0], [0], [1], [0, 0, 1, 1], [], []>} : vector<2x32xf32>, vector<32x4xf32>, vector<2x4xf32> -> vector<2x4xf32>
    %50 = vector.broadcast %6 : vector<1x4xf32> to vector<2x4xf32>
    %51 = arith.addf %49, %50 : vector<2x4xf32>
    %52 = math.tanh %51 : vector<2x4xf32>
    %cst_20 = arith.constant 1.57079637 : f32
    %53 = vector.broadcast %cst_20 : f32 to vector<2x4xf32>
    %54 = arith.mulf %53, %52 : vector<2x4xf32>
    %55 = math.cos %54 : vector<2x4xf32>
    %56 = math.sin %54 : vector<2x4xf32>
    %57 = vector.extract_strided_slice %55 {offsets = [0, 0], sizes = [2, 1], strides = [1, 1]} : vector<2x4xf32> to vector<2x1xf32>
    %58 = vector.extract_strided_slice %56 {offsets = [0, 0], sizes = [2, 1], strides = [1, 1]} : vector<2x4xf32> to vector<2x1xf32>
    %59 = vector.extract_strided_slice %55 {offsets = [0, 0], sizes = [2, 1], strides = [1, 1]} : vector<2x4xf32> to vector<2x1xf32>
    %60 = arith.subf %58, %59 : vector<2x1xf32>
    %61 = vector.broadcast %60 : vector<2x1xf32> to vector<2x16xf32>
    %62 = vector.broadcast %23 : vector<1x16xf32> to vector<2x16xf32>
    %63 = arith.mulf %61, %62 : vector<2x16xf32>
    %64 = vector.broadcast %57 : vector<2x1xf32> to vector<2x16xf32>
    %65 = arith.addf %64, %63 : vector<2x16xf32>
    %66 = vector.extract_strided_slice %55 {offsets = [0, 1], sizes = [2, 1], strides = [1, 1]} : vector<2x4xf32> to vector<2x1xf32>
    %67 = vector.extract_strided_slice %56 {offsets = [0, 1], sizes = [2, 1], strides = [1, 1]} : vector<2x4xf32> to vector<2x1xf32>
    %68 = vector.extract_strided_slice %55 {offsets = [0, 1], sizes = [2, 1], strides = [1, 1]} : vector<2x4xf32> to vector<2x1xf32>
    %69 = arith.subf %67, %68 : vector<2x1xf32>
    %70 = vector.broadcast %69 : vector<2x1xf32> to vector<2x16xf32>
    %71 = vector.broadcast %24 : vector<1x16xf32> to vector<2x16xf32>
    %72 = arith.mulf %70, %71 : vector<2x16xf32>
    %73 = vector.broadcast %66 : vector<2x1xf32> to vector<2x16xf32>
    %74 = arith.addf %73, %72 : vector<2x16xf32>
    %75 = vector.extract_strided_slice %55 {offsets = [0, 2], sizes = [2, 1], strides = [1, 1]} : vector<2x4xf32> to vector<2x1xf32>
    %76 = vector.extract_strided_slice %56 {offsets = [0, 2], sizes = [2, 1], strides = [1, 1]} : vector<2x4xf32> to vector<2x1xf32>
    %77 = vector.extract_strided_slice %55 {offsets = [0, 2], sizes = [2, 1], strides = [1, 1]} : vector<2x4xf32> to vector<2x1xf32>
    %78 = arith.subf %76, %77 : vector<2x1xf32>
    %79 = vector.broadcast %78 : vector<2x1xf32> to vector<2x16xf32>
    %80 = vector.broadcast %25 : vector<1x16xf32> to vector<2x16xf32>
    %81 = arith.mulf %79, %80 : vector<2x16xf32>
    %82 = vector.broadcast %75 : vector<2x1xf32> to vector<2x16xf32>
    %83 = arith.addf %82, %81 : vector<2x16xf32>
    %84 = vector.extract_strided_slice %55 {offsets = [0, 3], sizes = [2, 1], strides = [1, 1]} : vector<2x4xf32> to vector<2x1xf32>
    %85 = vector.extract_strided_slice %56 {offsets = [0, 3], sizes = [2, 1], strides = [1, 1]} : vector<2x4xf32> to vector<2x1xf32>
    %86 = vector.extract_strided_slice %55 {offsets = [0, 3], sizes = [2, 1], strides = [1, 1]} : vector<2x4xf32> to vector<2x1xf32>
    %87 = arith.subf %85, %86 : vector<2x1xf32>
    %88 = vector.broadcast %87 : vector<2x1xf32> to vector<2x16xf32>
    %89 = vector.broadcast %26 : vector<1x16xf32> to vector<2x16xf32>
    %90 = arith.mulf %88, %89 : vector<2x16xf32>
    %91 = vector.broadcast %84 : vector<2x1xf32> to vector<2x16xf32>
    %92 = arith.addf %91, %90 : vector<2x16xf32>
    %93 = arith.mulf %65, %74 : vector<2x16xf32>
    %94 = arith.mulf %83, %92 : vector<2x16xf32>
    %95 = arith.mulf %93, %94 : vector<2x16xf32>
    %cst_21 = arith.constant dense<0.000000e+00> : vector<2x32xf32>
    %96 = tpu.matmul %95, %12, %cst_21 {dimension_numbers = #tpu.dot_dimension_numbers<[1], [0], [0], [1], [0, 0, 1, 1], [], []>} : vector<2x16xf32>, vector<16x32xf32>, vector<2x32xf32> -> vector<2x32xf32>
    %97 = vector.extract_strided_slice %96 {offsets = [0, 0], sizes = [2, 16], strides = [1, 1]} : vector<2x32xf32> to vector<2x16xf32>
    %98 = vector.extract_strided_slice %96 {offsets = [0, 0], sizes = [2, 16], strides = [1, 1]} : vector<2x32xf32> to vector<2x16xf32>
    %99 = arith.mulf %97, %98 : vector<2x16xf32>
    %100 = vector.extract_strided_slice %96 {offsets = [0, 16], sizes = [2, 16], strides = [1, 1]} : vector<2x32xf32> to vector<2x16xf32>
    %101 = vector.extract_strided_slice %96 {offsets = [0, 16], sizes = [2, 16], strides = [1, 1]} : vector<2x32xf32> to vector<2x16xf32>
    %102 = arith.mulf %100, %101 : vector<2x16xf32>
    %103 = arith.addf %99, %102 : vector<2x16xf32>
    %cst_22 = arith.constant dense<0.000000e+00> : vector<2x32xf32>
    %104 = tpu.matmul %103, %8, %cst_22 {dimension_numbers = #tpu.dot_dimension_numbers<[1], [0], [0], [1], [0, 0, 1, 1], [], []>} : vector<2x16xf32>, vector<16x32xf32>, vector<2x32xf32> -> vector<2x32xf32>
    %105 = vector.broadcast %10 : vector<1x32xf32> to vector<2x32xf32>
    %106 = arith.addf %104, %105 : vector<2x32xf32>
    %107 = arith.addf %45, %106 : vector<2x32xf32>
    %108 = arith.negf %107 : vector<2x32xf32>
    %109 = math.exp %108 : vector<2x32xf32>
    %cst_23 = arith.constant 1.000000e+00 : f32
    %110 = vector.broadcast %cst_23 : f32 to vector<2x32xf32>
    %111 = arith.addf %110, %109 : vector<2x32xf32>
    %112 = arith.divf %110, %111 : vector<2x32xf32>
    %113 = math.tanh %48 : vector<2x32xf32>
    %114 = arith.mulf %112, %113 : vector<2x32xf32>
    %115 = vector.extract_strided_slice %22 {offsets = [2, 0], sizes = [2, 128], strides = [1, 1]} : vector<16x128xf32> to vector<2x128xf32>
    %cst_24 = arith.constant dense<0.000000e+00> : vector<2x128xf32>
    %116 = tpu.matmul %114, %1, %cst_24 {dimension_numbers = #tpu.dot_dimension_numbers<[1], [0], [0], [1], [0, 0, 1, 1], [], []>} : vector<2x32xf32>, vector<32x128xf32>, vector<2x128xf32> -> vector<2x128xf32>
    %117 = arith.addf %115, %116 : vector<2x128xf32>
    %118 = vector.extract_strided_slice %117 {offsets = [0, 0], sizes = [2, 96], strides = [1, 1]} : vector<2x128xf32> to vector<2x96xf32>
    %119 = arith.negf %118 : vector<2x96xf32>
    %120 = math.exp %119 : vector<2x96xf32>
    %cst_25 = arith.constant 1.000000e+00 : f32
    %121 = vector.broadcast %cst_25 : f32 to vector<2x96xf32>
    %122 = arith.addf %121, %120 : vector<2x96xf32>
    %123 = arith.divf %121, %122 : vector<2x96xf32>
    %124 = vector.extract_strided_slice %123 {offsets = [0, 0], sizes = [2, 32], strides = [1, 1]} : vector<2x96xf32> to vector<2x32xf32>
    %125 = vector.extract_strided_slice %123 {offsets = [0, 32], sizes = [2, 32], strides = [1, 1]} : vector<2x96xf32> to vector<2x32xf32>
    %126 = vector.extract_strided_slice %123 {offsets = [0, 64], sizes = [2, 32], strides = [1, 1]} : vector<2x96xf32> to vector<2x32xf32>
    %cst_26 = arith.constant 2.000000e+00 : f32
    %127 = vector.broadcast %cst_26 : f32 to vector<2x32xf32>
    %128 = arith.mulf %127, %126 : vector<2x32xf32>
    %cst_27 = arith.constant 1.000000e+00 : f32
    %129 = vector.broadcast %cst_27 : f32 to vector<2x32xf32>
    %130 = arith.subf %128, %129 : vector<2x32xf32>
    %131 = vector.extract_strided_slice %117 {offsets = [0, 96], sizes = [2, 32], strides = [1, 1]} : vector<2x128xf32> to vector<2x32xf32>
    %132 = arith.mulf %125, %48 : vector<2x32xf32>
    %133 = arith.mulf %124, %130 : vector<2x32xf32>
    %134 = arith.addf %132, %133 : vector<2x32xf32>
    %cst_28 = arith.constant dense<0.000000e+00> : vector<2x4xf32>
    %135 = tpu.matmul %134, %4, %cst_28 {dimension_numbers = #tpu.dot_dimension_numbers<[1], [0], [0], [1], [0, 0, 1, 1], [], []>} : vector<2x32xf32>, vector<32x4xf32>, vector<2x4xf32> -> vector<2x4xf32>
    %136 = vector.broadcast %6 : vector<1x4xf32> to vector<2x4xf32>
    %137 = arith.addf %135, %136 : vector<2x4xf32>
    %138 = math.tanh %137 : vector<2x4xf32>
    %cst_29 = arith.constant 1.57079637 : f32
    %139 = vector.broadcast %cst_29 : f32 to vector<2x4xf32>
    %140 = arith.mulf %139, %138 : vector<2x4xf32>
    %141 = math.cos %140 : vector<2x4xf32>
    %142 = math.sin %140 : vector<2x4xf32>
    %143 = vector.extract_strided_slice %141 {offsets = [0, 0], sizes = [2, 1], strides = [1, 1]} : vector<2x4xf32> to vector<2x1xf32>
    %144 = vector.extract_strided_slice %142 {offsets = [0, 0], sizes = [2, 1], strides = [1, 1]} : vector<2x4xf32> to vector<2x1xf32>
    %145 = vector.extract_strided_slice %141 {offsets = [0, 0], sizes = [2, 1], strides = [1, 1]} : vector<2x4xf32> to vector<2x1xf32>
    %146 = arith.subf %144, %145 : vector<2x1xf32>
    %147 = vector.broadcast %146 : vector<2x1xf32> to vector<2x16xf32>
    %148 = vector.broadcast %23 : vector<1x16xf32> to vector<2x16xf32>
    %149 = arith.mulf %147, %148 : vector<2x16xf32>
    %150 = vector.broadcast %143 : vector<2x1xf32> to vector<2x16xf32>
    %151 = arith.addf %150, %149 : vector<2x16xf32>
    %152 = vector.extract_strided_slice %141 {offsets = [0, 1], sizes = [2, 1], strides = [1, 1]} : vector<2x4xf32> to vector<2x1xf32>
    %153 = vector.extract_strided_slice %142 {offsets = [0, 1], sizes = [2, 1], strides = [1, 1]} : vector<2x4xf32> to vector<2x1xf32>
    %154 = vector.extract_strided_slice %141 {offsets = [0, 1], sizes = [2, 1], strides = [1, 1]} : vector<2x4xf32> to vector<2x1xf32>
    %155 = arith.subf %153, %154 : vector<2x1xf32>
    %156 = vector.broadcast %155 : vector<2x1xf32> to vector<2x16xf32>
    %157 = vector.broadcast %24 : vector<1x16xf32> to vector<2x16xf32>
    %158 = arith.mulf %156, %157 : vector<2x16xf32>
    %159 = vector.broadcast %152 : vector<2x1xf32> to vector<2x16xf32>
    %160 = arith.addf %159, %158 : vector<2x16xf32>
    %161 = vector.extract_strided_slice %141 {offsets = [0, 2], sizes = [2, 1], strides = [1, 1]} : vector<2x4xf32> to vector<2x1xf32>
    %162 = vector.extract_strided_slice %142 {offsets = [0, 2], sizes = [2, 1], strides = [1, 1]} : vector<2x4xf32> to vector<2x1xf32>
    %163 = vector.extract_strided_slice %141 {offsets = [0, 2], sizes = [2, 1], strides = [1, 1]} : vector<2x4xf32> to vector<2x1xf32>
    %164 = arith.subf %162, %163 : vector<2x1xf32>
    %165 = vector.broadcast %164 : vector<2x1xf32> to vector<2x16xf32>
    %166 = vector.broadcast %25 : vector<1x16xf32> to vector<2x16xf32>
    %167 = arith.mulf %165, %166 : vector<2x16xf32>
    %168 = vector.broadcast %161 : vector<2x1xf32> to vector<2x16xf32>
    %169 = arith.addf %168, %167 : vector<2x16xf32>
    %170 = vector.extract_strided_slice %141 {offsets = [0, 3], sizes = [2, 1], strides = [1, 1]} : vector<2x4xf32> to vector<2x1xf32>
    %171 = vector.extract_strided_slice %142 {offsets = [0, 3], sizes = [2, 1], strides = [1, 1]} : vector<2x4xf32> to vector<2x1xf32>
    %172 = vector.extract_strided_slice %141 {offsets = [0, 3], sizes = [2, 1], strides = [1, 1]} : vector<2x4xf32> to vector<2x1xf32>
    %173 = arith.subf %171, %172 : vector<2x1xf32>
    %174 = vector.broadcast %173 : vector<2x1xf32> to vector<2x16xf32>
    %175 = vector.broadcast %26 : vector<1x16xf32> to vector<2x16xf32>
    %176 = arith.mulf %174, %175 : vector<2x16xf32>
    %177 = vector.broadcast %170 : vector<2x1xf32> to vector<2x16xf32>
    %178 = arith.addf %177, %176 : vector<2x16xf32>
    %179 = arith.mulf %151, %160 : vector<2x16xf32>
    %180 = arith.mulf %169, %178 : vector<2x16xf32>
    %181 = arith.mulf %179, %180 : vector<2x16xf32>
    %cst_30 = arith.constant dense<0.000000e+00> : vector<2x32xf32>
    %182 = tpu.matmul %181, %12, %cst_30 {dimension_numbers = #tpu.dot_dimension_numbers<[1], [0], [0], [1], [0, 0, 1, 1], [], []>} : vector<2x16xf32>, vector<16x32xf32>, vector<2x32xf32> -> vector<2x32xf32>
    %183 = vector.extract_strided_slice %182 {offsets = [0, 0], sizes = [2, 16], strides = [1, 1]} : vector<2x32xf32> to vector<2x16xf32>
    %184 = vector.extract_strided_slice %182 {offsets = [0, 0], sizes = [2, 16], strides = [1, 1]} : vector<2x32xf32> to vector<2x16xf32>
    %185 = arith.mulf %183, %184 : vector<2x16xf32>
    %186 = vector.extract_strided_slice %182 {offsets = [0, 16], sizes = [2, 16], strides = [1, 1]} : vector<2x32xf32> to vector<2x16xf32>
    %187 = vector.extract_strided_slice %182 {offsets = [0, 16], sizes = [2, 16], strides = [1, 1]} : vector<2x32xf32> to vector<2x16xf32>
    %188 = arith.mulf %186, %187 : vector<2x16xf32>
    %189 = arith.addf %185, %188 : vector<2x16xf32>
    %cst_31 = arith.constant dense<0.000000e+00> : vector<2x32xf32>
    %190 = tpu.matmul %189, %8, %cst_31 {dimension_numbers = #tpu.dot_dimension_numbers<[1], [0], [0], [1], [0, 0, 1, 1], [], []>} : vector<2x16xf32>, vector<16x32xf32>, vector<2x32xf32> -> vector<2x32xf32>
    %191 = vector.broadcast %10 : vector<1x32xf32> to vector<2x32xf32>
    %192 = arith.addf %190, %191 : vector<2x32xf32>
    %193 = arith.addf %131, %192 : vector<2x32xf32>
    %194 = arith.negf %193 : vector<2x32xf32>
    %195 = math.exp %194 : vector<2x32xf32>
    %cst_32 = arith.constant 1.000000e+00 : f32
    %196 = vector.broadcast %cst_32 : f32 to vector<2x32xf32>
    %197 = arith.addf %196, %195 : vector<2x32xf32>
    %198 = arith.divf %196, %197 : vector<2x32xf32>
    %199 = math.tanh %134 : vector<2x32xf32>
    %200 = arith.mulf %198, %199 : vector<2x32xf32>
    %201 = vector.extract_strided_slice %22 {offsets = [4, 0], sizes = [2, 128], strides = [1, 1]} : vector<16x128xf32> to vector<2x128xf32>
    %cst_33 = arith.constant dense<0.000000e+00> : vector<2x128xf32>
    %202 = tpu.matmul %200, %1, %cst_33 {dimension_numbers = #tpu.dot_dimension_numbers<[1], [0], [0], [1], [0, 0, 1, 1], [], []>} : vector<2x32xf32>, vector<32x128xf32>, vector<2x128xf32> -> vector<2x128xf32>
    %203 = arith.addf %201, %202 : vector<2x128xf32>
    %204 = vector.extract_strided_slice %203 {offsets = [0, 0], sizes = [2, 96], strides = [1, 1]} : vector<2x128xf32> to vector<2x96xf32>
    %205 = arith.negf %204 : vector<2x96xf32>
    %206 = math.exp %205 : vector<2x96xf32>
    %cst_34 = arith.constant 1.000000e+00 : f32
    %207 = vector.broadcast %cst_34 : f32 to vector<2x96xf32>
    %208 = arith.addf %207, %206 : vector<2x96xf32>
    %209 = arith.divf %207, %208 : vector<2x96xf32>
    %210 = vector.extract_strided_slice %209 {offsets = [0, 0], sizes = [2, 32], strides = [1, 1]} : vector<2x96xf32> to vector<2x32xf32>
    %211 = vector.extract_strided_slice %209 {offsets = [0, 32], sizes = [2, 32], strides = [1, 1]} : vector<2x96xf32> to vector<2x32xf32>
    %212 = vector.extract_strided_slice %209 {offsets = [0, 64], sizes = [2, 32], strides = [1, 1]} : vector<2x96xf32> to vector<2x32xf32>
    %cst_35 = arith.constant 2.000000e+00 : f32
    %213 = vector.broadcast %cst_35 : f32 to vector<2x32xf32>
    %214 = arith.mulf %213, %212 : vector<2x32xf32>
    %cst_36 = arith.constant 1.000000e+00 : f32
    %215 = vector.broadcast %cst_36 : f32 to vector<2x32xf32>
    %216 = arith.subf %214, %215 : vector<2x32xf32>
    %217 = vector.extract_strided_slice %203 {offsets = [0, 96], sizes = [2, 32], strides = [1, 1]} : vector<2x128xf32> to vector<2x32xf32>
    %218 = arith.mulf %211, %134 : vector<2x32xf32>
    %219 = arith.mulf %210, %216 : vector<2x32xf32>
    %220 = arith.addf %218, %219 : vector<2x32xf32>
    %cst_37 = arith.constant dense<0.000000e+00> : vector<2x4xf32>
    %221 = tpu.matmul %220, %4, %cst_37 {dimension_numbers = #tpu.dot_dimension_numbers<[1], [0], [0], [1], [0, 0, 1, 1], [], []>} : vector<2x32xf32>, vector<32x4xf32>, vector<2x4xf32> -> vector<2x4xf32>
    %222 = vector.broadcast %6 : vector<1x4xf32> to vector<2x4xf32>
    %223 = arith.addf %221, %222 : vector<2x4xf32>
    %224 = math.tanh %223 : vector<2x4xf32>
    %cst_38 = arith.constant 1.57079637 : f32
    %225 = vector.broadcast %cst_38 : f32 to vector<2x4xf32>
    %226 = arith.mulf %225, %224 : vector<2x4xf32>
    %227 = math.cos %226 : vector<2x4xf32>
    %228 = math.sin %226 : vector<2x4xf32>
    %229 = vector.extract_strided_slice %227 {offsets = [0, 0], sizes = [2, 1], strides = [1, 1]} : vector<2x4xf32> to vector<2x1xf32>
    %230 = vector.extract_strided_slice %228 {offsets = [0, 0], sizes = [2, 1], strides = [1, 1]} : vector<2x4xf32> to vector<2x1xf32>
    %231 = vector.extract_strided_slice %227 {offsets = [0, 0], sizes = [2, 1], strides = [1, 1]} : vector<2x4xf32> to vector<2x1xf32>
    %232 = arith.subf %230, %231 : vector<2x1xf32>
    %233 = vector.broadcast %232 : vector<2x1xf32> to vector<2x16xf32>
    %234 = vector.broadcast %23 : vector<1x16xf32> to vector<2x16xf32>
    %235 = arith.mulf %233, %234 : vector<2x16xf32>
    %236 = vector.broadcast %229 : vector<2x1xf32> to vector<2x16xf32>
    %237 = arith.addf %236, %235 : vector<2x16xf32>
    %238 = vector.extract_strided_slice %227 {offsets = [0, 1], sizes = [2, 1], strides = [1, 1]} : vector<2x4xf32> to vector<2x1xf32>
    %239 = vector.extract_strided_slice %228 {offsets = [0, 1], sizes = [2, 1], strides = [1, 1]} : vector<2x4xf32> to vector<2x1xf32>
    %240 = vector.extract_strided_slice %227 {offsets = [0, 1], sizes = [2, 1], strides = [1, 1]} : vector<2x4xf32> to vector<2x1xf32>
    %241 = arith.subf %239, %240 : vector<2x1xf32>
    %242 = vector.broadcast %241 : vector<2x1xf32> to vector<2x16xf32>
    %243 = vector.broadcast %24 : vector<1x16xf32> to vector<2x16xf32>
    %244 = arith.mulf %242, %243 : vector<2x16xf32>
    %245 = vector.broadcast %238 : vector<2x1xf32> to vector<2x16xf32>
    %246 = arith.addf %245, %244 : vector<2x16xf32>
    %247 = vector.extract_strided_slice %227 {offsets = [0, 2], sizes = [2, 1], strides = [1, 1]} : vector<2x4xf32> to vector<2x1xf32>
    %248 = vector.extract_strided_slice %228 {offsets = [0, 2], sizes = [2, 1], strides = [1, 1]} : vector<2x4xf32> to vector<2x1xf32>
    %249 = vector.extract_strided_slice %227 {offsets = [0, 2], sizes = [2, 1], strides = [1, 1]} : vector<2x4xf32> to vector<2x1xf32>
    %250 = arith.subf %248, %249 : vector<2x1xf32>
    %251 = vector.broadcast %250 : vector<2x1xf32> to vector<2x16xf32>
    %252 = vector.broadcast %25 : vector<1x16xf32> to vector<2x16xf32>
    %253 = arith.mulf %251, %252 : vector<2x16xf32>
    %254 = vector.broadcast %247 : vector<2x1xf32> to vector<2x16xf32>
    %255 = arith.addf %254, %253 : vector<2x16xf32>
    %256 = vector.extract_strided_slice %227 {offsets = [0, 3], sizes = [2, 1], strides = [1, 1]} : vector<2x4xf32> to vector<2x1xf32>
    %257 = vector.extract_strided_slice %228 {offsets = [0, 3], sizes = [2, 1], strides = [1, 1]} : vector<2x4xf32> to vector<2x1xf32>
    %258 = vector.extract_strided_slice %227 {offsets = [0, 3], sizes = [2, 1], strides = [1, 1]} : vector<2x4xf32> to vector<2x1xf32>
    %259 = arith.subf %257, %258 : vector<2x1xf32>
    %260 = vector.broadcast %259 : vector<2x1xf32> to vector<2x16xf32>
    %261 = vector.broadcast %26 : vector<1x16xf32> to vector<2x16xf32>
    %262 = arith.mulf %260, %261 : vector<2x16xf32>
    %263 = vector.broadcast %256 : vector<2x1xf32> to vector<2x16xf32>
    %264 = arith.addf %263, %262 : vector<2x16xf32>
    %265 = arith.mulf %237, %246 : vector<2x16xf32>
    %266 = arith.mulf %255, %264 : vector<2x16xf32>
    %267 = arith.mulf %265, %266 : vector<2x16xf32>
    %cst_39 = arith.constant dense<0.000000e+00> : vector<2x32xf32>
    %268 = tpu.matmul %267, %12, %cst_39 {dimension_numbers = #tpu.dot_dimension_numbers<[1], [0], [0], [1], [0, 0, 1, 1], [], []>} : vector<2x16xf32>, vector<16x32xf32>, vector<2x32xf32> -> vector<2x32xf32>
    %269 = vector.extract_strided_slice %268 {offsets = [0, 0], sizes = [2, 16], strides = [1, 1]} : vector<2x32xf32> to vector<2x16xf32>
    %270 = vector.extract_strided_slice %268 {offsets = [0, 0], sizes = [2, 16], strides = [1, 1]} : vector<2x32xf32> to vector<2x16xf32>
    %271 = arith.mulf %269, %270 : vector<2x16xf32>
    %272 = vector.extract_strided_slice %268 {offsets = [0, 16], sizes = [2, 16], strides = [1, 1]} : vector<2x32xf32> to vector<2x16xf32>
    %273 = vector.extract_strided_slice %268 {offsets = [0, 16], sizes = [2, 16], strides = [1, 1]} : vector<2x32xf32> to vector<2x16xf32>
    %274 = arith.mulf %272, %273 : vector<2x16xf32>
    %275 = arith.addf %271, %274 : vector<2x16xf32>
    %cst_40 = arith.constant dense<0.000000e+00> : vector<2x32xf32>
    %276 = tpu.matmul %275, %8, %cst_40 {dimension_numbers = #tpu.dot_dimension_numbers<[1], [0], [0], [1], [0, 0, 1, 1], [], []>} : vector<2x16xf32>, vector<16x32xf32>, vector<2x32xf32> -> vector<2x32xf32>
    %277 = vector.broadcast %10 : vector<1x32xf32> to vector<2x32xf32>
    %278 = arith.addf %276, %277 : vector<2x32xf32>
    %279 = arith.addf %217, %278 : vector<2x32xf32>
    %280 = arith.negf %279 : vector<2x32xf32>
    %281 = math.exp %280 : vector<2x32xf32>
    %cst_41 = arith.constant 1.000000e+00 : f32
    %282 = vector.broadcast %cst_41 : f32 to vector<2x32xf32>
    %283 = arith.addf %282, %281 : vector<2x32xf32>
    %284 = arith.divf %282, %283 : vector<2x32xf32>
    %285 = math.tanh %220 : vector<2x32xf32>
    %286 = arith.mulf %284, %285 : vector<2x32xf32>
    %287 = vector.extract_strided_slice %22 {offsets = [6, 0], sizes = [2, 128], strides = [1, 1]} : vector<16x128xf32> to vector<2x128xf32>
    %cst_42 = arith.constant dense<0.000000e+00> : vector<2x128xf32>
    %288 = tpu.matmul %286, %1, %cst_42 {dimension_numbers = #tpu.dot_dimension_numbers<[1], [0], [0], [1], [0, 0, 1, 1], [], []>} : vector<2x32xf32>, vector<32x128xf32>, vector<2x128xf32> -> vector<2x128xf32>
    %289 = arith.addf %287, %288 : vector<2x128xf32>
    %290 = vector.extract_strided_slice %289 {offsets = [0, 0], sizes = [2, 96], strides = [1, 1]} : vector<2x128xf32> to vector<2x96xf32>
    %291 = arith.negf %290 : vector<2x96xf32>
    %292 = math.exp %291 : vector<2x96xf32>
    %cst_43 = arith.constant 1.000000e+00 : f32
    %293 = vector.broadcast %cst_43 : f32 to vector<2x96xf32>
    %294 = arith.addf %293, %292 : vector<2x96xf32>
    %295 = arith.divf %293, %294 : vector<2x96xf32>
    %296 = vector.extract_strided_slice %295 {offsets = [0, 0], sizes = [2, 32], strides = [1, 1]} : vector<2x96xf32> to vector<2x32xf32>
    %297 = vector.extract_strided_slice %295 {offsets = [0, 32], sizes = [2, 32], strides = [1, 1]} : vector<2x96xf32> to vector<2x32xf32>
    %298 = vector.extract_strided_slice %295 {offsets = [0, 64], sizes = [2, 32], strides = [1, 1]} : vector<2x96xf32> to vector<2x32xf32>
    %cst_44 = arith.constant 2.000000e+00 : f32
    %299 = vector.broadcast %cst_44 : f32 to vector<2x32xf32>
    %300 = arith.mulf %299, %298 : vector<2x32xf32>
    %cst_45 = arith.constant 1.000000e+00 : f32
    %301 = vector.broadcast %cst_45 : f32 to vector<2x32xf32>
    %302 = arith.subf %300, %301 : vector<2x32xf32>
    %303 = vector.extract_strided_slice %289 {offsets = [0, 96], sizes = [2, 32], strides = [1, 1]} : vector<2x128xf32> to vector<2x32xf32>
    %304 = arith.mulf %297, %220 : vector<2x32xf32>
    %305 = arith.mulf %296, %302 : vector<2x32xf32>
    %306 = arith.addf %304, %305 : vector<2x32xf32>
    %cst_46 = arith.constant dense<0.000000e+00> : vector<2x4xf32>
    %307 = tpu.matmul %306, %4, %cst_46 {dimension_numbers = #tpu.dot_dimension_numbers<[1], [0], [0], [1], [0, 0, 1, 1], [], []>} : vector<2x32xf32>, vector<32x4xf32>, vector<2x4xf32> -> vector<2x4xf32>
    %308 = vector.broadcast %6 : vector<1x4xf32> to vector<2x4xf32>
    %309 = arith.addf %307, %308 : vector<2x4xf32>
    %310 = math.tanh %309 : vector<2x4xf32>
    %cst_47 = arith.constant 1.57079637 : f32
    %311 = vector.broadcast %cst_47 : f32 to vector<2x4xf32>
    %312 = arith.mulf %311, %310 : vector<2x4xf32>
    %313 = math.cos %312 : vector<2x4xf32>
    %314 = math.sin %312 : vector<2x4xf32>
    %315 = vector.extract_strided_slice %313 {offsets = [0, 0], sizes = [2, 1], strides = [1, 1]} : vector<2x4xf32> to vector<2x1xf32>
    %316 = vector.extract_strided_slice %314 {offsets = [0, 0], sizes = [2, 1], strides = [1, 1]} : vector<2x4xf32> to vector<2x1xf32>
    %317 = vector.extract_strided_slice %313 {offsets = [0, 0], sizes = [2, 1], strides = [1, 1]} : vector<2x4xf32> to vector<2x1xf32>
    %318 = arith.subf %316, %317 : vector<2x1xf32>
    %319 = vector.broadcast %318 : vector<2x1xf32> to vector<2x16xf32>
    %320 = vector.broadcast %23 : vector<1x16xf32> to vector<2x16xf32>
    %321 = arith.mulf %319, %320 : vector<2x16xf32>
    %322 = vector.broadcast %315 : vector<2x1xf32> to vector<2x16xf32>
    %323 = arith.addf %322, %321 : vector<2x16xf32>
    %324 = vector.extract_strided_slice %313 {offsets = [0, 1], sizes = [2, 1], strides = [1, 1]} : vector<2x4xf32> to vector<2x1xf32>
    %325 = vector.extract_strided_slice %314 {offsets = [0, 1], sizes = [2, 1], strides = [1, 1]} : vector<2x4xf32> to vector<2x1xf32>
    %326 = vector.extract_strided_slice %313 {offsets = [0, 1], sizes = [2, 1], strides = [1, 1]} : vector<2x4xf32> to vector<2x1xf32>
    %327 = arith.subf %325, %326 : vector<2x1xf32>
    %328 = vector.broadcast %327 : vector<2x1xf32> to vector<2x16xf32>
    %329 = vector.broadcast %24 : vector<1x16xf32> to vector<2x16xf32>
    %330 = arith.mulf %328, %329 : vector<2x16xf32>
    %331 = vector.broadcast %324 : vector<2x1xf32> to vector<2x16xf32>
    %332 = arith.addf %331, %330 : vector<2x16xf32>
    %333 = vector.extract_strided_slice %313 {offsets = [0, 2], sizes = [2, 1], strides = [1, 1]} : vector<2x4xf32> to vector<2x1xf32>
    %334 = vector.extract_strided_slice %314 {offsets = [0, 2], sizes = [2, 1], strides = [1, 1]} : vector<2x4xf32> to vector<2x1xf32>
    %335 = vector.extract_strided_slice %313 {offsets = [0, 2], sizes = [2, 1], strides = [1, 1]} : vector<2x4xf32> to vector<2x1xf32>
    %336 = arith.subf %334, %335 : vector<2x1xf32>
    %337 = vector.broadcast %336 : vector<2x1xf32> to vector<2x16xf32>
    %338 = vector.broadcast %25 : vector<1x16xf32> to vector<2x16xf32>
    %339 = arith.mulf %337, %338 : vector<2x16xf32>
    %340 = vector.broadcast %333 : vector<2x1xf32> to vector<2x16xf32>
    %341 = arith.addf %340, %339 : vector<2x16xf32>
    %342 = vector.extract_strided_slice %313 {offsets = [0, 3], sizes = [2, 1], strides = [1, 1]} : vector<2x4xf32> to vector<2x1xf32>
    %343 = vector.extract_strided_slice %314 {offsets = [0, 3], sizes = [2, 1], strides = [1, 1]} : vector<2x4xf32> to vector<2x1xf32>
    %344 = vector.extract_strided_slice %313 {offsets = [0, 3], sizes = [2, 1], strides = [1, 1]} : vector<2x4xf32> to vector<2x1xf32>
    %345 = arith.subf %343, %344 : vector<2x1xf32>
    %346 = vector.broadcast %345 : vector<2x1xf32> to vector<2x16xf32>
    %347 = vector.broadcast %26 : vector<1x16xf32> to vector<2x16xf32>
    %348 = arith.mulf %346, %347 : vector<2x16xf32>
    %349 = vector.broadcast %342 : vector<2x1xf32> to vector<2x16xf32>
    %350 = arith.addf %349, %348 : vector<2x16xf32>
    %351 = arith.mulf %323, %332 : vector<2x16xf32>
    %352 = arith.mulf %341, %350 : vector<2x16xf32>
    %353 = arith.mulf %351, %352 : vector<2x16xf32>
    %cst_48 = arith.constant dense<0.000000e+00> : vector<2x32xf32>
    %354 = tpu.matmul %353, %12, %cst_48 {dimension_numbers = #tpu.dot_dimension_numbers<[1], [0], [0], [1], [0, 0, 1, 1], [], []>} : vector<2x16xf32>, vector<16x32xf32>, vector<2x32xf32> -> vector<2x32xf32>
    %355 = vector.extract_strided_slice %354 {offsets = [0, 0], sizes = [2, 16], strides = [1, 1]} : vector<2x32xf32> to vector<2x16xf32>
    %356 = vector.extract_strided_slice %354 {offsets = [0, 0], sizes = [2, 16], strides = [1, 1]} : vector<2x32xf32> to vector<2x16xf32>
    %357 = arith.mulf %355, %356 : vector<2x16xf32>
    %358 = vector.extract_strided_slice %354 {offsets = [0, 16], sizes = [2, 16], strides = [1, 1]} : vector<2x32xf32> to vector<2x16xf32>
    %359 = vector.extract_strided_slice %354 {offsets = [0, 16], sizes = [2, 16], strides = [1, 1]} : vector<2x32xf32> to vector<2x16xf32>
    %360 = arith.mulf %358, %359 : vector<2x16xf32>
    %361 = arith.addf %357, %360 : vector<2x16xf32>
    %cst_49 = arith.constant dense<0.000000e+00> : vector<2x32xf32>
    %362 = tpu.matmul %361, %8, %cst_49 {dimension_numbers = #tpu.dot_dimension_numbers<[1], [0], [0], [1], [0, 0, 1, 1], [], []>} : vector<2x16xf32>, vector<16x32xf32>, vector<2x32xf32> -> vector<2x32xf32>
    %363 = vector.broadcast %10 : vector<1x32xf32> to vector<2x32xf32>
    %364 = arith.addf %362, %363 : vector<2x32xf32>
    %365 = arith.addf %303, %364 : vector<2x32xf32>
    %366 = arith.negf %365 : vector<2x32xf32>
    %367 = math.exp %366 : vector<2x32xf32>
    %cst_50 = arith.constant 1.000000e+00 : f32
    %368 = vector.broadcast %cst_50 : f32 to vector<2x32xf32>
    %369 = arith.addf %368, %367 : vector<2x32xf32>
    %370 = arith.divf %368, %369 : vector<2x32xf32>
    %371 = math.tanh %306 : vector<2x32xf32>
    %372 = arith.mulf %370, %371 : vector<2x32xf32>
    %373 = vector.extract_strided_slice %22 {offsets = [8, 0], sizes = [2, 128], strides = [1, 1]} : vector<16x128xf32> to vector<2x128xf32>
    %cst_51 = arith.constant dense<0.000000e+00> : vector<2x128xf32>
    %374 = tpu.matmul %372, %1, %cst_51 {dimension_numbers = #tpu.dot_dimension_numbers<[1], [0], [0], [1], [0, 0, 1, 1], [], []>} : vector<2x32xf32>, vector<32x128xf32>, vector<2x128xf32> -> vector<2x128xf32>
    %375 = arith.addf %373, %374 : vector<2x128xf32>
    %376 = vector.extract_strided_slice %375 {offsets = [0, 0], sizes = [2, 96], strides = [1, 1]} : vector<2x128xf32> to vector<2x96xf32>
    %377 = arith.negf %376 : vector<2x96xf32>
    %378 = math.exp %377 : vector<2x96xf32>
    %cst_52 = arith.constant 1.000000e+00 : f32
    %379 = vector.broadcast %cst_52 : f32 to vector<2x96xf32>
    %380 = arith.addf %379, %378 : vector<2x96xf32>
    %381 = arith.divf %379, %380 : vector<2x96xf32>
    %382 = vector.extract_strided_slice %381 {offsets = [0, 0], sizes = [2, 32], strides = [1, 1]} : vector<2x96xf32> to vector<2x32xf32>
    %383 = vector.extract_strided_slice %381 {offsets = [0, 32], sizes = [2, 32], strides = [1, 1]} : vector<2x96xf32> to vector<2x32xf32>
    %384 = vector.extract_strided_slice %381 {offsets = [0, 64], sizes = [2, 32], strides = [1, 1]} : vector<2x96xf32> to vector<2x32xf32>
    %cst_53 = arith.constant 2.000000e+00 : f32
    %385 = vector.broadcast %cst_53 : f32 to vector<2x32xf32>
    %386 = arith.mulf %385, %384 : vector<2x32xf32>
    %cst_54 = arith.constant 1.000000e+00 : f32
    %387 = vector.broadcast %cst_54 : f32 to vector<2x32xf32>
    %388 = arith.subf %386, %387 : vector<2x32xf32>
    %389 = vector.extract_strided_slice %375 {offsets = [0, 96], sizes = [2, 32], strides = [1, 1]} : vector<2x128xf32> to vector<2x32xf32>
    %390 = arith.mulf %383, %306 : vector<2x32xf32>
    %391 = arith.mulf %382, %388 : vector<2x32xf32>
    %392 = arith.addf %390, %391 : vector<2x32xf32>
    %cst_55 = arith.constant dense<0.000000e+00> : vector<2x4xf32>
    %393 = tpu.matmul %392, %4, %cst_55 {dimension_numbers = #tpu.dot_dimension_numbers<[1], [0], [0], [1], [0, 0, 1, 1], [], []>} : vector<2x32xf32>, vector<32x4xf32>, vector<2x4xf32> -> vector<2x4xf32>
    %394 = vector.broadcast %6 : vector<1x4xf32> to vector<2x4xf32>
    %395 = arith.addf %393, %394 : vector<2x4xf32>
    %396 = math.tanh %395 : vector<2x4xf32>
    %cst_56 = arith.constant 1.57079637 : f32
    %397 = vector.broadcast %cst_56 : f32 to vector<2x4xf32>
    %398 = arith.mulf %397, %396 : vector<2x4xf32>
    %399 = math.cos %398 : vector<2x4xf32>
    %400 = math.sin %398 : vector<2x4xf32>
    %401 = vector.extract_strided_slice %399 {offsets = [0, 0], sizes = [2, 1], strides = [1, 1]} : vector<2x4xf32> to vector<2x1xf32>
    %402 = vector.extract_strided_slice %400 {offsets = [0, 0], sizes = [2, 1], strides = [1, 1]} : vector<2x4xf32> to vector<2x1xf32>
    %403 = vector.extract_strided_slice %399 {offsets = [0, 0], sizes = [2, 1], strides = [1, 1]} : vector<2x4xf32> to vector<2x1xf32>
    %404 = arith.subf %402, %403 : vector<2x1xf32>
    %405 = vector.broadcast %404 : vector<2x1xf32> to vector<2x16xf32>
    %406 = vector.broadcast %23 : vector<1x16xf32> to vector<2x16xf32>
    %407 = arith.mulf %405, %406 : vector<2x16xf32>
    %408 = vector.broadcast %401 : vector<2x1xf32> to vector<2x16xf32>
    %409 = arith.addf %408, %407 : vector<2x16xf32>
    %410 = vector.extract_strided_slice %399 {offsets = [0, 1], sizes = [2, 1], strides = [1, 1]} : vector<2x4xf32> to vector<2x1xf32>
    %411 = vector.extract_strided_slice %400 {offsets = [0, 1], sizes = [2, 1], strides = [1, 1]} : vector<2x4xf32> to vector<2x1xf32>
    %412 = vector.extract_strided_slice %399 {offsets = [0, 1], sizes = [2, 1], strides = [1, 1]} : vector<2x4xf32> to vector<2x1xf32>
    %413 = arith.subf %411, %412 : vector<2x1xf32>
    %414 = vector.broadcast %413 : vector<2x1xf32> to vector<2x16xf32>
    %415 = vector.broadcast %24 : vector<1x16xf32> to vector<2x16xf32>
    %416 = arith.mulf %414, %415 : vector<2x16xf32>
    %417 = vector.broadcast %410 : vector<2x1xf32> to vector<2x16xf32>
    %418 = arith.addf %417, %416 : vector<2x16xf32>
    %419 = vector.extract_strided_slice %399 {offsets = [0, 2], sizes = [2, 1], strides = [1, 1]} : vector<2x4xf32> to vector<2x1xf32>
    %420 = vector.extract_strided_slice %400 {offsets = [0, 2], sizes = [2, 1], strides = [1, 1]} : vector<2x4xf32> to vector<2x1xf32>
    %421 = vector.extract_strided_slice %399 {offsets = [0, 2], sizes = [2, 1], strides = [1, 1]} : vector<2x4xf32> to vector<2x1xf32>
    %422 = arith.subf %420, %421 : vector<2x1xf32>
    %423 = vector.broadcast %422 : vector<2x1xf32> to vector<2x16xf32>
    %424 = vector.broadcast %25 : vector<1x16xf32> to vector<2x16xf32>
    %425 = arith.mulf %423, %424 : vector<2x16xf32>
    %426 = vector.broadcast %419 : vector<2x1xf32> to vector<2x16xf32>
    %427 = arith.addf %426, %425 : vector<2x16xf32>
    %428 = vector.extract_strided_slice %399 {offsets = [0, 3], sizes = [2, 1], strides = [1, 1]} : vector<2x4xf32> to vector<2x1xf32>
    %429 = vector.extract_strided_slice %400 {offsets = [0, 3], sizes = [2, 1], strides = [1, 1]} : vector<2x4xf32> to vector<2x1xf32>
    %430 = vector.extract_strided_slice %399 {offsets = [0, 3], sizes = [2, 1], strides = [1, 1]} : vector<2x4xf32> to vector<2x1xf32>
    %431 = arith.subf %429, %430 : vector<2x1xf32>
    %432 = vector.broadcast %431 : vector<2x1xf32> to vector<2x16xf32>
    %433 = vector.broadcast %26 : vector<1x16xf32> to vector<2x16xf32>
    %434 = arith.mulf %432, %433 : vector<2x16xf32>
    %435 = vector.broadcast %428 : vector<2x1xf32> to vector<2x16xf32>
    %436 = arith.addf %435, %434 : vector<2x16xf32>
    %437 = arith.mulf %409, %418 : vector<2x16xf32>
    %438 = arith.mulf %427, %436 : vector<2x16xf32>
    %439 = arith.mulf %437, %438 : vector<2x16xf32>
    %cst_57 = arith.constant dense<0.000000e+00> : vector<2x32xf32>
    %440 = tpu.matmul %439, %12, %cst_57 {dimension_numbers = #tpu.dot_dimension_numbers<[1], [0], [0], [1], [0, 0, 1, 1], [], []>} : vector<2x16xf32>, vector<16x32xf32>, vector<2x32xf32> -> vector<2x32xf32>
    %441 = vector.extract_strided_slice %440 {offsets = [0, 0], sizes = [2, 16], strides = [1, 1]} : vector<2x32xf32> to vector<2x16xf32>
    %442 = vector.extract_strided_slice %440 {offsets = [0, 0], sizes = [2, 16], strides = [1, 1]} : vector<2x32xf32> to vector<2x16xf32>
    %443 = arith.mulf %441, %442 : vector<2x16xf32>
    %444 = vector.extract_strided_slice %440 {offsets = [0, 16], sizes = [2, 16], strides = [1, 1]} : vector<2x32xf32> to vector<2x16xf32>
    %445 = vector.extract_strided_slice %440 {offsets = [0, 16], sizes = [2, 16], strides = [1, 1]} : vector<2x32xf32> to vector<2x16xf32>
    %446 = arith.mulf %444, %445 : vector<2x16xf32>
    %447 = arith.addf %443, %446 : vector<2x16xf32>
    %cst_58 = arith.constant dense<0.000000e+00> : vector<2x32xf32>
    %448 = tpu.matmul %447, %8, %cst_58 {dimension_numbers = #tpu.dot_dimension_numbers<[1], [0], [0], [1], [0, 0, 1, 1], [], []>} : vector<2x16xf32>, vector<16x32xf32>, vector<2x32xf32> -> vector<2x32xf32>
    %449 = vector.broadcast %10 : vector<1x32xf32> to vector<2x32xf32>
    %450 = arith.addf %448, %449 : vector<2x32xf32>
    %451 = arith.addf %389, %450 : vector<2x32xf32>
    %452 = arith.negf %451 : vector<2x32xf32>
    %453 = math.exp %452 : vector<2x32xf32>
    %cst_59 = arith.constant 1.000000e+00 : f32
    %454 = vector.broadcast %cst_59 : f32 to vector<2x32xf32>
    %455 = arith.addf %454, %453 : vector<2x32xf32>
    %456 = arith.divf %454, %455 : vector<2x32xf32>
    %457 = math.tanh %392 : vector<2x32xf32>
    %458 = arith.mulf %456, %457 : vector<2x32xf32>
    %459 = vector.extract_strided_slice %22 {offsets = [10, 0], sizes = [2, 128], strides = [1, 1]} : vector<16x128xf32> to vector<2x128xf32>
    %cst_60 = arith.constant dense<0.000000e+00> : vector<2x128xf32>
    %460 = tpu.matmul %458, %1, %cst_60 {dimension_numbers = #tpu.dot_dimension_numbers<[1], [0], [0], [1], [0, 0, 1, 1], [], []>} : vector<2x32xf32>, vector<32x128xf32>, vector<2x128xf32> -> vector<2x128xf32>
    %461 = arith.addf %459, %460 : vector<2x128xf32>
    %462 = vector.extract_strided_slice %461 {offsets = [0, 0], sizes = [2, 96], strides = [1, 1]} : vector<2x128xf32> to vector<2x96xf32>
    %463 = arith.negf %462 : vector<2x96xf32>
    %464 = math.exp %463 : vector<2x96xf32>
    %cst_61 = arith.constant 1.000000e+00 : f32
    %465 = vector.broadcast %cst_61 : f32 to vector<2x96xf32>
    %466 = arith.addf %465, %464 : vector<2x96xf32>
    %467 = arith.divf %465, %466 : vector<2x96xf32>
    %468 = vector.extract_strided_slice %467 {offsets = [0, 0], sizes = [2, 32], strides = [1, 1]} : vector<2x96xf32> to vector<2x32xf32>
    %469 = vector.extract_strided_slice %467 {offsets = [0, 32], sizes = [2, 32], strides = [1, 1]} : vector<2x96xf32> to vector<2x32xf32>
    %470 = vector.extract_strided_slice %467 {offsets = [0, 64], sizes = [2, 32], strides = [1, 1]} : vector<2x96xf32> to vector<2x32xf32>
    %cst_62 = arith.constant 2.000000e+00 : f32
    %471 = vector.broadcast %cst_62 : f32 to vector<2x32xf32>
    %472 = arith.mulf %471, %470 : vector<2x32xf32>
    %cst_63 = arith.constant 1.000000e+00 : f32
    %473 = vector.broadcast %cst_63 : f32 to vector<2x32xf32>
    %474 = arith.subf %472, %473 : vector<2x32xf32>
    %475 = vector.extract_strided_slice %461 {offsets = [0, 96], sizes = [2, 32], strides = [1, 1]} : vector<2x128xf32> to vector<2x32xf32>
    %476 = arith.mulf %469, %392 : vector<2x32xf32>
    %477 = arith.mulf %468, %474 : vector<2x32xf32>
    %478 = arith.addf %476, %477 : vector<2x32xf32>
    %cst_64 = arith.constant dense<0.000000e+00> : vector<2x4xf32>
    %479 = tpu.matmul %478, %4, %cst_64 {dimension_numbers = #tpu.dot_dimension_numbers<[1], [0], [0], [1], [0, 0, 1, 1], [], []>} : vector<2x32xf32>, vector<32x4xf32>, vector<2x4xf32> -> vector<2x4xf32>
    %480 = vector.broadcast %6 : vector<1x4xf32> to vector<2x4xf32>
    %481 = arith.addf %479, %480 : vector<2x4xf32>
    %482 = math.tanh %481 : vector<2x4xf32>
    %cst_65 = arith.constant 1.57079637 : f32
    %483 = vector.broadcast %cst_65 : f32 to vector<2x4xf32>
    %484 = arith.mulf %483, %482 : vector<2x4xf32>
    %485 = math.cos %484 : vector<2x4xf32>
    %486 = math.sin %484 : vector<2x4xf32>
    %487 = vector.extract_strided_slice %485 {offsets = [0, 0], sizes = [2, 1], strides = [1, 1]} : vector<2x4xf32> to vector<2x1xf32>
    %488 = vector.extract_strided_slice %486 {offsets = [0, 0], sizes = [2, 1], strides = [1, 1]} : vector<2x4xf32> to vector<2x1xf32>
    %489 = vector.extract_strided_slice %485 {offsets = [0, 0], sizes = [2, 1], strides = [1, 1]} : vector<2x4xf32> to vector<2x1xf32>
    %490 = arith.subf %488, %489 : vector<2x1xf32>
    %491 = vector.broadcast %490 : vector<2x1xf32> to vector<2x16xf32>
    %492 = vector.broadcast %23 : vector<1x16xf32> to vector<2x16xf32>
    %493 = arith.mulf %491, %492 : vector<2x16xf32>
    %494 = vector.broadcast %487 : vector<2x1xf32> to vector<2x16xf32>
    %495 = arith.addf %494, %493 : vector<2x16xf32>
    %496 = vector.extract_strided_slice %485 {offsets = [0, 1], sizes = [2, 1], strides = [1, 1]} : vector<2x4xf32> to vector<2x1xf32>
    %497 = vector.extract_strided_slice %486 {offsets = [0, 1], sizes = [2, 1], strides = [1, 1]} : vector<2x4xf32> to vector<2x1xf32>
    %498 = vector.extract_strided_slice %485 {offsets = [0, 1], sizes = [2, 1], strides = [1, 1]} : vector<2x4xf32> to vector<2x1xf32>
    %499 = arith.subf %497, %498 : vector<2x1xf32>
    %500 = vector.broadcast %499 : vector<2x1xf32> to vector<2x16xf32>
    %501 = vector.broadcast %24 : vector<1x16xf32> to vector<2x16xf32>
    %502 = arith.mulf %500, %501 : vector<2x16xf32>
    %503 = vector.broadcast %496 : vector<2x1xf32> to vector<2x16xf32>
    %504 = arith.addf %503, %502 : vector<2x16xf32>
    %505 = vector.extract_strided_slice %485 {offsets = [0, 2], sizes = [2, 1], strides = [1, 1]} : vector<2x4xf32> to vector<2x1xf32>
    %506 = vector.extract_strided_slice %486 {offsets = [0, 2], sizes = [2, 1], strides = [1, 1]} : vector<2x4xf32> to vector<2x1xf32>
    %507 = vector.extract_strided_slice %485 {offsets = [0, 2], sizes = [2, 1], strides = [1, 1]} : vector<2x4xf32> to vector<2x1xf32>
    %508 = arith.subf %506, %507 : vector<2x1xf32>
    %509 = vector.broadcast %508 : vector<2x1xf32> to vector<2x16xf32>
    %510 = vector.broadcast %25 : vector<1x16xf32> to vector<2x16xf32>
    %511 = arith.mulf %509, %510 : vector<2x16xf32>
    %512 = vector.broadcast %505 : vector<2x1xf32> to vector<2x16xf32>
    %513 = arith.addf %512, %511 : vector<2x16xf32>
    %514 = vector.extract_strided_slice %485 {offsets = [0, 3], sizes = [2, 1], strides = [1, 1]} : vector<2x4xf32> to vector<2x1xf32>
    %515 = vector.extract_strided_slice %486 {offsets = [0, 3], sizes = [2, 1], strides = [1, 1]} : vector<2x4xf32> to vector<2x1xf32>
    %516 = vector.extract_strided_slice %485 {offsets = [0, 3], sizes = [2, 1], strides = [1, 1]} : vector<2x4xf32> to vector<2x1xf32>
    %517 = arith.subf %515, %516 : vector<2x1xf32>
    %518 = vector.broadcast %517 : vector<2x1xf32> to vector<2x16xf32>
    %519 = vector.broadcast %26 : vector<1x16xf32> to vector<2x16xf32>
    %520 = arith.mulf %518, %519 : vector<2x16xf32>
    %521 = vector.broadcast %514 : vector<2x1xf32> to vector<2x16xf32>
    %522 = arith.addf %521, %520 : vector<2x16xf32>
    %523 = arith.mulf %495, %504 : vector<2x16xf32>
    %524 = arith.mulf %513, %522 : vector<2x16xf32>
    %525 = arith.mulf %523, %524 : vector<2x16xf32>
    %cst_66 = arith.constant dense<0.000000e+00> : vector<2x32xf32>
    %526 = tpu.matmul %525, %12, %cst_66 {dimension_numbers = #tpu.dot_dimension_numbers<[1], [0], [0], [1], [0, 0, 1, 1], [], []>} : vector<2x16xf32>, vector<16x32xf32>, vector<2x32xf32> -> vector<2x32xf32>
    %527 = vector.extract_strided_slice %526 {offsets = [0, 0], sizes = [2, 16], strides = [1, 1]} : vector<2x32xf32> to vector<2x16xf32>
    %528 = vector.extract_strided_slice %526 {offsets = [0, 0], sizes = [2, 16], strides = [1, 1]} : vector<2x32xf32> to vector<2x16xf32>
    %529 = arith.mulf %527, %528 : vector<2x16xf32>
    %530 = vector.extract_strided_slice %526 {offsets = [0, 16], sizes = [2, 16], strides = [1, 1]} : vector<2x32xf32> to vector<2x16xf32>
    %531 = vector.extract_strided_slice %526 {offsets = [0, 16], sizes = [2, 16], strides = [1, 1]} : vector<2x32xf32> to vector<2x16xf32>
    %532 = arith.mulf %530, %531 : vector<2x16xf32>
    %533 = arith.addf %529, %532 : vector<2x16xf32>
    %cst_67 = arith.constant dense<0.000000e+00> : vector<2x32xf32>
    %534 = tpu.matmul %533, %8, %cst_67 {dimension_numbers = #tpu.dot_dimension_numbers<[1], [0], [0], [1], [0, 0, 1, 1], [], []>} : vector<2x16xf32>, vector<16x32xf32>, vector<2x32xf32> -> vector<2x32xf32>
    %535 = vector.broadcast %10 : vector<1x32xf32> to vector<2x32xf32>
    %536 = arith.addf %534, %535 : vector<2x32xf32>
    %537 = arith.addf %475, %536 : vector<2x32xf32>
    %538 = arith.negf %537 : vector<2x32xf32>
    %539 = math.exp %538 : vector<2x32xf32>
    %cst_68 = arith.constant 1.000000e+00 : f32
    %540 = vector.broadcast %cst_68 : f32 to vector<2x32xf32>
    %541 = arith.addf %540, %539 : vector<2x32xf32>
    %542 = arith.divf %540, %541 : vector<2x32xf32>
    %543 = math.tanh %478 : vector<2x32xf32>
    %544 = arith.mulf %542, %543 : vector<2x32xf32>
    %545 = vector.extract_strided_slice %22 {offsets = [12, 0], sizes = [2, 128], strides = [1, 1]} : vector<16x128xf32> to vector<2x128xf32>
    %cst_69 = arith.constant dense<0.000000e+00> : vector<2x128xf32>
    %546 = tpu.matmul %544, %1, %cst_69 {dimension_numbers = #tpu.dot_dimension_numbers<[1], [0], [0], [1], [0, 0, 1, 1], [], []>} : vector<2x32xf32>, vector<32x128xf32>, vector<2x128xf32> -> vector<2x128xf32>
    %547 = arith.addf %545, %546 : vector<2x128xf32>
    %548 = vector.extract_strided_slice %547 {offsets = [0, 0], sizes = [2, 96], strides = [1, 1]} : vector<2x128xf32> to vector<2x96xf32>
    %549 = arith.negf %548 : vector<2x96xf32>
    %550 = math.exp %549 : vector<2x96xf32>
    %cst_70 = arith.constant 1.000000e+00 : f32
    %551 = vector.broadcast %cst_70 : f32 to vector<2x96xf32>
    %552 = arith.addf %551, %550 : vector<2x96xf32>
    %553 = arith.divf %551, %552 : vector<2x96xf32>
    %554 = vector.extract_strided_slice %553 {offsets = [0, 0], sizes = [2, 32], strides = [1, 1]} : vector<2x96xf32> to vector<2x32xf32>
    %555 = vector.extract_strided_slice %553 {offsets = [0, 32], sizes = [2, 32], strides = [1, 1]} : vector<2x96xf32> to vector<2x32xf32>
    %556 = vector.extract_strided_slice %553 {offsets = [0, 64], sizes = [2, 32], strides = [1, 1]} : vector<2x96xf32> to vector<2x32xf32>
    %cst_71 = arith.constant 2.000000e+00 : f32
    %557 = vector.broadcast %cst_71 : f32 to vector<2x32xf32>
    %558 = arith.mulf %557, %556 : vector<2x32xf32>
    %cst_72 = arith.constant 1.000000e+00 : f32
    %559 = vector.broadcast %cst_72 : f32 to vector<2x32xf32>
    %560 = arith.subf %558, %559 : vector<2x32xf32>
    %561 = vector.extract_strided_slice %547 {offsets = [0, 96], sizes = [2, 32], strides = [1, 1]} : vector<2x128xf32> to vector<2x32xf32>
    %562 = arith.mulf %555, %478 : vector<2x32xf32>
    %563 = arith.mulf %554, %560 : vector<2x32xf32>
    %564 = arith.addf %562, %563 : vector<2x32xf32>
    %cst_73 = arith.constant dense<0.000000e+00> : vector<2x4xf32>
    %565 = tpu.matmul %564, %4, %cst_73 {dimension_numbers = #tpu.dot_dimension_numbers<[1], [0], [0], [1], [0, 0, 1, 1], [], []>} : vector<2x32xf32>, vector<32x4xf32>, vector<2x4xf32> -> vector<2x4xf32>
    %566 = vector.broadcast %6 : vector<1x4xf32> to vector<2x4xf32>
    %567 = arith.addf %565, %566 : vector<2x4xf32>
    %568 = math.tanh %567 : vector<2x4xf32>
    %cst_74 = arith.constant 1.57079637 : f32
    %569 = vector.broadcast %cst_74 : f32 to vector<2x4xf32>
    %570 = arith.mulf %569, %568 : vector<2x4xf32>
    %571 = math.cos %570 : vector<2x4xf32>
    %572 = math.sin %570 : vector<2x4xf32>
    %573 = vector.extract_strided_slice %571 {offsets = [0, 0], sizes = [2, 1], strides = [1, 1]} : vector<2x4xf32> to vector<2x1xf32>
    %574 = vector.extract_strided_slice %572 {offsets = [0, 0], sizes = [2, 1], strides = [1, 1]} : vector<2x4xf32> to vector<2x1xf32>
    %575 = vector.extract_strided_slice %571 {offsets = [0, 0], sizes = [2, 1], strides = [1, 1]} : vector<2x4xf32> to vector<2x1xf32>
    %576 = arith.subf %574, %575 : vector<2x1xf32>
    %577 = vector.broadcast %576 : vector<2x1xf32> to vector<2x16xf32>
    %578 = vector.broadcast %23 : vector<1x16xf32> to vector<2x16xf32>
    %579 = arith.mulf %577, %578 : vector<2x16xf32>
    %580 = vector.broadcast %573 : vector<2x1xf32> to vector<2x16xf32>
    %581 = arith.addf %580, %579 : vector<2x16xf32>
    %582 = vector.extract_strided_slice %571 {offsets = [0, 1], sizes = [2, 1], strides = [1, 1]} : vector<2x4xf32> to vector<2x1xf32>
    %583 = vector.extract_strided_slice %572 {offsets = [0, 1], sizes = [2, 1], strides = [1, 1]} : vector<2x4xf32> to vector<2x1xf32>
    %584 = vector.extract_strided_slice %571 {offsets = [0, 1], sizes = [2, 1], strides = [1, 1]} : vector<2x4xf32> to vector<2x1xf32>
    %585 = arith.subf %583, %584 : vector<2x1xf32>
    %586 = vector.broadcast %585 : vector<2x1xf32> to vector<2x16xf32>
    %587 = vector.broadcast %24 : vector<1x16xf32> to vector<2x16xf32>
    %588 = arith.mulf %586, %587 : vector<2x16xf32>
    %589 = vector.broadcast %582 : vector<2x1xf32> to vector<2x16xf32>
    %590 = arith.addf %589, %588 : vector<2x16xf32>
    %591 = vector.extract_strided_slice %571 {offsets = [0, 2], sizes = [2, 1], strides = [1, 1]} : vector<2x4xf32> to vector<2x1xf32>
    %592 = vector.extract_strided_slice %572 {offsets = [0, 2], sizes = [2, 1], strides = [1, 1]} : vector<2x4xf32> to vector<2x1xf32>
    %593 = vector.extract_strided_slice %571 {offsets = [0, 2], sizes = [2, 1], strides = [1, 1]} : vector<2x4xf32> to vector<2x1xf32>
    %594 = arith.subf %592, %593 : vector<2x1xf32>
    %595 = vector.broadcast %594 : vector<2x1xf32> to vector<2x16xf32>
    %596 = vector.broadcast %25 : vector<1x16xf32> to vector<2x16xf32>
    %597 = arith.mulf %595, %596 : vector<2x16xf32>
    %598 = vector.broadcast %591 : vector<2x1xf32> to vector<2x16xf32>
    %599 = arith.addf %598, %597 : vector<2x16xf32>
    %600 = vector.extract_strided_slice %571 {offsets = [0, 3], sizes = [2, 1], strides = [1, 1]} : vector<2x4xf32> to vector<2x1xf32>
    %601 = vector.extract_strided_slice %572 {offsets = [0, 3], sizes = [2, 1], strides = [1, 1]} : vector<2x4xf32> to vector<2x1xf32>
    %602 = vector.extract_strided_slice %571 {offsets = [0, 3], sizes = [2, 1], strides = [1, 1]} : vector<2x4xf32> to vector<2x1xf32>
    %603 = arith.subf %601, %602 : vector<2x1xf32>
    %604 = vector.broadcast %603 : vector<2x1xf32> to vector<2x16xf32>
    %605 = vector.broadcast %26 : vector<1x16xf32> to vector<2x16xf32>
    %606 = arith.mulf %604, %605 : vector<2x16xf32>
    %607 = vector.broadcast %600 : vector<2x1xf32> to vector<2x16xf32>
    %608 = arith.addf %607, %606 : vector<2x16xf32>
    %609 = arith.mulf %581, %590 : vector<2x16xf32>
    %610 = arith.mulf %599, %608 : vector<2x16xf32>
    %611 = arith.mulf %609, %610 : vector<2x16xf32>
    %cst_75 = arith.constant dense<0.000000e+00> : vector<2x32xf32>
    %612 = tpu.matmul %611, %12, %cst_75 {dimension_numbers = #tpu.dot_dimension_numbers<[1], [0], [0], [1], [0, 0, 1, 1], [], []>} : vector<2x16xf32>, vector<16x32xf32>, vector<2x32xf32> -> vector<2x32xf32>
    %613 = vector.extract_strided_slice %612 {offsets = [0, 0], sizes = [2, 16], strides = [1, 1]} : vector<2x32xf32> to vector<2x16xf32>
    %614 = vector.extract_strided_slice %612 {offsets = [0, 0], sizes = [2, 16], strides = [1, 1]} : vector<2x32xf32> to vector<2x16xf32>
    %615 = arith.mulf %613, %614 : vector<2x16xf32>
    %616 = vector.extract_strided_slice %612 {offsets = [0, 16], sizes = [2, 16], strides = [1, 1]} : vector<2x32xf32> to vector<2x16xf32>
    %617 = vector.extract_strided_slice %612 {offsets = [0, 16], sizes = [2, 16], strides = [1, 1]} : vector<2x32xf32> to vector<2x16xf32>
    %618 = arith.mulf %616, %617 : vector<2x16xf32>
    %619 = arith.addf %615, %618 : vector<2x16xf32>
    %cst_76 = arith.constant dense<0.000000e+00> : vector<2x32xf32>
    %620 = tpu.matmul %619, %8, %cst_76 {dimension_numbers = #tpu.dot_dimension_numbers<[1], [0], [0], [1], [0, 0, 1, 1], [], []>} : vector<2x16xf32>, vector<16x32xf32>, vector<2x32xf32> -> vector<2x32xf32>
    %621 = vector.broadcast %10 : vector<1x32xf32> to vector<2x32xf32>
    %622 = arith.addf %620, %621 : vector<2x32xf32>
    %623 = arith.addf %561, %622 : vector<2x32xf32>
    %624 = arith.negf %623 : vector<2x32xf32>
    %625 = math.exp %624 : vector<2x32xf32>
    %cst_77 = arith.constant 1.000000e+00 : f32
    %626 = vector.broadcast %cst_77 : f32 to vector<2x32xf32>
    %627 = arith.addf %626, %625 : vector<2x32xf32>
    %628 = arith.divf %626, %627 : vector<2x32xf32>
    %629 = math.tanh %564 : vector<2x32xf32>
    %630 = arith.mulf %628, %629 : vector<2x32xf32>
    %631 = vector.extract_strided_slice %22 {offsets = [14, 0], sizes = [2, 128], strides = [1, 1]} : vector<16x128xf32> to vector<2x128xf32>
    %cst_78 = arith.constant dense<0.000000e+00> : vector<2x128xf32>
    %632 = tpu.matmul %630, %1, %cst_78 {dimension_numbers = #tpu.dot_dimension_numbers<[1], [0], [0], [1], [0, 0, 1, 1], [], []>} : vector<2x32xf32>, vector<32x128xf32>, vector<2x128xf32> -> vector<2x128xf32>
    %633 = arith.addf %631, %632 : vector<2x128xf32>
    %634 = vector.extract_strided_slice %633 {offsets = [0, 0], sizes = [2, 96], strides = [1, 1]} : vector<2x128xf32> to vector<2x96xf32>
    %635 = arith.negf %634 : vector<2x96xf32>
    %636 = math.exp %635 : vector<2x96xf32>
    %cst_79 = arith.constant 1.000000e+00 : f32
    %637 = vector.broadcast %cst_79 : f32 to vector<2x96xf32>
    %638 = arith.addf %637, %636 : vector<2x96xf32>
    %639 = arith.divf %637, %638 : vector<2x96xf32>
    %640 = vector.extract_strided_slice %639 {offsets = [0, 0], sizes = [2, 32], strides = [1, 1]} : vector<2x96xf32> to vector<2x32xf32>
    %641 = vector.extract_strided_slice %639 {offsets = [0, 32], sizes = [2, 32], strides = [1, 1]} : vector<2x96xf32> to vector<2x32xf32>
    %642 = vector.extract_strided_slice %639 {offsets = [0, 64], sizes = [2, 32], strides = [1, 1]} : vector<2x96xf32> to vector<2x32xf32>
    %cst_80 = arith.constant 2.000000e+00 : f32
    %643 = vector.broadcast %cst_80 : f32 to vector<2x32xf32>
    %644 = arith.mulf %643, %642 : vector<2x32xf32>
    %cst_81 = arith.constant 1.000000e+00 : f32
    %645 = vector.broadcast %cst_81 : f32 to vector<2x32xf32>
    %646 = arith.subf %644, %645 : vector<2x32xf32>
    %647 = vector.extract_strided_slice %633 {offsets = [0, 96], sizes = [2, 32], strides = [1, 1]} : vector<2x128xf32> to vector<2x32xf32>
    %648 = arith.mulf %641, %564 : vector<2x32xf32>
    %649 = arith.mulf %640, %646 : vector<2x32xf32>
    %650 = arith.addf %648, %649 : vector<2x32xf32>
    %cst_82 = arith.constant dense<0.000000e+00> : vector<2x4xf32>
    %651 = tpu.matmul %650, %4, %cst_82 {dimension_numbers = #tpu.dot_dimension_numbers<[1], [0], [0], [1], [0, 0, 1, 1], [], []>} : vector<2x32xf32>, vector<32x4xf32>, vector<2x4xf32> -> vector<2x4xf32>
    %652 = vector.broadcast %6 : vector<1x4xf32> to vector<2x4xf32>
    %653 = arith.addf %651, %652 : vector<2x4xf32>
    %654 = math.tanh %653 : vector<2x4xf32>
    %cst_83 = arith.constant 1.57079637 : f32
    %655 = vector.broadcast %cst_83 : f32 to vector<2x4xf32>
    %656 = arith.mulf %655, %654 : vector<2x4xf32>
    %657 = math.cos %656 : vector<2x4xf32>
    %658 = math.sin %656 : vector<2x4xf32>
    %659 = vector.extract_strided_slice %657 {offsets = [0, 0], sizes = [2, 1], strides = [1, 1]} : vector<2x4xf32> to vector<2x1xf32>
    %660 = vector.extract_strided_slice %658 {offsets = [0, 0], sizes = [2, 1], strides = [1, 1]} : vector<2x4xf32> to vector<2x1xf32>
    %661 = vector.extract_strided_slice %657 {offsets = [0, 0], sizes = [2, 1], strides = [1, 1]} : vector<2x4xf32> to vector<2x1xf32>
    %662 = arith.subf %660, %661 : vector<2x1xf32>
    %663 = vector.broadcast %662 : vector<2x1xf32> to vector<2x16xf32>
    %664 = vector.broadcast %23 : vector<1x16xf32> to vector<2x16xf32>
    %665 = arith.mulf %663, %664 : vector<2x16xf32>
    %666 = vector.broadcast %659 : vector<2x1xf32> to vector<2x16xf32>
    %667 = arith.addf %666, %665 : vector<2x16xf32>
    %668 = vector.extract_strided_slice %657 {offsets = [0, 1], sizes = [2, 1], strides = [1, 1]} : vector<2x4xf32> to vector<2x1xf32>
    %669 = vector.extract_strided_slice %658 {offsets = [0, 1], sizes = [2, 1], strides = [1, 1]} : vector<2x4xf32> to vector<2x1xf32>
    %670 = vector.extract_strided_slice %657 {offsets = [0, 1], sizes = [2, 1], strides = [1, 1]} : vector<2x4xf32> to vector<2x1xf32>
    %671 = arith.subf %669, %670 : vector<2x1xf32>
    %672 = vector.broadcast %671 : vector<2x1xf32> to vector<2x16xf32>
    %673 = vector.broadcast %24 : vector<1x16xf32> to vector<2x16xf32>
    %674 = arith.mulf %672, %673 : vector<2x16xf32>
    %675 = vector.broadcast %668 : vector<2x1xf32> to vector<2x16xf32>
    %676 = arith.addf %675, %674 : vector<2x16xf32>
    %677 = vector.extract_strided_slice %657 {offsets = [0, 2], sizes = [2, 1], strides = [1, 1]} : vector<2x4xf32> to vector<2x1xf32>
    %678 = vector.extract_strided_slice %658 {offsets = [0, 2], sizes = [2, 1], strides = [1, 1]} : vector<2x4xf32> to vector<2x1xf32>
    %679 = vector.extract_strided_slice %657 {offsets = [0, 2], sizes = [2, 1], strides = [1, 1]} : vector<2x4xf32> to vector<2x1xf32>
    %680 = arith.subf %678, %679 : vector<2x1xf32>
    %681 = vector.broadcast %680 : vector<2x1xf32> to vector<2x16xf32>
    %682 = vector.broadcast %25 : vector<1x16xf32> to vector<2x16xf32>
    %683 = arith.mulf %681, %682 : vector<2x16xf32>
    %684 = vector.broadcast %677 : vector<2x1xf32> to vector<2x16xf32>
    %685 = arith.addf %684, %683 : vector<2x16xf32>
    %686 = vector.extract_strided_slice %657 {offsets = [0, 3], sizes = [2, 1], strides = [1, 1]} : vector<2x4xf32> to vector<2x1xf32>
    %687 = vector.extract_strided_slice %658 {offsets = [0, 3], sizes = [2, 1], strides = [1, 1]} : vector<2x4xf32> to vector<2x1xf32>
    %688 = vector.extract_strided_slice %657 {offsets = [0, 3], sizes = [2, 1], strides = [1, 1]} : vector<2x4xf32> to vector<2x1xf32>
    %689 = arith.subf %687, %688 : vector<2x1xf32>
    %690 = vector.broadcast %689 : vector<2x1xf32> to vector<2x16xf32>
    %691 = vector.broadcast %26 : vector<1x16xf32> to vector<2x16xf32>
    %692 = arith.mulf %690, %691 : vector<2x16xf32>
    %693 = vector.broadcast %686 : vector<2x1xf32> to vector<2x16xf32>
    %694 = arith.addf %693, %692 : vector<2x16xf32>
    %695 = arith.mulf %667, %676 : vector<2x16xf32>
    %696 = arith.mulf %685, %694 : vector<2x16xf32>
    %697 = arith.mulf %695, %696 : vector<2x16xf32>
    %cst_84 = arith.constant dense<0.000000e+00> : vector<2x32xf32>
    %698 = tpu.matmul %697, %12, %cst_84 {dimension_numbers = #tpu.dot_dimension_numbers<[1], [0], [0], [1], [0, 0, 1, 1], [], []>} : vector<2x16xf32>, vector<16x32xf32>, vector<2x32xf32> -> vector<2x32xf32>
    %699 = vector.extract_strided_slice %698 {offsets = [0, 0], sizes = [2, 16], strides = [1, 1]} : vector<2x32xf32> to vector<2x16xf32>
    %700 = vector.extract_strided_slice %698 {offsets = [0, 0], sizes = [2, 16], strides = [1, 1]} : vector<2x32xf32> to vector<2x16xf32>
    %701 = arith.mulf %699, %700 : vector<2x16xf32>
    %702 = vector.extract_strided_slice %698 {offsets = [0, 16], sizes = [2, 16], strides = [1, 1]} : vector<2x32xf32> to vector<2x16xf32>
    %703 = vector.extract_strided_slice %698 {offsets = [0, 16], sizes = [2, 16], strides = [1, 1]} : vector<2x32xf32> to vector<2x16xf32>
    %704 = arith.mulf %702, %703 : vector<2x16xf32>
    %705 = arith.addf %701, %704 : vector<2x16xf32>
    %cst_85 = arith.constant dense<0.000000e+00> : vector<2x32xf32>
    %706 = tpu.matmul %705, %8, %cst_85 {dimension_numbers = #tpu.dot_dimension_numbers<[1], [0], [0], [1], [0, 0, 1, 1], [], []>} : vector<2x16xf32>, vector<16x32xf32>, vector<2x32xf32> -> vector<2x32xf32>
    %707 = vector.broadcast %10 : vector<1x32xf32> to vector<2x32xf32>
    %708 = arith.addf %706, %707 : vector<2x32xf32>
    %709 = arith.addf %647, %708 : vector<2x32xf32>
    %710 = arith.negf %709 : vector<2x32xf32>
    %711 = math.exp %710 : vector<2x32xf32>
    %cst_86 = arith.constant 1.000000e+00 : f32
    %712 = vector.broadcast %cst_86 : f32 to vector<2x32xf32>
    %713 = arith.addf %712, %711 : vector<2x32xf32>
    %714 = arith.divf %712, %713 : vector<2x32xf32>
    %715 = math.tanh %650 : vector<2x32xf32>
    %716 = arith.mulf %714, %715 : vector<2x32xf32>
    %717 = vector.broadcast %16 : vector<1x32xf32> to vector<2x32xf32>
    %718 = arith.mulf %716, %717 : vector<2x32xf32>
    %cst_87 = arith.constant dense<0.000000e+00> : vector<2xf32>
    %719 = vector.multi_reduction <add>, %718, %cst_87 [1] : vector<2x32xf32> to vector<2xf32>
    %720 = vector.shape_cast %719 : vector<2xf32> to vector<2x1xf32>
    %721 = vector.broadcast %18 : vector<1x1xf32> to vector<2x1xf32>
    %722 = arith.addf %720, %721 : vector<2x1xf32>
    %723 = vector.shape_cast %722 : vector<2x1xf32> to vector<2x1xf32>
    %724 = vector.broadcast %723 : vector<2x1xf32> to vector<2x128xf32>
    %c0_88 = arith.constant 0 : index
    %c0_89 = arith.constant 0 : index
    %725 = vector.load %arg3[%c0_88, %c0_89] : memref<2x128xf32, #tpu.memory_space<vmem>>, vector<2x128xf32>
    tpu.vector_store %arg3[%c0_88, %c0_89], %724 {strides = array<i32>} : memref<2x128xf32, #tpu.memory_space<vmem>>, vector<2x128xf32>,
    return
  }
  func.func @transform_0(%arg0: i32) -> (i32, i32) {
    %c0_i32 = arith.constant 0 : i32
    %c0_i32_0 = arith.constant 0 : i32
    %c0_i32_1 = arith.constant 0 : i32
    return %c0_i32, %c0_i32_0 : i32, i32
  }
  func.func @transform_1(%arg0: i32) -> (i32, i32) {
    %c0_i32 = arith.constant 0 : i32
    %c0_i32_0 = arith.constant 0 : i32
    %c0_i32_1 = arith.constant 0 : i32
    return %c0_i32, %c0_i32_0 : i32, i32
  }
  func.func @transform_2(%arg0: i32) -> (i32, i32) {
    %c0_i32 = arith.constant 0 : i32
    %c0_i32_0 = arith.constant 0 : i32
    %c0_i32_1 = arith.constant 0 : i32
    return %c0_i32, %c0_i32_0 : i32, i32
  }
}

</mosaic_0001>

<bundles_post_ra>
// kernel: tpu_custom_call.1
= control target key start
LH: loop header
LB: loop body
LE: loop exit
PB: predicated region body
PF: predicated region fallthrough
CT: control target
= control target key end

     0   :  { %7 = vsyncpa [#allocation3], 0  ;;  %s5734_s0 = inlined_call_operand.vmem [shape: f32[16,8], index: 0, kind: input, shape index: {}]   ;;  %s5735_s1 = inlined_call_operand.hbm [shape: f32[152,128], index: 1, kind: input, shape index: {}]   ;;  %s5736_s2 = inlined_call_operand.hbm [shape: f32[2,128], index: 2, kind: output, shape index: {}]  }
   0x1   :  { %8 = vsyncpa [#allocation4], 0  ;;  %s15_s11 = sshll.u32 %s5735_s1, 4  ;;  %s4715_s12 = smov [#allocation2]   ;;  %s16_s11 = int_to_ptr.hbm [resolvable:$true] %s15_s11 }
   0x2   :  { %s17_s13 = sshll.u32 %s4715_s12, 4  ;;  %s4716_s14 = smov 128   ;;  %s18_s13 = int_to_ptr.vmem [resolvable:$true] %s17_s13 }
   0x3   :  { %s4717_s15 = smov 8  }
   0x4   :  { %23 = dma.hbm_to_vmem [thread:$0]  %s16_s11, 2432, %s18_s13, [#allocation3], %s4716_s14, %s4716_s14, %s4717_s15  }
   0x5   :  { %4711 = dma.done.wait [#allocation3], 2432  }
   0x6   :  { %4712 = vsyncadd [#allocation3], 4294964864  ;;  %vm50_vm0 = vcmask 64512   ;;  %v4752_v0 = vld [vmem:[#allocation2 + $0x20] sm:$0xff]  ;;  %v4754_v1 = vld [vmem:[#allocation2 + $0x18] sm:$0xff]  ;;  %v4718_v6 = vmov 0.0  }
   0x7   :  { %v28_v2 = vld [vmem:[#allocation2] sm:$0xff]  ;;  %96 = vmatpush.msra.mxu1 %v4752_v0  ;;  %v4760_v4 = vld [vmem:[#allocation2 + $0x10] sm:$0xff]  ;;  %v4764_v5 = vld [vmem:[#allocation2 + $0x8] sm:$0xff]  ;;  %s4719_s17 = smov 64   ;;  %s4720_s18 = smov 32   ;;  %vm80_vm5 = vcmask 261120  }
   0x8   :  { %72 = vmatpush.msra.mxu0 %v28_v2  ;;  %v47_v3 = vld [vmem:[%s5734_s0] sm:$0xff]  ;;  %v4531_v7 = vld [vmem:[#allocation2 + $0x28] ss:$0 sm:$0xff]  ;;  %v4789_v31 = vld [vmem:[#allocation2 + $0x38] sm:$0xff]  ;;  %s4721_s19 = smov 96   ;;  %v4722_v41 = vmov 0  }
   0x9   :  { %4349 = vmatmul.msk.f32.vlgmr.msra.gmra.mxu0 %vm50_vm0, %v47_v3  ;;  %97 = vmatpush.msra.mxu1 %v4754_v1  ;;  %v4784_v29 = vld [vmem:[#allocation2 + $0x48] sm:$0xff]  ;;  %v4786_v30 = vld [vmem:[#allocation2 + $0x40] sm:$0xff]  ;;  %v4792_v32 = vld [vmem:[#allocation2 + $0x30] sm:$0xff]  ;;  %v4723_v54 = vmov 683565275   ;;  %s4732_s20 = smov 112  }
   0xa   :  { %155 = vmatpush.msra.mxu2 %v4784_v29  ;;  %v4809_v37 = vld [vmem:[#allocation2 + $0x50] ss:$0 sm:$0xff]  ;;  %4473 = vset.pattern.permute.xlu1 %v4722_v41  ;;  %v4724_v56 = vmov 2475754826   ;;  %v4725_v59 = vmov 2131351028  }
   0xb   :  { %98 = vmatpush.msra.mxu1 %v4760_v4  ;;  %v4726_v62 = vmov 2102212464   ;;  %v4727_v3 = vmov 920167782   ;;  %s4339_s26 = sshll.u32 %s5736_s2, 4  ;;  %s4340_s26 = int_to_ptr.hbm [resolvable:$true] %s4339_s26 }
   0xc   :  { %156 = vmatpush.msra.mxu2 %v4786_v30 }
   0xd   :  { %99 = vmatpush.msra.mxu1 %v4764_v5 }
   0xe   :  { %100 = vmatmul.f32.vlgmr.msra.gmra.mxu1 %v4718_v6  ;;  %157 = vmatpush.msra.mxu2 %v4789_v31 }
   0xf   :  { %625 = vmatpush.msrb.mxu1 %v4752_v0 }
  0x10   :  { %158 = vmatpush.msra.mxu2 %v4792_v32 }
  0x11   :  { %626 = vmatpush.msrb.mxu1 %v4754_v1 }
  0x12   :  { %689 = vmatpush.msrb.mxu2 %v4784_v29 }
  0x13   :  { %627 = vmatpush.msrb.mxu1 %v4760_v4 }
  0x14   :  { %690 = vmatpush.msrb.mxu2 %v4786_v30 }
  0x15   :  { %628 = vmatpush.msrb.mxu1 %v4764_v5 }
  0x16   :  { %691 = vmatpush.msrb.mxu2 %v4789_v31 }
  0x17   :  { %1155 = vmatpush.msra.mxu1 %v4752_v0 }
  0x18   :  { %692 = vmatpush.msrb.mxu2 %v4792_v32 }
  0x19   :  { %1156 = vmatpush.msra.mxu1 %v4754_v1 }
  0x1b   :  { %1157 = vmatpush.msra.mxu1 %v4760_v4 }
  0x1d   :  { %1158 = vmatpush.msra.mxu1 %v4764_v5 }
  0x86   :  { %v74_v8 = vpop.f32.mrf.mxu0 }
  0x87   :  { %v4776_v9 = vadd.f32 %v4531_v7, %v74_v8  ;;  %v4728_v8 = vmov 1326507024  }
  0x8b   :  { %v101_v10 = vpop.f32.mrf.mxu1 }
  0x8c   :  { %v4779_v11 = vadd.f32 %v101_v10, %v4776_v9 }
  0x8e   :  { %v4351_v12 = vmul.f32 -1.442695, %v4779_v11 }
  0x90   :  { %4536 = vpow2.f32 %v4351_v12 }
  0x96   :  { %v4537_v13 = vpop.eup %4536 }
  0x97   :  { %v108_v14 = vadd.f32 1.0, %v4537_v13 }
  0x99   :  { %4538 = vrcp.f32 %v108_v14  ;;  %v120_v18 = vand.u32 2147483648, %v108_v14  ;;  %v118_v20 = vand.u32 2147483647, %v108_v14  ;;  %vm114_vm2 = vweird.f32 %v108_v14 }
  0x9b   :  { %v121_v22 = vor.u32 1.1754944e-38, %v120_v18  ;;  %vm119_vm4 = vcmp.eq.f32.partialorder %v118_v20, 8.507059e+37 }
  0x9f   :  { %v4539_v15 = vpop.eup %4538 }
  0xa0   :  { %v110_v16 = vmul.f32 %v4539_v15, %v108_v14  ;;  %vm115_vm1 = vweird.f32 %v4539_v15 }
  0xa1   :  { %vm116_vm3 = vmor %vm114_vm2, %vm115_vm1 }
  0xa2   :  { %v111_v17 = vsub.f32 1.0, %v110_v16 }
  0xa4   :  { %v112_v19 = vmul.f32 %v4539_v15, %v111_v17 }
  0xa6   :  { %v113_v21 = vadd.f32 %v4539_v15, %v112_v19 }
  0xa8   :  { %v117_v23 = vsel %vm116_vm3, %v4539_v15, %v113_v21 }
  0xa9   :  { %v122_v24 = vsel %vm119_vm4, %v121_v22, %v117_v23 }
  0xaa   :  { %v124_v25 = vmul.f32 2.0, %v122_v24  ;;  %v126_v33 = vmul.f32 0.0, %v122_v24 }
  0xac   :  { %v4352_v26 = vadd.f32 -1.0, %v124_v25 }
  0xae   :  { %128 = vrot.lane.b32.xlu0 %v4352_v26, %s4719_s17 }
 0x120   :  { %v129_v27 = vpop.permute.xlu0 %128 }
 0x121   :  { %v131_v28 = vmul.f32 %v129_v27, %v122_v24 }
 0x123   :  { %133 = vrot.lane.b32.xlu0 %v131_v28, %s4720_s18 }
 0x195   :  { %v134_v34 = vpop.permute.xlu0 %133 }
 0x196   :  { %v4800_v35 = vadd.f32 %v134_v34, %v126_v33 }
 0x198   :  { %139 = vrot.lane.b32.xlu1 %v4800_v35, %s4721_s19 }
 0x20a   :  { %v140_v36 = vpop.permute.xlu1 %139 }
 0x20b   :  { %4353 = vmatmul.msk.f32.vlgmr.msra.gmra.mxu2 %vm80_vm5, %v140_v36 }
 0x20c   :  { %1219 = vmatpush.msra.mxu2 %v4784_v29 }
 0x20e   :  { %1220 = vmatpush.msra.mxu2 %v4786_v30 }
 0x210   :  { %1221 = vmatpush.msra.mxu2 %v4789_v31 }
 0x212   :  { %1222 = vmatpush.msra.mxu2 %v4792_v32 }
 0x28e   :  { %v160_v38 = vpop.f32.mrf.mxu2 }
 0x28f   :  { %v161_v39 = vadd.f32 %v4809_v37, %v160_v38 }
 0x291   :  { %4540 = vtanh.f32 %v161_v39 }
 0x292   :  { %4542 = vtanh.f32 %v4800_v35 }
 0x297   :  { %v4541_v40 = vpop.eup %4540 }
 0x298   :  { %v4813_v42 = vmul.f32 1.5707964, %v4541_v40 }
 0x29a   :  { %v168_v43 = vand.u32 2139095040, %v4813_v42  ;;  %v165_v46 = vand.u32 2147483647, %v4813_v42  ;;  %vm167_vm3 = vcmp.lt.s32.totalorder %v4813_v42, 0 }
 0x29c   :  { %v169_v44 = vshrl.u32 %v168_v43, 23  ;;  %v172_v48 = vand.u32 8388607, %v165_v46  ;;  %vm166_vm4 = vcmp.le.f32.partialorder %v165_v46, 0.7853982 }
 0x29e   :  { %v4354_v45 = vadd.s32 4294967169, %v169_v44  ;;  %v173_v52 = vor.u32 8388608, %v172_v48 }
 0x2a0   :  { %v175_v47 = vadd.s32 1, %v4354_v45  ;;  %v4839_v17 = vshll.u32 %v173_v52, 8 }
 0x2a2   :  { %vm176_vm6 = vcmp.gt.s32.totalorder %v175_v47, 0  ;;  %v214_v26 = vand.u32 65535, %v4839_v17  ;;  %v215_v27 = vshrl.u32 %v4839_v17, 16 }
 0x2a3   :  { %v177_v49 = vsel %vm176_vm6, %v175_v47, 0 }
 0x2a4   :  { %v179_v50 = vand.u32 31, %v177_v49  ;;  %v4821_v53 = vshrl.u32 %v177_v49, 5 }
 0x2a6   :  { %v4819_v51 = vsub.s32 32, %v179_v50  ;;  %v182_v55 = vshll.u32 %v4723_v54, %v179_v50  ;;  %v185_v57 = vshll.u32 %v4724_v56, %v179_v50  ;;  %v188_v61 = vshll.u32 %v4725_v59, %v179_v50 }
 0x2a7   :  { %v191_v2 = vshll.u32 %v4726_v62, %v179_v50  ;;  %v194_v7 = vshll.u32 %v4727_v3, %v179_v50  ;;  %vm197_vm7 = vcmp.lt.s32.totalorder %v4821_v53, 1  ;;  %vm200_vm8 = vcmp.lt.s32.totalorder %v4821_v53, 4 }
 0x2a8   :  { %v183_v58 = vshrl.u32 %v4724_v56, %v4819_v51  ;;  %v186_v60 = vshrl.u32 %v4725_v59, %v4819_v51  ;;  %v189_v63 = vshrl.u32 %v4726_v62, %v4819_v51  ;;  %v192_v6 = vshrl.u32 %v4727_v3, %v4819_v51 }
 0x2a9   :  { %v195_v10 = vshrl.u32 %v4728_v8, %v4819_v51  ;;  %vm199_vm9 = vcmp.lt.s32.totalorder %v4821_v53, 3  ;;  %vm198_vm10 = vcmp.lt.s32.totalorder %v4821_v53, 2 }
 0x2aa   :  { %v184_v12 = vor.u32 %v183_v58, %v182_v55  ;;  %v187_v13 = vor.u32 %v186_v60, %v185_v57  ;;  %v190_v14 = vor.u32 %v189_v63, %v188_v61  ;;  %v193_v15 = vor.u32 %v192_v6, %v191_v2 }
 0x2ab   :  { %v196_v16 = vor.u32 %v195_v10, %v194_v7  ;;  %v181_v10 = vshrl.u32 %v4723_v54, %v4819_v51 }
 0x2ac   :  { %v205_v18 = vsel %vm197_vm7, %v184_v12, %v187_v13  ;;  %v209_v19 = vsel %vm197_vm7, %v187_v13, %v190_v14  ;;  %v206_v20 = vsel %vm200_vm8, %v193_v15, 920167782  ;;  %v202_v2 = vsel %vm200_vm8, %v190_v14, 2102212464 }
 0x2ad   :  { %v210_v21 = vsel %vm200_vm8, %v196_v16, 1326507024  ;;  %v207_v22 = vsel %vm199_vm9, %v190_v14, %v206_v20 }
 0x2ae   :  { %v211_v23 = vsel %vm199_vm9, %v193_v15, %v210_v21  ;;  %v208_v24 = vsel %vm198_vm10, %v205_v18, %v207_v22  ;;  %v201_v21 = vsel %vm197_vm7, %v181_v10, %v184_v12  ;;  %v203_v22 = vsel %vm199_vm9, %v187_v13, %v202_v2 }
 0x2af   :  { %v212_v25 = vsel %vm198_vm10, %v209_v19, %v211_v23  ;;  %v238_v34 = vand.u32 65535, %v208_v24  ;;  %v239_v36 = vshrl.u32 %v208_v24, 16  ;;  %v204_v51 = vsel %vm198_vm10, %v201_v21, %v203_v22 }
 0x2b0   :  { %v216_v28 = vand.u32 65535, %v212_v25  ;;  %v217_v33 = vshrl.u32 %v212_v25, 16  ;;  %v4730_v13 = vmov 1  }
 0x2b1   :  { %v241_v40 = vmul.u32 %v239_v36, %v214_v26  ;;  %v242_v43 = vmul.u32 %v238_v34, %v215_v27  ;;  %v240_v48 = vmul.u32 %v238_v34, %v214_v26  ;;  %v243_v55 = vmul.u32 %v239_v36, %v215_v27  ;;  %4474 = vset.pattern.permute.xlu2 %v4730_v13 }
 0x2b2   :  { %v219_v38 = vmul.u32 %v217_v33, %v214_v26  ;;  %v220_v39 = vmul.u32 %v216_v28, %v215_v27  ;;  %v218_v44 = vmul.u32 %v216_v28, %v214_v26  ;;  %v221_v47 = vmul.u32 %v217_v33, %v215_v27 }
 0x2b3   :  { %v244_v49 = vshll.u32 %v241_v40, 16  ;;  %v246_v58 = vshll.u32 %v242_v43, 16  ;;  %v245_v19 = vshrl.u32 %v241_v40, 16  ;;  %v247_v24 = vshrl.u32 %v242_v43, 16 }
 0x2b4   :  { %v222_v45 = vshll.u32 %v219_v38, 16  ;;  %v224_v50 = vshll.u32 %v220_v39, 16  ;;  %v223_v15 = vshrl.u32 %v219_v38, 16  ;;  %v225_v14 = vshrl.u32 %v220_v39, 16 }
 0x2b5   :  { %vm248_vm12 = vc.u32 %v240_v48, %v244_v49  ;;  %v250_v60 = vadd.s32 %v244_v49, %v240_v48  ;;  %v258_v34 = vmul.u32 %v4839_v17, %v204_v51 }
 0x2b6   :  { %vm226_vm11 = vc.u32 %v218_v44, %v222_v45  ;;  %v228_v52 = vadd.s32 %v222_v45, %v218_v44  ;;  %v249_v63 = vsel %vm248_vm12, 1, %v4722_v41  ;;  %v4729_v44 = vmov 3  }
 0x2b7   :  { %v227_v57 = vsel %vm226_vm11, 1, %v4722_v41  ;;  %v251_v7 = vadd.s32 %v249_v63, %v243_v55  ;;  %vm252_vm14 = vc.u32 %v250_v60, %v246_v58  ;;  %v254_v27 = vadd.s32 %v250_v60, %v246_v58  ;;  %4476 = vset.pattern.permute.xlu0 %v4729_v44 }
 0x2b8   :  { %v229_v61 = vadd.s32 %v227_v57, %v221_v47  ;;  %vm230_vm13 = vc.u32 %v228_v52, %v224_v50  ;;  %v253_v18 = vsel %vm252_vm14, 1, %v4722_v41  ;;  %vm308_vm12 = vweird.f32 %v4813_v42 }
 0x2b9   :  { %v231_v6 = vsel %vm230_vm13, 1, %v4722_v41  ;;  %v255_v20 = vadd.s32 %v253_v18, %v251_v7  ;;  %vm524_vm13 = vcmask 130048  }
 0x2ba   :  { %v233_v16 = vadd.s32 %v231_v6, %v229_v61 }
 0x2bb   :  { %v256_v25 = vadd.s32 %v255_v20, %v245_v19 }
 0x2bc   :  { %v234_v23 = vadd.s32 %v233_v16, %v223_v15 }
 0x2bd   :  { %v257_v28 = vadd.s32 %v256_v25, %v247_v24 }
 0x2be   :  { %v235_v26 = vadd.s32 %v234_v23, %v225_v14 }
 0x2bf   :  { %v261_v33 = vadd.s32 1, %v257_v28 }
 0x2c0   :  { %vm260_vm15 = vc.u32 %v235_v26, %v254_v27  ;;  %v259_v17 = vadd.s32 %v254_v27, %v235_v26 }
 0x2c1   :  { %v262_v36 = vsel %vm260_vm15, %v261_v33, %v257_v28 }
 0x2c2   :  { %v263_v38 = vadd.s32 %v262_v36, %v258_v34 }
 0x2c4   :  { %v264_v12 = vadd.s32 536870912, %v263_v38 }
 0x2c6   :  { %v265_v40 = vshrl.u32 %v264_v12, 30 }
 0x2c8   :  { %v266_v39 = vshll.u32 %v265_v40, 30  ;;  %v289_v16 = vsub.s32 4, %v265_v40 }
 0x2ca   :  { %v267_v43 = vsub.s32 %v263_v38, %v266_v39  ;;  %v290_v22 = vsel %vm167_vm3, %v289_v16, %v265_v40 }
 0x2cb   :  { %v292_v24 = vsel %vm166_vm4, 0, %v290_v22 }
 0x2cc   :  { %vm268_vm1 = vcmp.lt.s32.totalorder %v267_v43, 0  ;;  %v269_v53 = vsub.s32 0, %v267_v43  ;;  %v463_v28 = vadd.s32 3, %v292_v24  ;;  %v309_v38 = vand.u32 3, %v292_v24 }
 0x2ce   :  { %v270_v45 = vsel %vm268_vm1, %v269_v53, %v267_v43  ;;  %v464_v12 = vand.u32 3, %v463_v28  ;;  %vm310_vm6 = vcmp.lt.s32.totalorder %v309_v38, 2  ;;  %vm311_vm7 = vcmp.eq.s32.totalorder %v309_v38, 0 }
 0x2cf   :  { %v271_v47 = vclz %v270_v45  ;;  %vm314_vm8 = vcmp.eq.s32.totalorder %v309_v38, 2  ;;  %v4918_v38 = vld [vmem:[#allocation2 + $0x58] sm:$0xff] }
 0x2d0   :  { %vm465_vm9 = vcmp.lt.s32.totalorder %v464_v12, 2  ;;  %vm466_vm10 = vcmp.eq.s32.totalorder %v464_v12, 0  ;;  %vm469_vm11 = vcmp.eq.s32.totalorder %v464_v12, 2 }
 0x2d1   :  { %v4355_v48 = vadd.s32 4294967294, %v271_v47 }
 0x2d3   :  { %vm4356_vm2 = vcmp.lt.s32.totalorder %v4355_v48, 0 }
 0x2d4   :  { %v274_v49 = vsel %vm4356_vm2, 0, %v4355_v48 }
 0x2d5   :  { %v275_v50 = vsub.s32 32, %v274_v49  ;;  %v279_v52 = vsub.s32 4294967266, %v274_v49  ;;  %v276_v55 = vshll.u32 %v267_v43, %v274_v49 }
 0x2d7   :  { %v277_v57 = vshrl.u32 %v259_v17, %v275_v50  ;;  %v280_v58 = vadd.s32 127, %v279_v52 }
 0x2d9   :  { %v278_v60 = vor.u32 %v277_v57, %v276_v55  ;;  %v281_v61 = vshll.u32 %v280_v58, 23  ;;  %v4731_v57 = vmov 2  }
 0x2db   :  { %v282_v63 = vor.u32 4788187, %v281_v61  ;;  %v285_v6 = vcvt.s32.f32 %v278_v60  ;;  %v4893_v60 = vld [vmem:[#allocation2 + $0x78] sm:$0xff]  ;;  %v4895_v61 = vld [vmem:[#allocation2 + $0x70] sm:$0xff] }
 0x2dc   :  { %542 = vmatpush.msra.mxu3 %v4893_v60  ;;  %1071 = vmatpush.msrb.mxu0 %v4893_v60 }
 0x2dd   :  { %v283_v2 = vand.u32 2147483647, %v282_v63 }
 0x2de   :  { %543 = vmatpush.msra.mxu3 %v4895_v61  ;;  %1072 = vmatpush.msrb.mxu0 %v4895_v61 }
 0x2df   :  { %v286_v7 = vmul.f32 %v285_v6, %v283_v2 }
 0x2e0   :  { %1601 = vmatpush.msra.mxu0 %v4893_v60 }
 0x2e1   :  { %v287_v10 = vxor.u32 2147483648, %v286_v7 }
 0x2e2   :  { %1602 = vmatpush.msra.mxu0 %v4895_v61 }
 0x2e3   :  { %v288_v15 = vsel %vm167_vm3, %v287_v10, %v286_v7  ;;  %v44_v10 = vld [vmem:[#allocation2 + $0x80] sm:$0xf] }
 0x2e4   :  { %v291_v18 = vsel %vm166_vm4, %v4813_v42, %v288_v15  ;;  %v4543_v42 = vpop.eup %4542  ;;  %v4903_v15 = vperm.slane %v44_v10, 3  ;;  %v4905_v16 = vperm.slane %v44_v10, 0 }
 0x2e5   :  { %v293_v19 = vmul.f32 %v291_v18, %v291_v18 }
 0x2e7   :  { %v294_v20 = vmul.f32 -0.001358992, %v293_v19  ;;  %v301_v21 = vmul.f32 -0.00019511016, %v293_v19 }
 0x2e9   :  { %v295_v14 = vadd.f32 0.041655596, %v294_v20  ;;  %v302_v23 = vadd.f32 0.008332121, %v301_v21  ;;  %v4909_v20 = vperm.slane %v44_v10, 2 }
 0x2eb   :  { %v296_v25 = vmul.f32 %v295_v14, %v293_v19  ;;  %v303_v26 = vmul.f32 %v302_v23, %v293_v19 }
 0x2ed   :  { %v297_v27 = vadd.f32 -0.4999988, %v296_v25  ;;  %v304_v51 = vadd.f32 -0.16666654, %v303_v26 }
 0x2ef   :  { %v298_v33 = vmul.f32 %v297_v27, %v293_v19  ;;  %v305_v34 = vmul.f32 %v304_v51, %v293_v19  ;;  %v4907_v19 = vperm.slane %v44_v10, 1 }
 0x2f1   :  { %v299_v36 = vadd.f32 1.0, %v298_v33  ;;  %v306_v46 = vadd.f32 1.0, %v305_v34 }
 0x2f3   :  { %v307_v39 = vmul.f32 %v306_v46, %v291_v18  ;;  %v315_v43 = vxor.u32 2147483648, %v299_v36  ;;  %v4916_v46 = vld [vmem:[#allocation2 + $0x60] sm:$0xff] }
 0x2f4   :  { %572 = vmatpush.msrb.mxu3 %v4916_v46 }
 0x2f5   :  { %v312_v53 = vxor.u32 2147483648, %v307_v39  ;;  %v316_v45 = vsel %vm314_vm8, %v315_v43, %v307_v39  ;;  %v471_v48 = vsel %vm469_vm11, %v315_v43, %v307_v39 }
 0x2f6   :  { %573 = vmatpush.msrb.mxu3 %v4918_v38 }
 0x2f7   :  { %v313_v40 = vsel %vm311_vm7, %v299_v36, %v312_v53  ;;  %v468_v47 = vsel %vm466_vm10, %v299_v36, %v312_v53 }
 0x2f8   :  { %v317_v49 = vsel %vm310_vm6, %v313_v40, %v316_v45  ;;  %v472_v17 = vsel %vm465_vm9, %v468_v47, %v471_v48  ;;  %v4928_v40 = vld [vmem:[#allocation2 + $0x68] ss:$0 sm:$0xff] }
 0x2f9   :  { %v318_v50 = vsel %vm308_vm12, nan, %v317_v49  ;;  %v473_v52 = vsel %vm308_vm12, nan, %v472_v17 }
 0x2fa   :  { %v474_v55 = vsub.f32 %v473_v52, %v318_v50 }
 0x2fc   :  { %511 = vperm.xlu0 %4476, %v474_v55   ;;  %489 = vperm.xlu2 %4474, %v474_v55  }
 0x2fd   :  { %477 = vperm.xlu1 %4473, %v474_v55  }
 0x304   :  { %4475 = vset.pattern.permute.xlu2 %v4731_v57  ;;  %4483 = vset.pattern.permute.xlu0 %v4731_v57 }
 0x305   :  { %484 = vperm.xlu1 %4473, %v318_v50   ;;  %500 = vperm.xlu2 %4475, %v474_v55  }
 0x30d   :  { %4478 = vset.pattern.permute.xlu1 %v4731_v57  ;;  %4477 = vset.pattern.permute.xlu2 %v4730_v13 }
 0x30e   :  { %506 = vperm.xlu1 %4478, %v318_v50   ;;  %495 = vperm.xlu2 %4477, %v318_v50  }
 0x316   :  { %4479 = vset.pattern.permute.xlu2 %v4729_v44  ;;  %4481 = vset.pattern.permute.xlu1 %v4722_v41 }
 0x317   :  { %517 = vperm.xlu2 %4479, %v318_v50  }
 0x31f   :  { %604 = vrot.lane.b32.xlu2 %v4543_v42, %s4719_s17 }
 0x320   :  { %4480 = vset.pattern.permute.xlu2 %v4722_v41 }
 0x356   :  { %v490_v58 = vpop.permute.xlu2 %489 }
 0x357   :  { %v493_v23 = vmul.f32 %v4907_v19, %v490_v58 }
 0x35f   :  { %v501_v63 = vpop.permute.xlu2 %500 }
 0x360   :  { %v504_v24 = vmul.f32 %v4909_v20, %v501_v63 }
 0x368   :  { %v496_v6 = vpop.permute.xlu2 %495 }
 0x369   :  { %v498_v27 = vadd.f32 %v496_v6, %v493_v23 }
 0x36e   :  { %v512_v18 = vpop.permute.xlu0 %511 }
 0x36f   :  { %v478_v2 = vpop.permute.xlu1 %477  ;;  %v515_v21 = vmul.f32 %v4903_v15, %v512_v18 }
 0x370   :  { %v481_v22 = vmul.f32 %v4905_v16, %v478_v2 }
 0x371   :  { %v518_v14 = vpop.permute.xlu2 %517 }
 0x372   :  { %v520_v51 = vadd.f32 %v518_v14, %v515_v21 }
 0x377   :  { %v485_v7 = vpop.permute.xlu1 %484 }
 0x378   :  { %v487_v25 = vadd.f32 %v485_v7, %v481_v22 }
 0x379   :  { %v605_v21 = vpop.permute.xlu2 %604 }
 0x37a   :  { %v521_v33 = vmul.f32 %v498_v27, %v487_v25 }
 0x380   :  { %v507_v26 = vpop.permute.xlu1 %506 }
 0x381   :  { %v509_v28 = vadd.f32 %v507_v26, %v504_v24 }
 0x383   :  { %v522_v34 = vmul.f32 %v520_v51, %v509_v28 }
 0x385   :  { %v523_v36 = vmul.f32 %v522_v34, %v521_v33 }
 0x387   :  { %4360 = vmatmul.msk.f32.vlgmr.msra.gmra.mxu3 %vm524_vm13, %v523_v36 }
 0x388   :  { %1100 = vmatpush.msra.mxu3 %v4916_v46 }
 0x38a   :  { %1101 = vmatpush.msra.mxu3 %v4918_v38 }
 0x40a   :  { %v545_v12 = vpop.f32.mrf.mxu3 }
 0x40b   :  { %v548_v39 = vmul.f32 %v545_v12, %v545_v12 }
 0x40d   :  { %550 = vrot.lane.b32.xlu0 %v548_v39, %s4732_s20 }
 0x47f   :  { %v551_v43 = vpop.permute.xlu0 %550 }
 0x480   :  { %v553_v53 = vadd.f32 %v551_v43, %v548_v39 }
 0x482   :  { %4361 = vmatmul.msk.f32.vlgmr.msrb.gmra.mxu3 %vm524_vm13, %v553_v53 }
 0x483   :  { %1630 = vmatpush.msrb.mxu3 %v4916_v46 }
 0x485   :  { %1631 = vmatpush.msrb.mxu3 %v4918_v38 }
 0x505   :  { %v575_v45 = vpop.f32.mrf.mxu3 }
 0x506   :  { %v576_v47 = vadd.f32 %v4928_v40, %v575_v45 }
 0x508   :  { %579 = vrot.lane.b32.xlu1 %v576_v47, %s4721_s19 }
 0x57a   :  { %v580_v48 = vpop.permute.xlu1 %579 }
 0x57b   :  { %v582_v49 = vadd.f32 %v580_v48, %v4779_v11  ;;  %v658_v48 = vrot.slane %v4800_v35, 6 }
 0x57d   :  { %v4362_v17 = vmul.f32 -1.442695, %v582_v49 }
 0x57f   :  { %4544 = vpow2.f32 %v4362_v17 }
 0x585   :  { %v4545_v50 = vpop.eup %4544 }
 0x586   :  { %v586_v52 = vadd.f32 1.0, %v4545_v50 }
 0x588   :  { %4546 = vrcp.f32 %v586_v52  ;;  %v598_v63 = vand.u32 2147483648, %v586_v52  ;;  %v596_v6 = vand.u32 2147483647, %v586_v52  ;;  %vm592_vm15 = vweird.f32 %v586_v52 }
 0x58a   :  { %v599_v10 = vor.u32 1.1754944e-38, %v598_v63  ;;  %vm597_vm2 = vcmp.eq.f32.partialorder %v596_v6, 8.507059e+37 }
 0x58e   :  { %v4547_v55 = vpop.eup %4546 }
 0x58f   :  { %v588_v42 = vmul.f32 %v4547_v55, %v586_v52  ;;  %vm593_vm14 = vweird.f32 %v4547_v55 }
 0x590   :  { %vm594_vm1 = vmor %vm592_vm15, %vm593_vm14 }
 0x591   :  { %v589_v58 = vsub.f32 1.0, %v588_v42 }
 0x593   :  { %v590_v2 = vmul.f32 %v4547_v55, %v589_v58 }
 0x595   :  { %v591_v7 = vadd.f32 %v4547_v55, %v590_v2 }
 0x597   :  { %v595_v18 = vsel %vm594_vm1, %v4547_v55, %v591_v7 }
 0x598   :  { %v600_v11 = vsel %vm597_vm2, %v599_v10, %v595_v18 }
 0x599   :  { %v607_v22 = vmul.f32 %v605_v21, %v600_v11 }
 0x59b   :  { %609 = vrot.lane.b32.xlu0 %v607_v22, %s4720_s18 }
 0x60d   :  { %v610_v14 = vpop.permute.xlu0 %609 }
 0x60e   :  { %4363 = vmatmul.msk.f32.vlgmr.msrb.gmra.mxu1 %vm80_vm5, %v610_v14 }
 0x60f   :  { %1685 = vmatpush.msrb.mxu1 %v4752_v0 }
 0x611   :  { %1686 = vmatpush.msrb.mxu1 %v4754_v1 }
 0x613   :  { %1687 = vmatpush.msrb.mxu1 %v4760_v4 }
 0x615   :  { %1688 = vmatpush.msrb.mxu1 %v4764_v5 }
 0x68b   :  { %v630_v23 = vpop.f32.mrf.mxu1 }
 0x68c   :  { %v634_v24 = vrot.slane %v630_v23, 6 }
 0x68e   :  { %v4940_v25 = vadd.f32 %v634_v24, %v4776_v9 }
 0x690   :  { %v4364_v26 = vmul.f32 -1.442695, %v4940_v25 }
 0x692   :  { %4548 = vpow2.f32 %v4364_v26 }
 0x698   :  { %v4549_v27 = vpop.eup %4548 }
 0x699   :  { %v640_v51 = vadd.f32 1.0, %v4549_v27 }
 0x69b   :  { %4550 = vrcp.f32 %v640_v51  ;;  %v652_v34 = vand.u32 2147483648, %v640_v51  ;;  %v650_v4 = vand.u32 2147483647, %v640_v51  ;;  %vm646_vm4 = vweird.f32 %v640_v51 }
 0x69d   :  { %v653_v5 = vor.u32 1.1754944e-38, %v652_v34  ;;  %vm651_vm7 = vcmp.eq.f32.partialorder %v650_v4, 8.507059e+37 }
 0x6a1   :  { %v4551_v28 = vpop.eup %4550 }
 0x6a2   :  { %v642_v33 = vmul.f32 %v4551_v28, %v640_v51  ;;  %vm647_vm3 = vweird.f32 %v4551_v28 }
 0x6a3   :  { %vm648_vm6 = vmor %vm646_vm4, %vm647_vm3 }
 0x6a4   :  { %v643_v0 = vsub.f32 1.0, %v642_v33 }
 0x6a6   :  { %v644_v1 = vmul.f32 %v4551_v28, %v643_v0 }
 0x6a8   :  { %v645_v36 = vadd.f32 %v4551_v28, %v644_v1 }
 0x6aa   :  { %v649_v12 = vsel %vm648_vm6, %v4551_v28, %v645_v36 }
 0x6ab   :  { %v654_v39 = vsel %vm651_vm7, %v653_v5, %v649_v12 }
 0x6ac   :  { %v656_v43 = vmul.f32 2.0, %v654_v39  ;;  %v660_v49 = vmul.f32 %v658_v48, %v654_v39 }
 0x6ae   :  { %v4365_v53 = vadd.f32 -1.0, %v656_v43 }
 0x6b0   :  { %662 = vrot.lane.b32.xlu1 %v4365_v53, %s4719_s17 }
 0x722   :  { %v663_v45 = vpop.permute.xlu1 %662 }
 0x723   :  { %v665_v47 = vmul.f32 %v663_v45, %v654_v39 }
 0x725   :  { %667 = vrot.lane.b32.xlu2 %v665_v47, %s4720_s18 }
 0x77f   :  { %v668_v17 = vpop.permute.xlu2 %667 }
 0x780   :  { %v4946_v50 = vadd.f32 %v668_v17, %v660_v49 }
 0x782   :  { %v672_v52 = vrot.slane %v4946_v50, 2 }
 0x784   :  { %673 = vrot.lane.b32.xlu0 %v672_v52, %s4721_s19 }
 0x7f6   :  { %v674_v55 = vpop.permute.xlu0 %673 }
 0x7f7   :  { %4366 = vmatmul.msk.f32.vlgmr.msrb.gmra.mxu2 %vm80_vm5, %v674_v55 }
 0x7f8   :  { %1749 = vmatpush.msrb.mxu2 %v4784_v29 }
 0x7fa   :  { %1750 = vmatpush.msrb.mxu2 %v4786_v30 }
 0x7fc   :  { %1751 = vmatpush.msrb.mxu2 %v4789_v31 }
 0x7fe   :  { %1752 = vmatpush.msrb.mxu2 %v4792_v32 }
 0x87a   :  { %v694_v35 = vpop.f32.mrf.mxu2 }
 0x87b   :  { %v695_v42 = vadd.f32 %v4809_v37, %v694_v35 }
 0x87d   :  { %4552 = vtanh.f32 %v695_v42 }
 0x87e   :  { %4554 = vtanh.f32 %v4946_v50 }
 0x883   :  { %v4553_v58 = vpop.eup %4552 }
 0x884   :  { %v4956_v63 = vmul.f32 1.5707964, %v4553_v58 }
 0x886   :  { %v702_v2 = vand.u32 2139095040, %v4956_v63  ;;  %v699_v10 = vand.u32 2147483647, %v4956_v63  ;;  %vm701_vm7 = vcmp.lt.s32.totalorder %v4956_v63, 0 }
 0x888   :  { %v703_v6 = vshrl.u32 %v702_v2, 23  ;;  %v706_v30 = vand.u32 8388607, %v699_v10 }
 0x88a   :  { %v4367_v7 = vadd.s32 4294967169, %v703_v6  ;;  %v707_v21 = vor.u32 8388608, %v706_v30 }
 0x88c   :  { %v709_v29 = vadd.s32 1, %v4367_v7  ;;  %v4975_v5 = vshll.u32 %v707_v21, 8 }
 0x88e   :  { %vm710_vm8 = vcmp.gt.s32.totalorder %v709_v29, 0  ;;  %v748_v17 = vand.u32 65535, %v4975_v5  ;;  %v749_v52 = vshrl.u32 %v4975_v5, 16 }
 0x88f   :  { %v711_v31 = vsel %vm710_vm8, %v709_v29, 0  ;;  %vm700_vm8 = vcmp.le.f32.partialorder %v699_v10, 0.7853982 }
 0x890   :  { %v713_v32 = vand.u32 31, %v711_v31  ;;  %v4962_v37 = vshrl.u32 %v711_v31, 5 }
 0x892   :  { %v714_v18 = vsub.s32 32, %v713_v32  ;;  %v716_v11 = vshll.u32 %v4723_v54, %v713_v32  ;;  %v719_v22 = vshll.u32 %v4724_v56, %v713_v32  ;;  %v722_v24 = vshll.u32 %v4725_v59, %v713_v32 }
 0x893   :  { %v725_v27 = vshll.u32 %v4726_v62, %v713_v32  ;;  %v728_v28 = vshll.u32 %v4727_v3, %v713_v32  ;;  %vm731_vm9 = vcmp.lt.s32.totalorder %v4962_v37, 1  ;;  %vm734_vm10 = vcmp.lt.s32.totalorder %v4962_v37, 4 }
 0x894   :  { %v717_v14 = vshrl.u32 %v4724_v56, %v714_v18  ;;  %v720_v23 = vshrl.u32 %v4725_v59, %v714_v18  ;;  %v723_v26 = vshrl.u32 %v4726_v62, %v714_v18  ;;  %v726_v51 = vshrl.u32 %v4727_v3, %v714_v18 }
 0x895   :  { %v729_v33 = vshrl.u32 %v4728_v8, %v714_v18  ;;  %vm733_vm11 = vcmp.lt.s32.totalorder %v4962_v37, 3  ;;  %vm732_vm12 = vcmp.lt.s32.totalorder %v4962_v37, 2 }
 0x896   :  { %v718_v0 = vor.u32 %v717_v14, %v716_v11  ;;  %v721_v34 = vor.u32 %v720_v23, %v719_v22  ;;  %v724_v1 = vor.u32 %v723_v26, %v722_v24  ;;  %v727_v4 = vor.u32 %v726_v51, %v725_v27 }
 0x897   :  { %v730_v36 = vor.u32 %v729_v33, %v728_v28 }
 0x898   :  { %v739_v12 = vsel %vm731_vm9, %v718_v0, %v721_v34  ;;  %v743_v39 = vsel %vm731_vm9, %v721_v34, %v724_v1  ;;  %v740_v43 = vsel %vm734_vm10, %v727_v4, 920167782  ;;  %v736_v33 = vsel %vm734_vm10, %v724_v1, 2102212464 }
 0x899   :  { %v744_v53 = vsel %vm734_vm10, %v730_v36, 1326507024  ;;  %v741_v45 = vsel %vm733_vm11, %v724_v1, %v740_v43 }
 0x89a   :  { %v745_v47 = vsel %vm733_vm11, %v727_v4, %v744_v53  ;;  %v742_v48 = vsel %vm732_vm12, %v739_v12, %v741_v45  ;;  %v715_v12 = vshrl.u32 %v4723_v54, %v714_v18 }
 0x89b   :  { %v746_v49 = vsel %vm732_vm12, %v743_v39, %v745_v47  ;;  %v772_v42 = vand.u32 65535, %v742_v48  ;;  %v773_v58 = vshrl.u32 %v742_v48, 16 }
 0x89c   :  { %v750_v55 = vand.u32 65535, %v746_v49  ;;  %v751_v35 = vshrl.u32 %v746_v49, 16  ;;  %v735_v48 = vsel %vm731_vm9, %v715_v12, %v718_v0  ;;  %v737_v49 = vsel %vm733_vm11, %v721_v34, %v736_v33 }
 0x89d   :  { %v775_v7 = vmul.u32 %v773_v58, %v748_v17  ;;  %v776_v29 = vmul.u32 %v772_v42, %v749_v52  ;;  %v774_v21 = vmul.u32 %v772_v42, %v748_v17  ;;  %v777_v23 = vmul.u32 %v773_v58, %v749_v52 }
 0x89e   :  { %v753_v2 = vmul.u32 %v751_v35, %v748_v17  ;;  %v754_v6 = vmul.u32 %v750_v55, %v749_v52  ;;  %v752_v30 = vmul.u32 %v750_v55, %v748_v17  ;;  %v755_v32 = vmul.u32 %v751_v35, %v749_v52 }
 0x89f   :  { %v778_v11 = vshll.u32 %v775_v7, 16  ;;  %v780_v26 = vshll.u32 %v776_v29, 16  ;;  %v779_v45 = vshrl.u32 %v775_v7, 16  ;;  %v781_v52 = vshrl.u32 %v776_v29, 16 }
 0x8a0   :  { %v756_v31 = vshll.u32 %v753_v2, 16  ;;  %v758_v22 = vshll.u32 %v754_v6, 16  ;;  %v757_v39 = vshrl.u32 %v753_v2, 16  ;;  %v759_v17 = vshrl.u32 %v754_v6, 16 }
 0x8a1   :  { %vm782_vm15 = vc.u32 %v774_v21, %v778_v11  ;;  %v784_v27 = vadd.s32 %v778_v11, %v774_v21  ;;  %v738_v18 = vsel %vm732_vm12, %v735_v48, %v737_v49 }
 0x8a2   :  { %vm760_vm14 = vc.u32 %v752_v30, %v756_v31  ;;  %v762_v14 = vadd.s32 %v756_v31, %v752_v30  ;;  %v783_v28 = vsel %vm782_vm15, 1, %v4722_v41  ;;  %v792_v7 = vmul.u32 %v4975_v5, %v738_v18 }
 0x8a3   :  { %v761_v24 = vsel %vm760_vm14, 1, %v4722_v41  ;;  %v785_v36 = vadd.s32 %v783_v28, %v777_v23  ;;  %vm786_vm2 = vc.u32 %v784_v27, %v780_v26  ;;  %v788_v42 = vadd.s32 %v784_v27, %v780_v26 }
 0x8a4   :  { %v763_v51 = vadd.s32 %v761_v24, %v755_v32  ;;  %vm764_vm1 = vc.u32 %v762_v14, %v758_v22  ;;  %v787_v53 = vsel %vm786_vm2, 1, %v4722_v41 }
 0x8a5   :  { %v765_v4 = vsel %vm764_vm1, 1, %v4722_v41  ;;  %v789_v47 = vadd.s32 %v787_v53, %v785_v36  ;;  %vm842_vm1 = vweird.f32 %v4956_v63 }
 0x8a6   :  { %v767_v43 = vadd.s32 %v765_v4, %v763_v51 }
 0x8a7   :  { %v790_v55 = vadd.s32 %v789_v47, %v779_v45 }
 0x8a8   :  { %v768_v1 = vadd.s32 %v767_v43, %v757_v39 }
 0x8a9   :  { %v791_v58 = vadd.s32 %v790_v55, %v781_v52 }
 0x8aa   :  { %v769_v35 = vadd.s32 %v768_v1, %v759_v17 }
 0x8ab   :  { %v795_v2 = vadd.s32 1, %v791_v58 }
 0x8ac   :  { %vm794_vm3 = vc.u32 %v769_v35, %v788_v42  ;;  %v793_v37 = vadd.s32 %v788_v42, %v769_v35 }
 0x8ad   :  { %v796_v30 = vsel %vm794_vm3, %v795_v2, %v791_v58 }
 0x8ae   :  { %v797_v31 = vadd.s32 %v796_v30, %v792_v7 }
 0x8b0   :  { %v798_v0 = vadd.s32 536870912, %v797_v31 }
 0x8b2   :  { %v799_v32 = vshrl.u32 %v798_v0, 30 }
 0x8b4   :  { %v800_v21 = vshll.u32 %v799_v32, 30  ;;  %v823_v53 = vsub.s32 4, %v799_v32 }
 0x8b6   :  { %v801_v34 = vsub.s32 %v797_v31, %v800_v21  ;;  %v824_v17 = vsel %vm701_vm7, %v823_v53, %v799_v32 }
 0x8b7   :  { %v826_v55 = vsel %vm700_vm8, 0, %v824_v17 }
 0x8b8   :  { %vm802_vm4 = vcmp.lt.s32.totalorder %v801_v34, 0  ;;  %v803_v6 = vsub.s32 0, %v801_v34  ;;  %v997_v2 = vadd.s32 3, %v826_v55  ;;  %v843_v0 = vand.u32 3, %v826_v55 }
 0x8ba   :  { %v804_v29 = vsel %vm802_vm4, %v803_v6, %v801_v34  ;;  %v998_v21 = vand.u32 3, %v997_v2  ;;  %vm844_vm9 = vcmp.lt.s32.totalorder %v843_v0, 2  ;;  %vm845_vm10 = vcmp.eq.s32.totalorder %v843_v0, 0  ;;  %v4555_v2 = vpop.eup %4554 }
 0x8bb   :  { %v805_v11 = vclz %v804_v29  ;;  %vm848_vm11 = vcmp.eq.s32.totalorder %v843_v0, 2 }
 0x8bc   :  { %vm999_vm12 = vcmp.lt.s32.totalorder %v998_v21, 2  ;;  %vm1000_vm14 = vcmp.eq.s32.totalorder %v998_v21, 0  ;;  %vm1003_vm15 = vcmp.eq.s32.totalorder %v998_v21, 2 }
 0x8bd   :  { %v4368_v22 = vadd.s32 4294967294, %v805_v11 }
 0x8bf   :  { %vm4369_vm6 = vcmp.lt.s32.totalorder %v4368_v22, 0 }
 0x8c0   :  { %v808_v14 = vsel %vm4369_vm6, 0, %v4368_v22 }
 0x8c1   :  { %v809_v23 = vsub.s32 32, %v808_v14  ;;  %v813_v24 = vsub.s32 4294967266, %v808_v14  ;;  %v810_v26 = vshll.u32 %v801_v34, %v808_v14 }
 0x8c3   :  { %v811_v27 = vshrl.u32 %v793_v37, %v809_v23  ;;  %v814_v51 = vadd.s32 127, %v813_v24 }
 0x8c5   :  { %v812_v5 = vor.u32 %v811_v27, %v810_v26  ;;  %v815_v28 = vshll.u32 %v814_v51, 23 }
 0x8c7   :  { %v816_v33 = vor.u32 4788187, %v815_v28  ;;  %v819_v36 = vcvt.s32.f32 %v812_v5 }
 0x8c9   :  { %v817_v4 = vand.u32 2147483647, %v816_v33 }
 0x8cb   :  { %v820_v12 = vmul.f32 %v819_v36, %v817_v4 }
 0x8cd   :  { %v821_v39 = vxor.u32 2147483648, %v820_v12 }
 0x8cf   :  { %v822_v43 = vsel %vm701_vm7, %v821_v39, %v820_v12 }
 0x8d0   :  { %v825_v45 = vsel %vm700_vm8, %v4956_v63, %v822_v43  ;;  %v48_v63 = vld [vmem:[%s5734_s0 + $0x8] sm:$0xff]  ;;  %s4733_s0 = smov [#allocation5]  }
 0x8d1   :  { %v827_v47 = vmul.f32 %v825_v45, %v825_v45  ;;  %4350 = vmatmul.msk.f32.gmra.mxu0 %vm50_vm0, %v48_v63  ;;  %v5048_v63 = vld [vmem:[#allocation2 + $0x20] sm:$0xff]  ;;  %s4337_s23 = sshll.u32 %s4733_s0, 4  ;;  %s4338_s23 = int_to_ptr.vmem [resolvable:$true] %s4337_s23 }
 0x8d3   :  { %v828_v48 = vmul.f32 -0.001358992, %v827_v47  ;;  %v835_v49 = vmul.f32 -0.00019511016, %v827_v47 }
 0x8d5   :  { %v829_v1 = vadd.f32 0.041655596, %v828_v48  ;;  %v836_v52 = vadd.f32 0.008332121, %v835_v49 }
 0x8d7   :  { %v830_v35 = vmul.f32 %v829_v1, %v827_v47  ;;  %v837_v42 = vmul.f32 %v836_v52, %v827_v47 }
 0x8d9   :  { %v831_v18 = vadd.f32 -0.4999988, %v830_v35  ;;  %v838_v58 = vadd.f32 -0.16666654, %v837_v42 }
 0x8db   :  { %v832_v7 = vmul.f32 %v831_v18, %v827_v47  ;;  %v839_v30 = vmul.f32 %v838_v58, %v827_v47 }
 0x8dd   :  { %v833_v31 = vadd.f32 1.0, %v832_v7  ;;  %v840_v10 = vadd.f32 1.0, %v839_v30 }
 0x8df   :  { %v841_v34 = vmul.f32 %v840_v10, %v825_v45  ;;  %v849_v6 = vxor.u32 2147483648, %v833_v31 }
 0x8e1   :  { %v846_v29 = vxor.u32 2147483648, %v841_v34  ;;  %v850_v11 = vsel %vm848_vm11, %v849_v6, %v841_v34  ;;  %v1005_v14 = vsel %vm1003_vm15, %v849_v6, %v841_v34 }
 0x8e3   :  { %v847_v32 = vsel %vm845_vm10, %v833_v31, %v846_v29  ;;  %v1002_v22 = vsel %vm1000_vm14, %v833_v31, %v846_v29 }
 0x8e4   :  { %v851_v37 = vsel %vm844_vm9, %v847_v32, %v850_v11  ;;  %v1006_v23 = vsel %vm999_vm12, %v1002_v22, %v1005_v14 }
 0x8e5   :  { %v852_v24 = vsel %vm842_vm1, nan, %v851_v37  ;;  %v1007_v26 = vsel %vm842_vm1, nan, %v1006_v23 }
 0x8e6   :  { %1017 = vperm.xlu2 %4480, %v852_v24   ;;  %v1008_v27 = vsub.f32 %v1007_v26, %v852_v24 }
 0x8e8   :  { %1032 = vperm.xlu0 %4483, %v1008_v27   ;;  %1011 = vperm.xlu1 %4481, %v1008_v27  }
 0x8ee   :  { %4482 = vset.pattern.permute.xlu2 %v4730_v13 }
 0x8ef   :  { %1022 = vperm.xlu2 %4482, %v1008_v27  }
 0x8f0   :  { %4487 = vset.pattern.permute.xlu0 %v4729_v44  ;;  %4484 = vset.pattern.permute.xlu1 %v4729_v44 }
 0x8f1   :  { %1047 = vperm.xlu0 %4487, %v852_v24   ;;  %1042 = vperm.xlu1 %4484, %v1008_v27  }
 0x8f7   :  { %4486 = vset.pattern.permute.xlu2 %v4731_v57 }
 0x8f8   :  { %1037 = vperm.xlu2 %4486, %v852_v24  }
 0x8f9   :  { %4485 = vset.pattern.permute.xlu1 %v4730_v13  ;;  %4489 = vset.pattern.permute.xlu0 %v4722_v41 }
 0x8fa   :  { %1027 = vperm.xlu1 %4485, %v852_v24  }
 0x900   :  { %4488 = vset.pattern.permute.xlu2 %v4722_v41 }
 0x940   :  { %v1018_v51 = vpop.permute.xlu2 %1017 }
 0x949   :  { %v1023_v33 = vpop.permute.xlu2 %1022 }
 0x94a   :  { %v1025_v53 = vmul.f32 %v1023_v33, %v4907_v19 }
 0x94e   :  { %v5035_v42 = vpop.f32.mrf.mxu0 }
 0x952   :  { %v1038_v47 = vpop.permute.xlu2 %1037 }
 0x95a   :  { %v1012_v5 = vpop.permute.xlu1 %1011  ;;  %v1033_v28 = vpop.permute.xlu0 %1032 }
 0x95b   :  { %v1035_v12 = vmul.f32 %v1033_v28, %v4909_v20  ;;  %v1014_v39 = vmul.f32 %v1012_v5, %v4905_v16  ;;  %v5054_v5 = vld [vmem:[#allocation2 + $0x10] sm:$0xff]  ;;  %v5057_v28 = vld [vmem:[#allocation2 + $0x8] sm:$0xff] }
 0x95d   :  { %v1040_v49 = vadd.f32 %v1038_v47, %v1035_v12  ;;  %v1020_v17 = vadd.f32 %v1018_v51, %v1014_v39  ;;  %v5051_v51 = vld [vmem:[#allocation2 + $0x18] sm:$0xff] }
 0x963   :  { %v1043_v4 = vpop.permute.xlu1 %1042  ;;  %v1048_v43 = vpop.permute.xlu0 %1047 }
 0x964   :  { %v1045_v36 = vmul.f32 %v1043_v4, %v4903_v15 }
 0x966   :  { %v1050_v45 = vadd.f32 %v1048_v43, %v1045_v36 }
 0x968   :  { %v1052_v52 = vmul.f32 %v1050_v45, %v1040_v49 }
 0x96c   :  { %v1028_v48 = vpop.permute.xlu1 %1027 }
 0x96d   :  { %v1030_v1 = vadd.f32 %v1028_v48, %v1025_v53 }
 0x96f   :  { %v1051_v55 = vmul.f32 %v1030_v1, %v1020_v17 }
 0x971   :  { %v1053_v35 = vmul.f32 %v1052_v52, %v1051_v55 }
 0x973   :  { %4373 = vmatmul.msk.f32.vlgmr.msrb.gmra.mxu0 %vm524_vm13, %v1053_v35 }
 0x974   :  { %2131 = vmatpush.msrb.mxu0 %v4893_v60 }
 0x976   :  { %2132 = vmatpush.msrb.mxu0 %v4895_v61 }
 0x9f0   :  { %v1074_v18 = vpop.f32.mrf.mxu0 }
 0x9f1   :  { %v1077_v58 = vmul.f32 %v1074_v18, %v1074_v18 }
 0x9f3   :  { %1079 = vrot.lane.b32.xlu1 %v1077_v58, %s4732_s20 }
 0x9fb   :  { %1133 = vrot.lane.b32.xlu1 %v4555_v2, %s4719_s17 }
 0xa65   :  { %v1080_v7 = vpop.permute.xlu1 %1079 }
 0xa66   :  { %v1082_v30 = vadd.f32 %v1080_v7, %v1077_v58 }
 0xa68   :  { %4374 = vmatmul.msk.f32.vlgmr.msra.gmra.mxu3 %vm524_vm13, %v1082_v30  ;;  %v1188_v30 = vrot.slane %v4946_v50, 6  ;;  %v5078_v50 = vld [vmem:[#allocation2 + $0x38] sm:$0xff] }
 0xa69   :  { %2160 = vmatpush.msra.mxu3 %v4916_v46 }
 0xa6b   :  { %2161 = vmatpush.msra.mxu3 %v4918_v38 }
 0xa6d   :  { %v1134_v23 = vpop.permute.xlu1 %1133 }
 0xaeb   :  { %v1103_v60 = vpop.f32.mrf.mxu3 }
 0xaec   :  { %v1104_v61 = vadd.f32 %v4928_v40, %v1103_v60 }
 0xaee   :  { %v1107_v31 = vrot.slane %v1104_v61, 6 }
 0xaf0   :  { %1108 = vrot.lane.b32.xlu2 %v1107_v31, %s4721_s19 }
 0xb4a   :  { %v1109_v10 = vpop.permute.xlu2 %1108 }
 0xb4b   :  { %v1111_v0 = vadd.f32 %v1109_v10, %v4940_v25 }
 0xb4d   :  { %v4375_v21 = vmul.f32 -1.442695, %v1111_v0 }
 0xb4f   :  { %4556 = vpow2.f32 %v4375_v21  ;;  %v5072_v21 = vld [vmem:[#allocation2 + $0x48] sm:$0xff] }
 0xb55   :  { %v4557_v34 = vpop.eup %4556 }
 0xb56   :  { %v1115_v6 = vadd.f32 1.0, %v4557_v34  ;;  %v5075_v34 = vld [vmem:[#allocation2 + $0x40] sm:$0xff] }
 0xb58   :  { %4558 = vrcp.f32 %v1115_v6  ;;  %v1127_v46 = vand.u32 2147483648, %v1115_v6  ;;  %v1125_v38 = vand.u32 2147483647, %v1115_v6  ;;  %vm1121_vm2 = vweird.f32 %v1115_v6 }
 0xb5a   :  { %v1128_v40 = vor.u32 1.1754944e-38, %v1127_v46  ;;  %vm1126_vm4 = vcmp.eq.f32.partialorder %v1125_v38, 8.507059e+37 }
 0xb5e   :  { %v4559_v29 = vpop.eup %4558 }
 0xb5f   :  { %v1117_v32 = vmul.f32 %v4559_v29, %v1115_v6  ;;  %vm1122_vm0 = vweird.f32 %v4559_v29  ;;  %v5081_v6 = vld [vmem:[#allocation2 + $0x30] sm:$0xff] }
 0xb60   :  { %vm1123_vm3 = vmor %vm1121_vm2, %vm1122_vm0 }
 0xb61   :  { %v1118_v11 = vsub.f32 1.0, %v1117_v32  ;;  %v5084_v32 = vld [vmem:[#allocation2 + $0x50] ss:$0 sm:$0xff] }
 0xb63   :  { %v1119_v22 = vmul.f32 %v4559_v29, %v1118_v11 }
 0xb65   :  { %v1120_v14 = vadd.f32 %v4559_v29, %v1119_v22 }
 0xb67   :  { %v1124_v37 = vsel %vm1123_vm3, %v4559_v29, %v1120_v14 }
 0xb68   :  { %v1129_v25 = vsel %vm1126_vm4, %v1128_v40, %v1124_v37 }
 0xb69   :  { %v1136_v24 = vmul.f32 %v1134_v23, %v1129_v25 }
 0xb6b   :  { %v1138_v26 = vrot.slane %v1136_v24, 2 }
 0xb6d   :  { %1139 = vrot.lane.b32.xlu2 %v1138_v26, %s4720_s18 }
 0xbc7   :  { %v1140_v27 = vpop.permute.xlu2 %1139 }
 0xbc8   :  { %4376 = vmatmul.msk.f32.vlgmr.msra.gmra.mxu1 %vm80_vm5, %v1140_v27 }
 0xbc9   :  { %2215 = vmatpush.msra.mxu1 %v5048_v63 }
 0xbcb   :  { %2216 = vmatpush.msra.mxu1 %v5051_v51 }
 0xbcd   :  { %2217 = vmatpush.msra.mxu1 %v5054_v5 }
 0xbcf   :  { %2218 = vmatpush.msra.mxu1 %v5057_v28 }
 0xc45   :  { %v1160_v33 = vpop.f32.mrf.mxu1 }
 0xc46   :  { %v1164_v4 = vrot.slane %v1160_v33, 4 }
 0xc48   :  { %v5061_v36 = vadd.f32 %v1164_v4, %v4776_v9 }
 0xc4a   :  { %v4377_v12 = vmul.f32 -1.442695, %v5061_v36 }
 0xc4c   :  { %4560 = vpow2.f32 %v4377_v12 }
 0xc52   :  { %v4561_v39 = vpop.eup %4560 }
 0xc53   :  { %v1170_v43 = vadd.f32 1.0, %v4561_v39 }
 0xc55   :  { %4562 = vrcp.f32 %v1170_v43  ;;  %v1182_v48 = vand.u32 2147483648, %v1170_v43  ;;  %v1180_v17 = vand.u32 2147483647, %v1170_v43  ;;  %vm1176_vm7 = vweird.f32 %v1170_v43 }
 0xc57   :  { %v1183_v52 = vor.u32 1.1754944e-38, %v1182_v48  ;;  %vm1181_vm9 = vcmp.eq.f32.partialorder %v1180_v17, 8.507059e+37 }
 0xc5b   :  { %v4563_v53 = vpop.eup %4562 }
 0xc5c   :  { %v1172_v45 = vmul.f32 %v4563_v53, %v1170_v43  ;;  %vm1177_vm6 = vweird.f32 %v4563_v53 }
 0xc5d   :  { %vm1178_vm8 = vmor %vm1176_vm7, %vm1177_vm6 }
 0xc5e   :  { %v1173_v47 = vsub.f32 1.0, %v1172_v45 }
 0xc60   :  { %v1174_v49 = vmul.f32 %v4563_v53, %v1173_v47 }
 0xc62   :  { %v1175_v1 = vadd.f32 %v4563_v53, %v1174_v49 }
 0xc64   :  { %v1179_v55 = vsel %vm1178_vm8, %v4563_v53, %v1175_v1 }
 0xc65   :  { %v1184_v35 = vsel %vm1181_vm9, %v1183_v52, %v1179_v55 }
 0xc66   :  { %v1186_v18 = vmul.f32 2.0, %v1184_v35  ;;  %v1190_v60 = vmul.f32 %v1188_v30, %v1184_v35 }
 0xc68   :  { %v4378_v58 = vadd.f32 -1.0, %v1186_v18 }
 0xc6a   :  { %1192 = vrot.lane.b32.xlu0 %v4378_v58, %s4719_s17 }
 0xcdc   :  { %v1193_v2 = vpop.permute.xlu0 %1192 }
 0xcdd   :  { %v1195_v7 = vmul.f32 %v1193_v2, %v1184_v35 }
 0xcdf   :  { %1197 = vrot.lane.b32.xlu1 %v1195_v7, %s4720_s18 }
 0xd51   :  { %v1198_v61 = vpop.permute.xlu1 %1197 }
 0xd52   :  { %v5067_v31 = vadd.f32 %v1198_v61, %v1190_v60 }
 0xd54   :  { %v1202_v10 = vrot.slane %v5067_v31, 4 }
 0xd56   :  { %1203 = vrot.lane.b32.xlu2 %v1202_v10, %s4721_s19 }
 0xdb0   :  { %v1204_v0 = vpop.permute.xlu2 %1203 }
 0xdb1   :  { %4379 = vmatmul.msk.f32.vlgmr.msra.gmra.mxu2 %vm80_vm5, %v1204_v0 }
 0xdb2   :  { %2274 = vmatpush.msra.mxu2 %v5072_v21 }
 0xdb4   :  { %2275 = vmatpush.msra.mxu2 %v5075_v34 }
 0xdb6   :  { %2276 = vmatpush.msra.mxu2 %v5078_v50 }
 0xdb8   :  { %2277 = vmatpush.msra.mxu2 %v5081_v6 }
 0xe34   :  { %v1224_v29 = vpop.f32.mrf.mxu2 }
 0xe35   :  { %v1225_v11 = vadd.f32 %v5084_v32, %v1224_v29 }
 0xe37   :  { %4564 = vtanh.f32 %v1225_v11 }
 0xe38   :  { %4566 = vtanh.f32 %v5067_v31 }
 0xe3d   :  { %v4565_v46 = vpop.eup %4564 }
 0xe3e   :  { %v5087_v22 = vmul.f32 1.5707964, %v4565_v46 }
 0xe40   :  { %v1232_v38 = vand.u32 2139095040, %v5087_v22  ;;  %v1229_v37 = vand.u32 2147483647, %v5087_v22  ;;  %vm1231_vm8 = vcmp.lt.s32.totalorder %v5087_v22, 0 }
 0xe42   :  { %v1233_v14 = vshrl.u32 %v1232_v38, 23  ;;  %v1236_v25 = vand.u32 8388607, %v1229_v37  ;;  %vm1230_vm9 = vcmp.le.f32.partialorder %v1229_v37, 0.7853982 }
 0xe44   :  { %v4380_v40 = vadd.s32 4294967169, %v1233_v14  ;;  %v1237_v33 = vor.u32 8388608, %v1236_v25 }
 0xe46   :  { %v1239_v23 = vadd.s32 1, %v4380_v40  ;;  %v5106_v2 = vshll.u32 %v1237_v33, 8 }
 0xe48   :  { %vm1240_vm10 = vcmp.gt.s32.totalorder %v1239_v23, 0  ;;  %v1278_v46 = vand.u32 65535, %v5106_v2  ;;  %v1279_v38 = vshrl.u32 %v5106_v2, 16 }
 0xe49   :  { %v1241_v24 = vsel %vm1240_vm10, %v1239_v23, 0 }
 0xe4a   :  { %v1243_v26 = vand.u32 31, %v1241_v24  ;;  %v5093_v4 = vshrl.u32 %v1241_v24, 5 }
 0xe4c   :  { %v1244_v27 = vsub.s32 32, %v1243_v26  ;;  %v1246_v12 = vshll.u32 %v4723_v54, %v1243_v26  ;;  %v1249_v39 = vshll.u32 %v4724_v56, %v1243_v26  ;;  %v1252_v45 = vshll.u32 %v4725_v59, %v1243_v26 }
 0xe4d   :  { %v1255_v48 = vshll.u32 %v4726_v62, %v1243_v26  ;;  %v1258_v17 = vshll.u32 %v4727_v3, %v1243_v26  ;;  %vm1261_vm11 = vcmp.lt.s32.totalorder %v5093_v4, 1  ;;  %vm1264_vm12 = vcmp.lt.s32.totalorder %v5093_v4, 4 }
 0xe4e   :  { %v1247_v43 = vshrl.u32 %v4724_v56, %v1244_v27  ;;  %v1250_v53 = vshrl.u32 %v4725_v59, %v1244_v27  ;;  %v1253_v47 = vshrl.u32 %v4726_v62, %v1244_v27  ;;  %v1256_v49 = vshrl.u32 %v4727_v3, %v1244_v27 }
 0xe4f   :  { %v1259_v1 = vshrl.u32 %v4728_v8, %v1244_v27  ;;  %vm1263_vm14 = vcmp.lt.s32.totalorder %v5093_v4, 3  ;;  %vm1262_vm15 = vcmp.lt.s32.totalorder %v5093_v4, 2 }
 0xe50   :  { %v1248_v52 = vor.u32 %v1247_v43, %v1246_v12  ;;  %v1251_v55 = vor.u32 %v1250_v53, %v1249_v39  ;;  %v1254_v35 = vor.u32 %v1253_v47, %v1252_v45  ;;  %v1257_v18 = vor.u32 %v1256_v49, %v1255_v48 }
 0xe51   :  { %v1260_v58 = vor.u32 %v1259_v1, %v1258_v17 }
 0xe52   :  { %v1269_v7 = vsel %vm1261_vm11, %v1248_v52, %v1251_v55  ;;  %v1273_v30 = vsel %vm1261_vm11, %v1251_v55, %v1254_v35  ;;  %v1270_v60 = vsel %vm1264_vm12, %v1257_v18, 920167782 }
 0xe53   :  { %v1274_v61 = vsel %vm1264_vm12, %v1260_v58, 1326507024  ;;  %v1271_v10 = vsel %vm1263_vm14, %v1254_v35, %v1270_v60  ;;  %v1266_v60 = vsel %vm1264_vm12, %v1254_v35, 2102212464 }
 0xe54   :  { %v1275_v0 = vsel %vm1263_vm14, %v1257_v18, %v1274_v61  ;;  %v1272_v29 = vsel %vm1262_vm15, %v1269_v7, %v1271_v10 }
 0xe55   :  { %v1276_v11 = vsel %vm1262_vm15, %v1273_v30, %v1275_v0  ;;  %v1302_v23 = vand.u32 65535, %v1272_v29  ;;  %v1303_v25 = vshrl.u32 %v1272_v29, 16  ;;  %v1245_v0 = vshrl.u32 %v4723_v54, %v1244_v27 }
 0xe56   :  { %v1280_v14 = vand.u32 65535, %v1276_v11  ;;  %v1281_v40 = vshrl.u32 %v1276_v11, 16 }
 0xe57   :  { %v1305_v33 = vmul.u32 %v1303_v25, %v1278_v46  ;;  %v1306_v12 = vmul.u32 %v1302_v23, %v1279_v38  ;;  %v1304_v45 = vmul.u32 %v1302_v23, %v1278_v46  ;;  %v1307_v17 = vmul.u32 %v1303_v25, %v1279_v38 }
 0xe58   :  { %v1283_v24 = vmul.u32 %v1281_v40, %v1278_v46  ;;  %v1284_v26 = vmul.u32 %v1280_v14, %v1279_v38  ;;  %v1282_v39 = vmul.u32 %v1280_v14, %v1278_v46  ;;  %v1285_v53 = vmul.u32 %v1281_v40, %v1279_v38 }
 0xe59   :  { %v1308_v47 = vshll.u32 %v1305_v33, 16  ;;  %v1310_v18 = vshll.u32 %v1306_v12, 16  ;;  %v1309_v38 = vshrl.u32 %v1305_v33, 16  ;;  %v1265_v40 = vsel %vm1261_vm11, %v1245_v0, %v1248_v52 }
 0xe5a   :  { %v1286_v43 = vshll.u32 %v1283_v24, 16  ;;  %v1288_v48 = vshll.u32 %v1284_v26, 16  ;;  %v1287_v29 = vshrl.u32 %v1283_v24, 16  ;;  %v1267_v23 = vsel %vm1263_vm14, %v1251_v55, %v1266_v60 }
 0xe5b   :  { %vm1312_vm0 = vc.u32 %v1304_v45, %v1308_v47  ;;  %v1314_v58 = vadd.s32 %v1308_v47, %v1304_v45  ;;  %v1289_v25 = vshrl.u32 %v1284_v26, 16  ;;  %v1268_v27 = vsel %vm1262_vm15, %v1265_v40, %v1267_v23 }
 0xe5c   :  { %vm1290_vm1 = vc.u32 %v1282_v39, %v1286_v43  ;;  %v1292_v49 = vadd.s32 %v1286_v43, %v1282_v39  ;;  %v1313_v30 = vsel %vm1312_vm0, 1, %v4722_v41  ;;  %v1311_v39 = vshrl.u32 %v1306_v12, 16 }
 0xe5d   :  { %v1291_v1 = vsel %vm1290_vm1, 1, %v4722_v41  ;;  %v1315_v10 = vadd.s32 %v1313_v30, %v1307_v17  ;;  %vm1316_vm3 = vc.u32 %v1314_v58, %v1310_v18  ;;  %v1318_v45 = vadd.s32 %v1314_v58, %v1310_v18 }
 0xe5e   :  { %v1293_v7 = vadd.s32 %v1291_v1, %v1285_v53  ;;  %vm1294_vm2 = vc.u32 %v1292_v49, %v1288_v48  ;;  %v1317_v46 = vsel %vm1316_vm3, 1, %v4722_v41  ;;  %v1322_v33 = vmul.u32 %v5106_v2, %v1268_v27 }
 0xe5f   :  { %v1295_v61 = vsel %vm1294_vm2, 1, %v4722_v41  ;;  %v1319_v14 = vadd.s32 %v1317_v46, %v1315_v10  ;;  %vm1372_vm0 = vweird.f32 %v5087_v22 }
 0xe60   :  { %v1297_v11 = vadd.s32 %v1295_v61, %v1293_v7 }
 0xe61   :  { %v1320_v43 = vadd.s32 %v1319_v14, %v1309_v38 }
 0xe62   :  { %v1298_v35 = vadd.s32 %v1297_v11, %v1287_v29 }
 0xe63   :  { %v1321_v24 = vadd.s32 %v1320_v43, %v1311_v39 }
 0xe64   :  { %v1299_v53 = vadd.s32 %v1298_v35, %v1289_v25 }
 0xe65   :  { %v1325_v47 = vadd.s32 1, %v1321_v24 }
 0xe66   :  { %vm1324_vm4 = vc.u32 %v1299_v53, %v1318_v45  ;;  %v1323_v4 = vadd.s32 %v1318_v45, %v1299_v53 }
 0xe67   :  { %v1326_v48 = vsel %vm1324_vm4, %v1325_v47, %v1321_v24 }
 0xe68   :  { %v1327_v49 = vadd.s32 %v1326_v48, %v1322_v33 }
 0xe6a   :  { %v1328_v52 = vadd.s32 536870912, %v1327_v49 }
 0xe6c   :  { %v1329_v17 = vshrl.u32 %v1328_v52, 30 }
 0xe6e   :  { %v1330_v1 = vshll.u32 %v1329_v17, 30  ;;  %v1353_v25 = vsub.s32 4, %v1329_v17 }
 0xe70   :  { %v1331_v55 = vsub.s32 %v1327_v49, %v1330_v1  ;;  %v1354_v45 = vsel %vm1231_vm8, %v1353_v25, %v1329_v17 }
 0xe71   :  { %v1356_v47 = vsel %vm1230_vm9, 0, %v1354_v45 }
 0xe72   :  { %vm1332_vm6 = vcmp.lt.s32.totalorder %v1331_v55, 0  ;;  %v1333_v26 = vsub.s32 0, %v1331_v55  ;;  %v1527_v1 = vadd.s32 3, %v1356_v47 }
 0xe74   :  { %v1334_v12 = vsel %vm1332_vm6, %v1333_v26, %v1331_v55 }
 0xe75   :  { %v1335_v7 = vclz %v1334_v12 }
 0xe77   :  { %v4381_v30 = vadd.s32 4294967294, %v1335_v7  ;;  %v1373_v7 = vand.u32 3, %v1356_v47 }
 0xe79   :  { %vm4382_vm7 = vcmp.lt.s32.totalorder %v4381_v30, 0  ;;  %vm1374_vm10 = vcmp.lt.s32.totalorder %v1373_v7, 2  ;;  %vm1375_vm11 = vcmp.eq.s32.totalorder %v1373_v7, 0  ;;  %vm1378_vm12 = vcmp.eq.s32.totalorder %v1373_v7, 2 }
 0xe7a   :  { %v1338_v18 = vsel %vm4382_vm7, 0, %v4381_v30  ;;  %v1528_v30 = vand.u32 3, %v1527_v1 }
 0xe7b   :  { %v1339_v58 = vsub.s32 32, %v1338_v18  ;;  %v1343_v60 = vsub.s32 4294967266, %v1338_v18  ;;  %v1340_v61 = vshll.u32 %v1331_v55, %v1338_v18 }
 0xe7c   :  { %vm1529_vm14 = vcmp.lt.s32.totalorder %v1528_v30, 2  ;;  %vm1530_vm15 = vcmp.eq.s32.totalorder %v1528_v30, 0  ;;  %vm1533_vm1 = vcmp.eq.s32.totalorder %v1528_v30, 2 }
 0xe7d   :  { %v1341_v10 = vshrl.u32 %v1323_v4, %v1339_v58  ;;  %v1344_v0 = vadd.s32 127, %v1343_v60 }
 0xe7f   :  { %v1342_v2 = vor.u32 %v1341_v10, %v1340_v61  ;;  %v1345_v29 = vshll.u32 %v1344_v0, 23 }
 0xe81   :  { %v1346_v11 = vor.u32 4788187, %v1345_v29  ;;  %v1349_v38 = vcvt.s32.f32 %v1342_v2 }
 0xe83   :  { %v1347_v46 = vand.u32 2147483647, %v1346_v11 }
 0xe85   :  { %v1350_v14 = vmul.f32 %v1349_v38, %v1347_v46 }
 0xe87   :  { %v1351_v40 = vxor.u32 2147483648, %v1350_v14 }
 0xe89   :  { %v1352_v23 = vsel %vm1231_vm8, %v1351_v40, %v1350_v14 }
 0xe8a   :  { %v1355_v35 = vsel %vm1230_vm9, %v5087_v22, %v1352_v23  ;;  %v4567_v22 = vpop.eup %4566 }
 0xe8b   :  { %v1357_v39 = vmul.f32 %v1355_v35, %v1355_v35 }
 0xe8d   :  { %v1358_v43 = vmul.f32 -0.001358992, %v1357_v39  ;;  %v1365_v53 = vmul.f32 -0.00019511016, %v1357_v39 }
 0xe8f   :  { %v1359_v27 = vadd.f32 0.041655596, %v1358_v43  ;;  %v1366_v24 = vadd.f32 0.008332121, %v1365_v53 }
 0xe91   :  { %v1360_v33 = vmul.f32 %v1359_v27, %v1357_v39  ;;  %v1367_v48 = vmul.f32 %v1366_v24, %v1357_v39 }
 0xe93   :  { %v1361_v49 = vadd.f32 -0.4999988, %v1360_v33  ;;  %v1368_v52 = vadd.f32 -0.16666654, %v1367_v48 }
 0xe95   :  { %v1362_v55 = vmul.f32 %v1361_v49, %v1357_v39  ;;  %v1369_v26 = vmul.f32 %v1368_v52, %v1357_v39 }
 0xe97   :  { %v1363_v12 = vadd.f32 1.0, %v1362_v55  ;;  %v1370_v37 = vadd.f32 1.0, %v1369_v26  ;;  %v5162_v26 = vld [vmem:[#allocation2 + $0x78] sm:$0xff] }
 0xe99   :  { %v1371_v18 = vmul.f32 %v1370_v37, %v1355_v35  ;;  %v1379_v4 = vxor.u32 2147483648, %v1363_v12 }
 0xe9b   :  { %v1376_v58 = vxor.u32 2147483648, %v1371_v18  ;;  %v1380_v60 = vsel %vm1378_vm12, %v1379_v4, %v1371_v18  ;;  %v1535_v10 = vsel %vm1533_vm1, %v1379_v4, %v1371_v18  ;;  %v5170_v4 = vld [vmem:[#allocation2 + $0x60] sm:$0xff] }
 0xe9d   :  { %v1377_v17 = vsel %vm1375_vm11, %v1363_v12, %v1376_v58  ;;  %v1532_v61 = vsel %vm1530_vm15, %v1363_v12, %v1376_v58  ;;  %v5165_v12 = vld [vmem:[#allocation2 + $0x70] sm:$0xff]  ;;  %v5173_v58 = vld [vmem:[#allocation2 + $0x58] sm:$0xff] }
 0xe9e   :  { %v1381_v0 = vsel %vm1374_vm10, %v1377_v17, %v1380_v60  ;;  %v1536_v2 = vsel %vm1529_vm14, %v1532_v61, %v1535_v10  ;;  %v5176_v60 = vld [vmem:[#allocation2 + $0x68] ss:$0 sm:$0xff] }
 0xe9f   :  { %v1382_v29 = vsel %vm1372_vm0, nan, %v1381_v0  ;;  %v1537_v11 = vsel %vm1372_vm0, nan, %v1536_v2 }
 0xea0   :  { %1547 = vperm.xlu2 %4488, %v1382_v29   ;;  %v1538_v46 = vsub.f32 %v1537_v11, %v1382_v29 }
 0xea2   :  { %1552 = vperm.xlu1 %4485, %v1538_v46   ;;  %1541 = vperm.xlu0 %4489, %v1538_v46  }
 0xea8   :  { %4491 = vset.pattern.permute.xlu2 %v4731_v57 }
 0xea9   :  { %1562 = vperm.xlu2 %4491, %v1538_v46  }
 0xeaa   :  { %4492 = vset.pattern.permute.xlu1 %v4729_v44  ;;  %4490 = vset.pattern.permute.xlu0 %v4730_v13 }
 0xeab   :  { %1572 = vperm.xlu1 %4492, %v1538_v46   ;;  %1557 = vperm.xlu0 %4490, %v1382_v29  }
 0xeb1   :  { %4494 = vset.pattern.permute.xlu2 %v4729_v44 }
 0xeb2   :  { %1577 = vperm.xlu2 %4494, %v1382_v29  }
 0xeb3   :  { %4493 = vset.pattern.permute.xlu1 %v4731_v57  ;;  %1663 = vrot.lane.b32.xlu0 %v4567_v22, %s4719_s17 }
 0xeb4   :  { %1567 = vperm.xlu1 %4493, %v1382_v29  }
 0xeba   :  { %4495 = vset.pattern.permute.xlu2 %v4722_v41 }
 0xebc   :  { %4497 = vset.pattern.permute.xlu1 %v4730_v13 }
 0xefa   :  { %v1548_v38 = vpop.permute.xlu2 %1547 }
 0xf03   :  { %v1563_v23 = vpop.permute.xlu2 %1562 }
 0xf04   :  { %v1565_v45 = vmul.f32 %v1563_v23, %v4909_v20 }
 0xf0c   :  { %v1578_v24 = vpop.permute.xlu2 %1577 }
 0xf14   :  { %v1553_v14 = vpop.permute.xlu1 %1552  ;;  %v1542_v40 = vpop.permute.xlu0 %1541 }
 0xf15   :  { %v1555_v39 = vmul.f32 %v1553_v14, %v4907_v19  ;;  %v1544_v43 = vmul.f32 %v1542_v40, %v4905_v16 }
 0xf17   :  { %v1550_v33 = vadd.f32 %v1548_v38, %v1544_v43 }
 0xf1d   :  { %v1573_v25 = vpop.permute.xlu1 %1572  ;;  %v1558_v35 = vpop.permute.xlu0 %1557 }
 0xf1e   :  { %v1575_v53 = vmul.f32 %v1573_v25, %v4903_v15  ;;  %v1560_v27 = vadd.f32 %v1558_v35, %v1555_v39 }
 0xf20   :  { %v1580_v48 = vadd.f32 %v1578_v24, %v1575_v53  ;;  %v1581_v52 = vmul.f32 %v1560_v27, %v1550_v33 }
 0xf25   :  { %v1664_v53 = vpop.permute.xlu0 %1663 }
 0xf26   :  { %v1568_v47 = vpop.permute.xlu1 %1567 }
 0xf27   :  { %v1570_v49 = vadd.f32 %v1568_v47, %v1565_v45 }
 0xf29   :  { %v1582_v1 = vmul.f32 %v1580_v48, %v1570_v49 }
 0xf2b   :  { %v1583_v55 = vmul.f32 %v1582_v1, %v1581_v52 }
 0xf2d   :  { %4386 = vmatmul.msk.f32.vlgmr.msra.gmra.mxu0 %vm524_vm13, %v1583_v55 }
 0xf2e   :  { %2656 = vmatpush.msra.mxu0 %v5162_v26 }
 0xf30   :  { %2657 = vmatpush.msra.mxu0 %v5165_v12 }
 0xfaa   :  { %v1604_v37 = vpop.f32.mrf.mxu0 }
 0xfab   :  { %v1607_v7 = vmul.f32 %v1604_v37, %v1604_v37 }
 0xfad   :  { %1609 = vrot.lane.b32.xlu1 %v1607_v7, %s4732_s20 }
0x101f   :  { %v1610_v30 = vpop.permute.xlu1 %1609 }
0x1020   :  { %v1612_v18 = vadd.f32 %v1610_v30, %v1607_v7 }
0x1022   :  { %4387 = vmatmul.msk.f32.vlgmr.msrb.gmra.mxu3 %vm524_vm13, %v1612_v18 }
0x1023   :  { %2685 = vmatpush.msrb.mxu3 %v5170_v4 }
0x1025   :  { %2686 = vmatpush.msrb.mxu3 %v5173_v58 }
0x10a5   :  { %v1633_v17 = vpop.f32.mrf.mxu3 }
0x10a6   :  { %v1634_v61 = vadd.f32 %v5176_v60, %v1633_v17 }
0x10a8   :  { %v1637_v10 = vrot.slane %v1634_v61, 4 }
0x10aa   :  { %1638 = vrot.lane.b32.xlu2 %v1637_v10, %s4721_s19 }
0x1104   :  { %v1639_v0 = vpop.permute.xlu2 %1638 }
0x1105   :  { %v1641_v2 = vadd.f32 %v1639_v0, %v5061_v36 }
0x1107   :  { %v4388_v29 = vmul.f32 -1.442695, %v1641_v2  ;;  %v1718_v2 = vrot.slane %v5067_v31, 6 }
0x1109   :  { %4568 = vpow2.f32 %v4388_v29 }
0x110f   :  { %v4569_v11 = vpop.eup %4568 }
0x1110   :  { %v1645_v46 = vadd.f32 1.0, %v4569_v11 }
0x1112   :  { %4570 = vrcp.f32 %v1645_v46  ;;  %v1657_v40 = vand.u32 2147483648, %v1645_v46  ;;  %v1655_v25 = vand.u32 2147483647, %v1645_v46  ;;  %vm1651_vm3 = vweird.f32 %v1645_v46 }
0x1114   :  { %v1658_v39 = vor.u32 1.1754944e-38, %v1657_v40  ;;  %vm1656_vm6 = vcmp.eq.f32.partialorder %v1655_v25, 8.507059e+37 }
0x1118   :  { %v4571_v22 = vpop.eup %4570 }
0x1119   :  { %v1647_v38 = vmul.f32 %v4571_v22, %v1645_v46  ;;  %vm1652_vm2 = vweird.f32 %v4571_v22 }
0x111a   :  { %vm1653_vm4 = vmor %vm1651_vm3, %vm1652_vm2 }
0x111b   :  { %v1648_v14 = vsub.f32 1.0, %v1647_v38 }
0x111d   :  { %v1649_v23 = vmul.f32 %v4571_v22, %v1648_v14 }
0x111f   :  { %v1650_v35 = vadd.f32 %v4571_v22, %v1649_v23 }
0x1121   :  { %v1654_v43 = vsel %vm1653_vm4, %v4571_v22, %v1650_v35 }
0x1122   :  { %v1659_v36 = vsel %vm1656_vm6, %v1658_v39, %v1654_v43 }
0x1123   :  { %v1666_v45 = vmul.f32 %v1664_v53, %v1659_v36 }
0x1125   :  { %v1668_v27 = vrot.slane %v1666_v45, 4 }
0x1127   :  { %1669 = vrot.lane.b32.xlu1 %v1668_v27, %s4720_s18 }
0x1199   :  { %v1670_v24 = vpop.permute.xlu1 %1669 }
0x119a   :  { %4389 = vmatmul.msk.f32.vlgmr.msrb.gmra.mxu1 %vm80_vm5, %v1670_v24 }
0x119b   :  { %2738 = vmatpush.msrb.mxu1 %v5048_v63 }
0x119d   :  { %2739 = vmatpush.msrb.mxu1 %v5051_v51 }
0x119f   :  { %2740 = vmatpush.msrb.mxu1 %v5054_v5 }
0x11a1   :  { %2741 = vmatpush.msrb.mxu1 %v5057_v28 }
0x1217   :  { %v1690_v47 = vpop.f32.mrf.mxu1 }
0x1218   :  { %v1694_v33 = vrot.slane %v1690_v47, 2 }
0x121a   :  { %v5188_v48 = vadd.f32 %v1694_v33, %v4776_v9 }
0x121c   :  { %v4390_v49 = vmul.f32 -1.442695, %v5188_v48 }
0x121e   :  { %4572 = vpow2.f32 %v4390_v49 }
0x1224   :  { %v4573_v52 = vpop.eup %4572 }
0x1225   :  { %v1700_v1 = vadd.f32 1.0, %v4573_v52 }
0x1227   :  { %4574 = vrcp.f32 %v1700_v1  ;;  %v1712_v7 = vand.u32 2147483648, %v1700_v1  ;;  %v1710_v5 = vand.u32 2147483647, %v1700_v1  ;;  %vm1706_vm8 = vweird.f32 %v1700_v1 }
0x1229   :  { %v1713_v28 = vor.u32 1.1754944e-38, %v1712_v7  ;;  %vm1711_vm10 = vcmp.eq.f32.partialorder %v1710_v5, 8.507059e+37 }
0x122d   :  { %v4575_v55 = vpop.eup %4574 }
0x122e   :  { %v1702_v37 = vmul.f32 %v4575_v55, %v1700_v1  ;;  %vm1707_vm7 = vweird.f32 %v4575_v55 }
0x122f   :  { %vm1708_vm9 = vmor %vm1706_vm8, %vm1707_vm7 }
0x1230   :  { %v1703_v63 = vsub.f32 1.0, %v1702_v37 }
0x1232   :  { %v1704_v51 = vmul.f32 %v4575_v55, %v1703_v63 }
0x1234   :  { %v1705_v30 = vadd.f32 %v4575_v55, %v1704_v51 }
0x1236   :  { %v1709_v18 = vsel %vm1708_vm9, %v4575_v55, %v1705_v30 }
0x1237   :  { %v1714_v9 = vsel %vm1711_vm10, %v1713_v28, %v1709_v18 }
0x1238   :  { %v1716_v17 = vmul.f32 2.0, %v1714_v9  ;;  %v1720_v29 = vmul.f32 %v1718_v2, %v1714_v9 }
0x123a   :  { %v4391_v61 = vadd.f32 -1.0, %v1716_v17 }
0x123c   :  { %1722 = vrot.lane.b32.xlu2 %v4391_v61, %s4719_s17 }
0x1296   :  { %v1723_v10 = vpop.permute.xlu2 %1722 }
0x1297   :  { %v1725_v0 = vmul.f32 %v1723_v10, %v1714_v9 }
0x1299   :  { %1727 = vrot.lane.b32.xlu0 %v1725_v0, %s4720_s18 }
0x130b   :  { %v1728_v11 = vpop.permute.xlu0 %1727 }
0x130c   :  { %v5194_v46 = vadd.f32 %v1728_v11, %v1720_v29 }
0x130e   :  { %v1732_v22 = vrot.slane %v5194_v46, 6 }
0x1310   :  { %1733 = vrot.lane.b32.xlu1 %v1732_v22, %s4721_s19 }
0x1382   :  { %v1734_v38 = vpop.permute.xlu1 %1733 }
0x1383   :  { %4392 = vmatmul.msk.f32.vlgmr.msrb.gmra.mxu2 %vm80_vm5, %v1734_v38 }
0x1384   :  { %2802 = vmatpush.msrb.mxu2 %v5072_v21 }
0x1386   :  { %2803 = vmatpush.msrb.mxu2 %v5075_v34 }
0x1388   :  { %2804 = vmatpush.msrb.mxu2 %v5078_v50 }
0x138a   :  { %2805 = vmatpush.msrb.mxu2 %v5081_v6 }
0x1406   :  { %v1754_v31 = vpop.f32.mrf.mxu2 }
0x1407   :  { %v1755_v14 = vadd.f32 %v5084_v32, %v1754_v31 }
0x1409   :  { %4576 = vtanh.f32 %v1755_v14 }
0x140a   :  { %4578 = vtanh.f32 %v5194_v46  ;;  %v5328_v46 = vld [vmem:[#allocation2 + $0x30] sm:$0xff] }
0x140f   :  { %v4577_v40 = vpop.eup %4576 }
0x1410   :  { %v5206_v23 = vmul.f32 1.5707964, %v4577_v40 }
0x1412   :  { %v1762_v25 = vand.u32 2139095040, %v5206_v23  ;;  %v1759_v43 = vand.u32 2147483647, %v5206_v23  ;;  %vm1761_vm9 = vcmp.lt.s32.totalorder %v5206_v23, 0 }
0x1414   :  { %v1763_v35 = vshrl.u32 %v1762_v25, 23  ;;  %v1766_v34 = vand.u32 8388607, %v1759_v43  ;;  %vm1760_vm10 = vcmp.le.f32.partialorder %v1759_v43, 0.7853982 }
0x1416   :  { %v4393_v39 = vadd.s32 4294967169, %v1763_v35  ;;  %v1767_v36 = vor.u32 8388608, %v1766_v34 }
0x1418   :  { %v1769_v21 = vadd.s32 1, %v4393_v39  ;;  %v5225_v28 = vshll.u32 %v1767_v36, 8 }
0x141a   :  { %vm1770_vm11 = vcmp.gt.s32.totalorder %v1769_v21, 0  ;;  %v1808_v11 = vand.u32 65535, %v5225_v28  ;;  %v1809_v38 = vshrl.u32 %v5225_v28, 16 }
0x141b   :  { %v1771_v50 = vsel %vm1770_vm11, %v1769_v21, 0 }
0x141c   :  { %v1773_v6 = vand.u32 31, %v1771_v50  ;;  %v5212_v32 = vshrl.u32 %v1771_v50, 5 }
0x141e   :  { %v1774_v53 = vsub.s32 32, %v1773_v6  ;;  %v1776_v45 = vshll.u32 %v4723_v54, %v1773_v6  ;;  %v1779_v27 = vshll.u32 %v4724_v56, %v1773_v6  ;;  %v1782_v33 = vshll.u32 %v4725_v59, %v1773_v6 }
0x141f   :  { %v1785_v52 = vshll.u32 %v4726_v62, %v1773_v6  ;;  %v1788_v55 = vshll.u32 %v4727_v3, %v1773_v6  ;;  %vm1791_vm12 = vcmp.lt.s32.totalorder %v5212_v32, 1  ;;  %vm1794_vm14 = vcmp.lt.s32.totalorder %v5212_v32, 4 }
0x1420   :  { %v1777_v24 = vshrl.u32 %v4724_v56, %v1774_v53  ;;  %v1780_v47 = vshrl.u32 %v4725_v59, %v1774_v53  ;;  %v1783_v49 = vshrl.u32 %v4726_v62, %v1774_v53  ;;  %v1786_v1 = vshrl.u32 %v4727_v3, %v1774_v53 }
0x1421   :  { %v1789_v37 = vshrl.u32 %v4728_v8, %v1774_v53  ;;  %vm1793_vm15 = vcmp.lt.s32.totalorder %v5212_v32, 3  ;;  %vm1792_vm1 = vcmp.lt.s32.totalorder %v5212_v32, 2 }
0x1422   :  { %v1778_v63 = vor.u32 %v1777_v24, %v1776_v45  ;;  %v1781_v7 = vor.u32 %v1780_v47, %v1779_v27  ;;  %v1784_v51 = vor.u32 %v1783_v49, %v1782_v33  ;;  %v1787_v5 = vor.u32 %v1786_v1, %v1785_v52 }
0x1423   :  { %v1790_v30 = vor.u32 %v1789_v37, %v1788_v55 }
0x1424   :  { %v1799_v18 = vsel %vm1791_vm12, %v1778_v63, %v1781_v7  ;;  %v1803_v9 = vsel %vm1791_vm12, %v1781_v7, %v1784_v51  ;;  %v1800_v17 = vsel %vm1794_vm14, %v1787_v5, 920167782 }
0x1425   :  { %v1804_v61 = vsel %vm1794_vm14, %v1790_v30, 1326507024  ;;  %v1801_v10 = vsel %vm1793_vm15, %v1784_v51, %v1800_v17 }
0x1426   :  { %v1805_v0 = vsel %vm1793_vm15, %v1787_v5, %v1804_v61  ;;  %v1802_v2 = vsel %vm1792_vm1, %v1799_v18, %v1801_v10  ;;  %v1796_v5 = vsel %vm1794_vm14, %v1784_v51, 2102212464 }
0x1427   :  { %v1806_v29 = vsel %vm1792_vm1, %v1803_v9, %v1805_v0  ;;  %v1832_v40 = vand.u32 65535, %v1802_v2  ;;  %v1833_v25 = vshrl.u32 %v1802_v2, 16  ;;  %v1775_v9 = vshrl.u32 %v4723_v54, %v1774_v53 }
0x1428   :  { %v1810_v31 = vand.u32 65535, %v1806_v29  ;;  %v1811_v14 = vshrl.u32 %v1806_v29, 16 }
0x1429   :  { %v1835_v21 = vmul.u32 %v1833_v25, %v1808_v11  ;;  %v1836_v34 = vmul.u32 %v1832_v40, %v1809_v38  ;;  %v1834_v45 = vmul.u32 %v1832_v40, %v1808_v11  ;;  %v1837_v33 = vmul.u32 %v1833_v25, %v1809_v38 }
0x142a   :  { %v1813_v35 = vmul.u32 %v1811_v14, %v1808_v11  ;;  %v1814_v39 = vmul.u32 %v1810_v31, %v1809_v38  ;;  %v1812_v50 = vmul.u32 %v1810_v31, %v1808_v11  ;;  %v1815_v36 = vmul.u32 %v1811_v14, %v1809_v38 }
0x142b   :  { %v1838_v27 = vshll.u32 %v1835_v21, 16  ;;  %v1840_v52 = vshll.u32 %v1836_v34, 16  ;;  %v1839_v0 = vshrl.u32 %v1835_v21, 16  ;;  %v1795_v29 = vsel %vm1791_vm12, %v1775_v9, %v1778_v63 }
0x142c   :  { %v1816_v6 = vshll.u32 %v1813_v35, 16  ;;  %v1818_v24 = vshll.u32 %v1814_v39, 16  ;;  %v1817_v17 = vshrl.u32 %v1813_v35, 16  ;;  %v1797_v11 = vsel %vm1793_vm15, %v1781_v7, %v1796_v5 }
0x142d   :  { %vm1842_vm2 = vc.u32 %v1834_v45, %v1838_v27  ;;  %v1844_v1 = vadd.s32 %v1838_v27, %v1834_v45  ;;  %v1819_v38 = vshrl.u32 %v1814_v39, 16  ;;  %v1841_v31 = vshrl.u32 %v1836_v34, 16 }
0x142e   :  { %vm1820_vm0 = vc.u32 %v1812_v50, %v1816_v6  ;;  %v1822_v47 = vadd.s32 %v1816_v6, %v1812_v50  ;;  %v1843_v37 = vsel %vm1842_vm2, 1, %v4722_v41  ;;  %v1798_v53 = vsel %vm1792_vm1, %v1795_v29, %v1797_v11 }
0x142f   :  { %v1821_v49 = vsel %vm1820_vm0, 1, %v4722_v41  ;;  %v1845_v18 = vadd.s32 %v1843_v37, %v1837_v33  ;;  %vm1846_vm4 = vc.u32 %v1844_v1, %v1840_v52  ;;  %v1848_v25 = vadd.s32 %v1844_v1, %v1840_v52 }
0x1430   :  { %v1823_v55 = vadd.s32 %v1821_v49, %v1815_v36  ;;  %vm1824_vm3 = vc.u32 %v1822_v47, %v1818_v24  ;;  %v1847_v10 = vsel %vm1846_vm4, 1, %v4722_v41  ;;  %v1852_v21 = vmul.u32 %v5225_v28, %v1798_v53 }
0x1431   :  { %v1825_v30 = vsel %vm1824_vm3, 1, %v4722_v41  ;;  %v1849_v2 = vadd.s32 %v1847_v10, %v1845_v18  ;;  %vm1902_vm2 = vweird.f32 %v5206_v23 }
0x1432   :  { %v1827_v61 = vadd.s32 %v1825_v30, %v1823_v55 }
0x1433   :  { %v1850_v14 = vadd.s32 %v1849_v2, %v1839_v0 }
0x1434   :  { %v1828_v51 = vadd.s32 %v1827_v61, %v1817_v17 }
0x1435   :  { %v1851_v35 = vadd.s32 %v1850_v14, %v1841_v31 }
0x1436   :  { %v1829_v40 = vadd.s32 %v1828_v51, %v1819_v38 }
0x1437   :  { %v1855_v50 = vadd.s32 1, %v1851_v35 }
0x1438   :  { %vm1854_vm6 = vc.u32 %v1829_v40, %v1848_v25  ;;  %v1853_v32 = vadd.s32 %v1848_v25, %v1829_v40 }
0x1439   :  { %v1856_v6 = vsel %vm1854_vm6, %v1855_v50, %v1851_v35 }
0x143a   :  { %v1857_v36 = vadd.s32 %v1856_v6, %v1852_v21 }
0x143c   :  { %v1858_v63 = vadd.s32 536870912, %v1857_v36 }
0x143e   :  { %v1859_v45 = vshrl.u32 %v1858_v63, 30 }
0x1440   :  { %v1860_v27 = vshll.u32 %v1859_v45, 30  ;;  %v1883_v0 = vsub.s32 4, %v1859_v45 }
0x1442   :  { %v1861_v7 = vsub.s32 %v1857_v36, %v1860_v27  ;;  %v1884_v51 = vsel %vm1761_vm9, %v1883_v0, %v1859_v45 }
0x1443   :  { %v1886_v40 = vsel %vm1760_vm10, 0, %v1884_v51 }
0x1444   :  { %vm1862_vm7 = vcmp.lt.s32.totalorder %v1861_v7, 0  ;;  %v1863_v39 = vsub.s32 0, %v1861_v7  ;;  %v2057_v21 = vadd.s32 3, %v1886_v40  ;;  %v1903_v27 = vand.u32 3, %v1886_v40 }
0x1446   :  { %v1864_v34 = vsel %vm1862_vm7, %v1863_v39, %v1861_v7  ;;  %vm1904_vm11 = vcmp.lt.s32.totalorder %v1903_v27, 2  ;;  %vm1905_vm12 = vcmp.eq.s32.totalorder %v1903_v27, 0  ;;  %vm1908_vm14 = vcmp.eq.s32.totalorder %v1903_v27, 2 }
0x1447   :  { %v1865_v24 = vclz %v1864_v34 }
0x1449   :  { %v4394_v47 = vadd.s32 4294967294, %v1865_v24 }
0x144b   :  { %vm4395_vm8 = vcmp.lt.s32.totalorder %v4394_v47, 0 }
0x144c   :  { %v1868_v33 = vsel %vm4395_vm8, 0, %v4394_v47 }
0x144d   :  { %v1869_v49 = vsub.s32 32, %v1868_v33  ;;  %v1873_v52 = vsub.s32 4294967266, %v1868_v33  ;;  %v1870_v1 = vshll.u32 %v1861_v7, %v1868_v33  ;;  %v2058_v7 = vand.u32 3, %v2057_v21 }
0x144f   :  { %v1871_v55 = vshrl.u32 %v1853_v32, %v1869_v49  ;;  %v1874_v37 = vadd.s32 127, %v1873_v52  ;;  %vm2059_vm15 = vcmp.lt.s32.totalorder %v2058_v7, 2  ;;  %vm2060_vm1 = vcmp.eq.s32.totalorder %v2058_v7, 0 }
0x1450   :  { %vm2063_vm0 = vcmp.eq.s32.totalorder %v2058_v7, 2 }
0x1451   :  { %v1872_v28 = vor.u32 %v1871_v55, %v1870_v1  ;;  %v1875_v5 = vshll.u32 %v1874_v37, 23 }
0x1453   :  { %v1876_v30 = vor.u32 4788187, %v1875_v5  ;;  %v1879_v9 = vcvt.s32.f32 %v1872_v28 }
0x1455   :  { %v1877_v18 = vand.u32 2147483647, %v1876_v30 }
0x1457   :  { %v1880_v17 = vmul.f32 %v1879_v9, %v1877_v18 }
0x1459   :  { %v1881_v61 = vxor.u32 2147483648, %v1880_v17 }
0x145b   :  { %v1882_v10 = vsel %vm1761_vm9, %v1881_v61, %v1880_v17 }
0x145c   :  { %v1885_v2 = vsel %vm1760_vm10, %v5206_v23, %v1882_v10  ;;  %v4579_v23 = vpop.eup %4578 }
0x145d   :  { %v1887_v29 = vmul.f32 %v1885_v2, %v1885_v2 }
0x145f   :  { %v1888_v11 = vmul.f32 -0.001358992, %v1887_v29  ;;  %v1895_v38 = vmul.f32 -0.00019511016, %v1887_v29 }
0x1461   :  { %v1889_v31 = vadd.f32 0.041655596, %v1888_v11  ;;  %v1896_v14 = vadd.f32 0.008332121, %v1895_v38 }
0x1463   :  { %v1890_v25 = vmul.f32 %v1889_v31, %v1887_v29  ;;  %v1897_v53 = vmul.f32 %v1896_v14, %v1887_v29 }
0x1465   :  { %v1891_v35 = vadd.f32 -0.4999988, %v1890_v25  ;;  %v1898_v50 = vadd.f32 -0.16666654, %v1897_v53 }
0x1467   :  { %v1892_v6 = vmul.f32 %v1891_v35, %v1887_v29  ;;  %v1899_v36 = vmul.f32 %v1898_v50, %v1887_v29 }
0x1469   :  { %v1893_v63 = vadd.f32 1.0, %v1892_v6  ;;  %v1900_v43 = vadd.f32 1.0, %v1899_v36 }
0x146b   :  { %v1901_v39 = vmul.f32 %v1900_v43, %v1885_v2  ;;  %v1909_v34 = vxor.u32 2147483648, %v1893_v63 }
0x146d   :  { %v1906_v24 = vxor.u32 2147483648, %v1901_v39  ;;  %v1910_v47 = vsel %vm1908_vm14, %v1909_v34, %v1901_v39  ;;  %v2065_v32 = vsel %vm2063_vm0, %v1909_v34, %v1901_v39 }
0x146f   :  { %v1907_v45 = vsel %vm1905_vm12, %v1893_v63, %v1906_v24  ;;  %v2062_v33 = vsel %vm2060_vm1, %v1893_v63, %v1906_v24 }
0x1470   :  { %v1911_v49 = vsel %vm1904_vm11, %v1907_v45, %v1910_v47  ;;  %v2066_v52 = vsel %vm2059_vm15, %v2062_v33, %v2065_v32 }
0x1471   :  { %v1912_v1 = vsel %vm1902_vm2, nan, %v1911_v49  ;;  %v2067_v55 = vsel %vm1902_vm2, nan, %v2066_v52 }
0x1472   :  { %2087 = vperm.xlu1 %4497, %v1912_v1   ;;  %v2068_v37 = vsub.f32 %v2067_v55, %v1912_v1 }
0x1474   :  { %2082 = vperm.xlu0 %4490, %v2068_v37   ;;  %2071 = vperm.xlu2 %4495, %v2068_v37  }
0x147a   :  { %4498 = vset.pattern.permute.xlu1 %v4731_v57 }
0x147b   :  { %2092 = vperm.xlu1 %4498, %v2068_v37  }
0x147c   :  { %4496 = vset.pattern.permute.xlu0 %v4722_v41  ;;  %4499 = vset.pattern.permute.xlu2 %v4729_v44 }
0x147d   :  { %2077 = vperm.xlu0 %4496, %v1912_v1   ;;  %2102 = vperm.xlu2 %4499, %v2068_v37   ;;  %v5291_v37 = vld [vmem:[#allocation2 + $0x20] sm:$0xff] }
0x1483   :  { %4501 = vset.pattern.permute.xlu1 %v4729_v44 }
0x1484   :  { %2107 = vperm.xlu1 %4501, %v1912_v1  }
0x1485   :  { %4500 = vset.pattern.permute.xlu2 %v4731_v57 }
0x1486   :  { %2097 = vperm.xlu2 %4500, %v1912_v1  }
0x148c   :  { %2193 = vrot.lane.b32.xlu1 %v4579_v23, %s4719_s17  ;;  %v5294_v23 = vld [vmem:[#allocation2 + $0x18] sm:$0xff] }
0x148d   :  { %4502 = vset.pattern.permute.xlu1 %v4730_v13 }
0x14ce   :  { %v2072_v28 = vpop.permute.xlu2 %2071 }
0x14cf   :  { %v2074_v61 = vmul.f32 %v2072_v28, %v4905_v16  ;;  %v5297_v28 = vld [vmem:[#allocation2 + $0x10] sm:$0xff] }
0x14d7   :  { %v2103_v18 = vpop.permute.xlu2 %2102 }
0x14d8   :  { %v2105_v2 = vmul.f32 %v2103_v18, %v4903_v15 }
0x14e0   :  { %v2098_v11 = vpop.permute.xlu2 %2097 }
0x14e4   :  { %v2088_v5 = vpop.permute.xlu1 %2087 }
0x14e6   :  { %v2083_v30 = vpop.permute.xlu0 %2082 }
0x14e7   :  { %v2085_v10 = vmul.f32 %v2083_v30, %v4907_v19  ;;  %v4650_v30 = vld [vmem:[#allocation2 + $0x28] ss:$0 sm:$0xff] }
0x14e8   :  { %v5304_v18 = vadd.f32 %v4650_v30, %v5035_v42 }
0x14e9   :  { %v2090_v51 = vadd.f32 %v2088_v5, %v2085_v10  ;;  %v5300_v5 = vld [vmem:[#allocation2 + $0x8] sm:$0xff] }
0x14ed   :  { %v2093_v9 = vpop.permute.xlu1 %2092 }
0x14ee   :  { %v2095_v0 = vmul.f32 %v2093_v9, %v4909_v20 }
0x14ef   :  { %v2078_v17 = vpop.permute.xlu0 %2077 }
0x14f0   :  { %v2080_v29 = vadd.f32 %v2078_v17, %v2074_v61  ;;  %v2100_v31 = vadd.f32 %v2098_v11, %v2095_v0 }
0x14f2   :  { %v2111_v40 = vmul.f32 %v2090_v51, %v2080_v29 }
0x14f6   :  { %v2108_v38 = vpop.permute.xlu1 %2107 }
0x14f7   :  { %v2110_v14 = vadd.f32 %v2108_v38, %v2105_v2 }
0x14f9   :  { %v2112_v25 = vmul.f32 %v2110_v14, %v2100_v31 }
0x14fb   :  { %v2113_v53 = vmul.f32 %v2112_v25, %v2111_v40 }
0x14fd   :  { %4399 = vmatmul.msk.f32.vlgmr.msrb.gmra.mxu0 %vm524_vm13, %v2113_v53 }
0x14fe   :  { %3184 = vmatpush.msrb.mxu0 %v5162_v26  ;;  %v2194_v49 = vpop.permute.xlu1 %2193 }
0x1500   :  { %3185 = vmatpush.msrb.mxu0 %v5165_v12 }
0x157a   :  { %v2134_v35 = vpop.f32.mrf.mxu0 }
0x157b   :  { %v2137_v50 = vmul.f32 %v2134_v35, %v2134_v35 }
0x157d   :  { %2139 = vrot.lane.b32.xlu2 %v2137_v50, %s4732_s20 }
0x15d7   :  { %v2140_v21 = vpop.permute.xlu2 %2139 }
0x15d8   :  { %v2142_v6 = vadd.f32 %v2140_v21, %v2137_v50 }
0x15da   :  { %4400 = vmatmul.msk.f32.vlgmr.msra.gmra.mxu3 %vm524_vm13, %v2142_v6 }
0x15db   :  { %3213 = vmatpush.msra.mxu3 %v5170_v4 }
0x15dd   :  { %3214 = vmatpush.msra.mxu3 %v5173_v58 }
0x165d   :  { %v2163_v36 = vpop.f32.mrf.mxu3 }
0x165e   :  { %v2164_v63 = vadd.f32 %v5176_v60, %v2163_v36 }
0x1660   :  { %v2167_v43 = vrot.slane %v2164_v63, 2 }
0x1662   :  { %2168 = vrot.lane.b32.xlu0 %v2167_v43, %s4721_s19 }
0x16d4   :  { %v2169_v26 = vpop.permute.xlu0 %2168 }
0x16d5   :  { %v2171_v12 = vadd.f32 %v2169_v26, %v5188_v48  ;;  %v5319_v26 = vld [vmem:[#allocation2 + $0x48] sm:$0xff] }
0x16d7   :  { %v4401_v27 = vmul.f32 -1.442695, %v2171_v12  ;;  %v5322_v12 = vld [vmem:[#allocation2 + $0x40] sm:$0xff] }
0x16d9   :  { %4580 = vpow2.f32 %v4401_v27  ;;  %v5325_v27 = vld [vmem:[#allocation2 + $0x38] sm:$0xff] }
0x16df   :  { %v4581_v7 = vpop.eup %4580 }
0x16e0   :  { %v2175_v39 = vadd.f32 1.0, %v4581_v7  ;;  %v5331_v7 = vld [vmem:[#allocation2 + $0x50] ss:$0 sm:$0xff] }
0x16e2   :  { %4582 = vrcp.f32 %v2175_v39  ;;  %v2187_v4 = vand.u32 2147483648, %v2175_v39  ;;  %v2185_v58 = vand.u32 2147483647, %v2175_v39  ;;  %vm2181_vm4 = vweird.f32 %v2175_v39 }
0x16e4   :  { %v2188_v60 = vor.u32 1.1754944e-38, %v2187_v4  ;;  %vm2186_vm7 = vcmp.eq.f32.partialorder %v2185_v58, 8.507059e+37 }
0x16e8   :  { %v4583_v34 = vpop.eup %4582 }
0x16e9   :  { %v2177_v24 = vmul.f32 %v4583_v34, %v2175_v39  ;;  %vm2182_vm3 = vweird.f32 %v4583_v34 }
0x16ea   :  { %vm2183_vm6 = vmor %vm2181_vm4, %vm2182_vm3 }
0x16eb   :  { %v2178_v45 = vsub.f32 1.0, %v2177_v24 }
0x16ed   :  { %v2179_v47 = vmul.f32 %v4583_v34, %v2178_v45 }
0x16ef   :  { %v2180_v33 = vadd.f32 %v4583_v34, %v2179_v47 }
0x16f1   :  { %v2184_v32 = vsel %vm2183_vm6, %v4583_v34, %v2180_v33 }
0x16f2   :  { %v2189_v48 = vsel %vm2186_vm7, %v2188_v60, %v2184_v32 }
0x16f3   :  { %v2196_v52 = vmul.f32 %v2194_v49, %v2189_v48 }
0x16f5   :  { %v2198_v1 = vrot.slane %v2196_v52, 6 }
0x16f7   :  { %2199 = vrot.lane.b32.xlu2 %v2198_v1, %s4720_s18 }
0x1751   :  { %v2200_v55 = vpop.permute.xlu2 %2199 }
0x1752   :  { %4402 = vmatmul.msk.f32.vlgmr.msra.gmra.mxu1 %vm80_vm5, %v2200_v55 }
0x1753   :  { %3268 = vmatpush.msra.mxu1 %v5291_v37 }
0x1755   :  { %3269 = vmatpush.msra.mxu1 %v5294_v23 }
0x1757   :  { %3270 = vmatpush.msra.mxu1 %v5297_v28 }
0x1759   :  { %3271 = vmatpush.msra.mxu1 %v5300_v5 }
0x17cf   :  { %v2220_v9 = vpop.f32.mrf.mxu1 }
0x17d0   :  { %v5307_v17 = vadd.f32 %v2220_v9, %v5304_v18 }
0x17d2   :  { %v4403_v61 = vmul.f32 -1.442695, %v5307_v17 }
0x17d4   :  { %4584 = vpow2.f32 %v4403_v61 }
0x17da   :  { %v4585_v10 = vpop.eup %4584 }
0x17db   :  { %v2227_v0 = vadd.f32 1.0, %v4585_v10 }
0x17dd   :  { %4586 = vrcp.f32 %v2227_v0  ;;  %v2239_v38 = vand.u32 2147483648, %v2227_v0  ;;  %v2237_v31 = vand.u32 2147483647, %v2227_v0  ;;  %vm2233_vm9 = vweird.f32 %v2227_v0 }
0x17df   :  { %v2240_v42 = vor.u32 1.1754944e-38, %v2239_v38  ;;  %vm2238_vm11 = vcmp.eq.f32.partialorder %v2237_v31, 8.507059e+37 }
0x17e3   :  { %v4587_v2 = vpop.eup %4586 }
0x17e4   :  { %v2229_v29 = vmul.f32 %v4587_v2, %v2227_v0  ;;  %vm2234_vm8 = vweird.f32 %v4587_v2 }
0x17e5   :  { %vm2235_vm10 = vmor %vm2233_vm9, %vm2234_vm8 }
0x17e6   :  { %v2230_v11 = vsub.f32 1.0, %v2229_v29 }
0x17e8   :  { %v2231_v51 = vmul.f32 %v4587_v2, %v2230_v11 }
0x17ea   :  { %v2232_v14 = vadd.f32 %v4587_v2, %v2231_v51 }
0x17ec   :  { %v2236_v40 = vsel %vm2235_vm10, %v4587_v2, %v2232_v14 }
0x17ed   :  { %v2241_v25 = vsel %vm2238_vm11, %v2240_v42, %v2236_v40 }
0x17ee   :  { %v2243_v53 = vmul.f32 2.0, %v2241_v25  ;;  %v2246_v6 = vmul.f32 %v2241_v25, %v1732_v22 }
0x17f0   :  { %v4404_v35 = vadd.f32 -1.0, %v2243_v53 }
0x17f2   :  { %2248 = vrot.lane.b32.xlu0 %v4404_v35, %s4719_s17 }
0x1864   :  { %v2249_v50 = vpop.permute.xlu0 %2248 }
0x1865   :  { %v2251_v21 = vmul.f32 %v2249_v50, %v2241_v25 }
0x1867   :  { %2253 = vrot.lane.b32.xlu1 %v2251_v21, %s4720_s18 }
0x18d9   :  { %v2254_v36 = vpop.permute.xlu1 %2253 }
0x18da   :  { %v5314_v63 = vadd.f32 %v2254_v36, %v2246_v6 }
0x18dc   :  { %2258 = vrot.lane.b32.xlu2 %v5314_v63, %s4721_s19 }
0x1936   :  { %v2259_v43 = vpop.permute.xlu2 %2258 }
0x1937   :  { %4405 = vmatmul.msk.f32.vlgmr.msra.gmra.mxu2 %vm80_vm5, %v2259_v43 }
0x1938   :  { %3332 = vmatpush.msra.mxu2 %v5319_v26 }
0x193a   :  { %3333 = vmatpush.msra.mxu2 %v5322_v12 }
0x193c   :  { %3334 = vmatpush.msra.mxu2 %v5325_v27 }
0x193e   :  { %3335 = vmatpush.msra.mxu2 %v5328_v46 }
0x19ba   :  { %v2279_v22 = vpop.f32.mrf.mxu2 }
0x19bb   :  { %v2280_v39 = vadd.f32 %v5331_v7, %v2279_v22 }
0x19bd   :  { %4588 = vtanh.f32 %v2280_v39 }
0x19be   :  { %4590 = vtanh.f32 %v5314_v63 }
0x19c3   :  { %v4589_v34 = vpop.eup %4588 }
0x19c4   :  { %v5334_v24 = vmul.f32 1.5707964, %v4589_v34 }
0x19c6   :  { %v2287_v45 = vand.u32 2139095040, %v5334_v24  ;;  %v2284_v58 = vand.u32 2147483647, %v5334_v24  ;;  %vm2286_vm10 = vcmp.lt.s32.totalorder %v5334_v24, 0 }
0x19c8   :  { %v2288_v4 = vshrl.u32 %v2287_v45, 23  ;;  %v2291_v60 = vand.u32 8388607, %v2284_v58  ;;  %vm2285_vm11 = vcmp.le.f32.partialorder %v2284_v58, 0.7853982 }
0x19ca   :  { %v4406_v47 = vadd.s32 4294967169, %v2288_v4  ;;  %v2292_v52 = vor.u32 8388608, %v2291_v60 }
0x19cc   :  { %v2294_v33 = vadd.s32 1, %v4406_v47  ;;  %v5353_v25 = vshll.u32 %v2292_v52, 8 }
0x19ce   :  { %vm2295_vm12 = vcmp.gt.s32.totalorder %v2294_v33, 0  ;;  %v2333_v39 = vand.u32 65535, %v5353_v25  ;;  %v2334_v34 = vshrl.u32 %v5353_v25, 16 }
0x19cf   :  { %v2296_v32 = vsel %vm2295_vm12, %v2294_v33, 0 }
0x19d0   :  { %v2298_v49 = vand.u32 31, %v2296_v32  ;;  %v5340_v1 = vshrl.u32 %v2296_v32, 5 }
0x19d2   :  { %v2299_v48 = vsub.s32 32, %v2298_v49  ;;  %v2301_v55 = vshll.u32 %v4723_v54, %v2298_v49  ;;  %v2304_v30 = vshll.u32 %v4724_v56, %v2298_v49  ;;  %v2307_v10 = vshll.u32 %v4725_v59, %v2298_v49 }
0x19d3   :  { %v2310_v2 = vshll.u32 %v4726_v62, %v2298_v49  ;;  %v2313_v11 = vshll.u32 %v4727_v3, %v2298_v49  ;;  %vm2316_vm14 = vcmp.lt.s32.totalorder %v5340_v1, 1  ;;  %vm2319_vm15 = vcmp.lt.s32.totalorder %v5340_v1, 4 }
0x19d4   :  { %v2302_v9 = vshrl.u32 %v4724_v56, %v2299_v48  ;;  %v2305_v61 = vshrl.u32 %v4725_v59, %v2299_v48  ;;  %v2308_v0 = vshrl.u32 %v4726_v62, %v2299_v48  ;;  %v2311_v29 = vshrl.u32 %v4727_v3, %v2299_v48 }
0x19d5   :  { %v2314_v38 = vshrl.u32 %v4728_v8, %v2299_v48  ;;  %vm2318_vm1 = vcmp.lt.s32.totalorder %v5340_v1, 3  ;;  %vm2317_vm0 = vcmp.lt.s32.totalorder %v5340_v1, 2 }
0x19d6   :  { %v2303_v51 = vor.u32 %v2302_v9, %v2301_v55  ;;  %v2306_v31 = vor.u32 %v2305_v61, %v2304_v30  ;;  %v2309_v14 = vor.u32 %v2308_v0, %v2307_v10  ;;  %v2312_v42 = vor.u32 %v2311_v29, %v2310_v2 }
0x19d7   :  { %v2315_v40 = vor.u32 %v2314_v38, %v2313_v11 }
0x19d8   :  { %v2324_v53 = vsel %vm2316_vm14, %v2303_v51, %v2306_v31  ;;  %v2328_v35 = vsel %vm2316_vm14, %v2306_v31, %v2309_v14  ;;  %v2325_v50 = vsel %vm2319_vm15, %v2312_v42, 920167782 }
0x19d9   :  { %v2329_v21 = vsel %vm2319_vm15, %v2315_v40, 1326507024  ;;  %v2326_v6 = vsel %vm2318_vm1, %v2309_v14, %v2325_v50 }
0x19da   :  { %v2330_v36 = vsel %vm2318_vm1, %v2312_v42, %v2329_v21  ;;  %v2327_v43 = vsel %vm2317_vm0, %v2324_v53, %v2326_v6  ;;  %v2300_v6 = vshrl.u32 %v4723_v54, %v2299_v48 }
0x19db   :  { %v2331_v22 = vsel %vm2317_vm0, %v2328_v35, %v2330_v36  ;;  %v2357_v47 = vand.u32 65535, %v2327_v43  ;;  %v2358_v33 = vshrl.u32 %v2327_v43, 16  ;;  %v2321_v35 = vsel %vm2319_vm15, %v2309_v14, 2102212464 }
0x19dc   :  { %v2335_v45 = vand.u32 65535, %v2331_v22  ;;  %v2336_v4 = vshrl.u32 %v2331_v22, 16 }
0x19dd   :  { %v2360_v49 = vmul.u32 %v2358_v33, %v2333_v39  ;;  %v2361_v52 = vmul.u32 %v2357_v47, %v2334_v34  ;;  %v2359_v61 = vmul.u32 %v2357_v47, %v2333_v39  ;;  %v2362_v29 = vmul.u32 %v2358_v33, %v2334_v34 }
0x19de   :  { %v2338_v60 = vmul.u32 %v2336_v4, %v2333_v39  ;;  %v2339_v32 = vmul.u32 %v2335_v45, %v2334_v34  ;;  %v2337_v55 = vmul.u32 %v2335_v45, %v2333_v39  ;;  %v2340_v9 = vmul.u32 %v2336_v4, %v2334_v34 }
0x19df   :  { %v2363_v10 = vshll.u32 %v2360_v49, 16  ;;  %v2365_v38 = vshll.u32 %v2361_v52, 16  ;;  %v2364_v39 = vshrl.u32 %v2360_v49, 16  ;;  %v2320_v45 = vsel %vm2316_vm14, %v2300_v6, %v2303_v51 }
0x19e0   :  { %v2341_v30 = vshll.u32 %v2338_v60, 16  ;;  %v2343_v0 = vshll.u32 %v2339_v32, 16  ;;  %v2342_v36 = vshrl.u32 %v2338_v60, 16  ;;  %v2322_v4 = vsel %vm2318_vm1, %v2306_v31, %v2321_v35 }
0x19e1   :  { %vm2367_vm3 = vc.u32 %v2359_v61, %v2363_v10  ;;  %v2369_v42 = vadd.s32 %v2363_v10, %v2359_v61  ;;  %v2344_v47 = vshrl.u32 %v2339_v32, 16  ;;  %v2366_v33 = vshrl.u32 %v2361_v52, 16 }
0x19e2   :  { %vm2345_vm2 = vc.u32 %v2337_v55, %v2341_v30  ;;  %v2347_v2 = vadd.s32 %v2341_v30, %v2337_v55  ;;  %v2368_v53 = vsel %vm2367_vm3, 1, %v4722_v41  ;;  %v2323_v48 = vsel %vm2317_vm0, %v2320_v45, %v2322_v4 }
0x19e3   :  { %v2346_v11 = vsel %vm2345_vm2, 1, %v4722_v41  ;;  %v2370_v21 = vadd.s32 %v2368_v53, %v2362_v29  ;;  %vm2371_vm6 = vc.u32 %v2369_v42, %v2365_v38  ;;  %v2377_v49 = vmul.u32 %v5353_v25, %v2323_v48 }
0x19e4   :  { %v2348_v40 = vadd.s32 %v2346_v11, %v2340_v9  ;;  %vm2349_vm4 = vc.u32 %v2347_v2, %v2343_v0  ;;  %v2372_v22 = vsel %vm2371_vm6, 1, %v4722_v41  ;;  %v2373_v9 = vadd.s32 %v2369_v42, %v2365_v38 }
0x19e5   :  { %v2350_v50 = vsel %vm2349_vm4, 1, %v4722_v41  ;;  %v2374_v34 = vadd.s32 %v2372_v22, %v2370_v21  ;;  %vm2427_vm3 = vweird.f32 %v5334_v24 }
0x19e6   :  { %v2352_v43 = vadd.s32 %v2350_v50, %v2348_v40 }
0x19e7   :  { %v2375_v55 = vadd.s32 %v2374_v34, %v2364_v39 }
0x19e8   :  { %v2353_v14 = vadd.s32 %v2352_v43, %v2342_v36 }
0x19e9   :  { %v2376_v60 = vadd.s32 %v2375_v55, %v2366_v33 }
0x19ea   :  { %v2354_v30 = vadd.s32 %v2353_v14, %v2344_v47 }
0x19eb   :  { %v2380_v61 = vadd.s32 1, %v2376_v60 }
0x19ec   :  { %vm2379_vm7 = vc.u32 %v2354_v30, %v2373_v9  ;;  %v2378_v1 = vadd.s32 %v2373_v9, %v2354_v30 }
0x19ed   :  { %v2381_v10 = vsel %vm2379_vm7, %v2380_v61, %v2376_v60 }
0x19ee   :  { %v2382_v0 = vadd.s32 %v2381_v10, %v2377_v49 }
0x19f0   :  { %v2383_v51 = vadd.s32 536870912, %v2382_v0 }
0x19f2   :  { %v2384_v2 = vshrl.u32 %v2383_v51, 30 }
0x19f4   :  { %v2385_v29 = vshll.u32 %v2384_v2, 30  ;;  %v2408_v4 = vsub.s32 4, %v2384_v2 }
0x19f6   :  { %v2386_v31 = vsub.s32 %v2382_v0, %v2385_v29  ;;  %v2409_v30 = vsel %vm2286_vm10, %v2408_v4, %v2384_v2 }
0x19f7   :  { %v2411_v60 = vsel %vm2285_vm11, 0, %v2409_v30 }
0x19f8   :  { %vm2387_vm8 = vcmp.lt.s32.totalorder %v2386_v31, 0  ;;  %v2388_v32 = vsub.s32 0, %v2386_v31  ;;  %v2582_v51 = vadd.s32 3, %v2411_v60 }
0x19fa   :  { %v2389_v52 = vsel %vm2387_vm8, %v2388_v32, %v2386_v31 }
0x19fb   :  { %v2390_v11 = vclz %v2389_v52  ;;  %v2428_v52 = vand.u32 3, %v2411_v60 }
0x19fd   :  { %v4407_v40 = vadd.s32 4294967294, %v2390_v11  ;;  %v2583_v11 = vand.u32 3, %v2582_v51  ;;  %vm2429_vm12 = vcmp.lt.s32.totalorder %v2428_v52, 2  ;;  %vm2430_vm14 = vcmp.eq.s32.totalorder %v2428_v52, 0 }
0x19fe   :  { %vm2433_vm15 = vcmp.eq.s32.totalorder %v2428_v52, 2 }
0x19ff   :  { %vm4408_vm9 = vcmp.lt.s32.totalorder %v4407_v40, 0  ;;  %vm2584_vm1 = vcmp.lt.s32.totalorder %v2583_v11, 2  ;;  %vm2585_vm0 = vcmp.eq.s32.totalorder %v2583_v11, 0  ;;  %vm2588_vm2 = vcmp.eq.s32.totalorder %v2583_v11, 2 }
0x1a00   :  { %v2393_v38 = vsel %vm4408_vm9, 0, %v4407_v40 }
0x1a01   :  { %v2394_v42 = vsub.s32 32, %v2393_v38  ;;  %v2398_v53 = vsub.s32 4294967266, %v2393_v38  ;;  %v2395_v35 = vshll.u32 %v2386_v31, %v2393_v38 }
0x1a03   :  { %v2396_v50 = vshrl.u32 %v2378_v1, %v2394_v42  ;;  %v2399_v21 = vadd.s32 127, %v2398_v53 }
0x1a05   :  { %v2397_v25 = vor.u32 %v2396_v50, %v2395_v35  ;;  %v2400_v6 = vshll.u32 %v2399_v21, 23 }
0x1a07   :  { %v2401_v36 = vor.u32 4788187, %v2400_v6  ;;  %v2404_v22 = vcvt.s32.f32 %v2397_v25 }
0x1a09   :  { %v2402_v43 = vand.u32 2147483647, %v2401_v36 }
0x1a0b   :  { %v2405_v39 = vmul.f32 %v2404_v22, %v2402_v43 }
0x1a0d   :  { %v2406_v34 = vxor.u32 2147483648, %v2405_v39 }
0x1a0f   :  { %v2407_v45 = vsel %vm2286_vm10, %v2406_v34, %v2405_v39 }
0x1a10   :  { %v2410_v47 = vsel %vm2285_vm11, %v5334_v24, %v2407_v45  ;;  %v4591_v24 = vpop.eup %4590 }
0x1a11   :  { %v2412_v14 = vmul.f32 %v2410_v47, %v2410_v47 }
0x1a13   :  { %v2413_v33 = vmul.f32 -0.001358992, %v2412_v14  ;;  %v2420_v55 = vmul.f32 -0.00019511016, %v2412_v14 }
0x1a15   :  { %v2414_v9 = vadd.f32 0.041655596, %v2413_v33  ;;  %v2421_v48 = vadd.f32 0.008332121, %v2420_v55 }
0x1a17   :  { %v2415_v61 = vmul.f32 %v2414_v9, %v2412_v14  ;;  %v2422_v49 = vmul.f32 %v2421_v48, %v2412_v14 }
0x1a19   :  { %v2416_v10 = vadd.f32 -0.4999988, %v2415_v61  ;;  %v2423_v0 = vadd.f32 -0.16666654, %v2422_v49 }
0x1a1b   :  { %v2417_v29 = vmul.f32 %v2416_v10, %v2412_v14  ;;  %v2424_v31 = vmul.f32 %v2423_v0, %v2412_v14 }
0x1a1d   :  { %v2418_v32 = vadd.f32 1.0, %v2417_v29  ;;  %v2425_v58 = vadd.f32 1.0, %v2424_v31  ;;  %v5410_v29 = vld [vmem:[#allocation2 + $0x78] sm:$0xff]  ;;  %v5413_v31 = vld [vmem:[#allocation2 + $0x70] sm:$0xff] }
0x1a1f   :  { %v2426_v40 = vmul.f32 %v2425_v58, %v2410_v47  ;;  %v2434_v38 = vxor.u32 2147483648, %v2418_v32 }
0x1a21   :  { %v2431_v1 = vxor.u32 2147483648, %v2426_v40  ;;  %v2435_v42 = vsel %vm2433_vm15, %v2434_v38, %v2426_v40  ;;  %v2590_v35 = vsel %vm2588_vm2, %v2434_v38, %v2426_v40  ;;  %v5418_v40 = vld [vmem:[#allocation2 + $0x60] sm:$0xff]  ;;  %v5421_v38 = vld [vmem:[#allocation2 + $0x58] sm:$0xff] }
0x1a23   :  { %v2432_v2 = vsel %vm2430_vm14, %v2418_v32, %v2431_v1  ;;  %v2587_v53 = vsel %vm2585_vm0, %v2418_v32, %v2431_v1 }
0x1a24   :  { %v2436_v50 = vsel %vm2429_vm12, %v2432_v2, %v2435_v42  ;;  %v2591_v21 = vsel %vm2584_vm1, %v2587_v53, %v2590_v35  ;;  %v5424_v2 = vld [vmem:[#allocation2 + $0x68] ss:$0 sm:$0xff] }
0x1a25   :  { %v2437_v25 = vsel %vm2427_vm3, nan, %v2436_v50  ;;  %v2592_v6 = vsel %vm2427_vm3, nan, %v2591_v21 }
0x1a26   :  { %v2593_v36 = vsub.f32 %v2592_v6, %v2437_v25 }
0x1a28   :  { %2617 = vperm.xlu2 %4500, %v2593_v36   ;;  %2607 = vperm.xlu1 %4502, %v2593_v36  }
0x1a29   :  { %2596 = vperm.xlu0 %4496, %v2593_v36  }
0x1a30   :  { %4505 = vset.pattern.permute.xlu2 %v4730_v13  ;;  %4504 = vset.pattern.permute.xlu1 %v4722_v41 }
0x1a31   :  { %4503 = vset.pattern.permute.xlu0 %v4729_v44  ;;  %2612 = vperm.xlu2 %4505, %v2437_v25  }
0x1a32   :  { %2602 = vperm.xlu1 %4504, %v2437_v25   ;;  %2627 = vperm.xlu0 %4503, %v2593_v36  }
0x1a39   :  { %4507 = vset.pattern.permute.xlu2 %v4729_v44 }
0x1a3a   :  { %4506 = vset.pattern.permute.xlu1 %v4731_v57  ;;  %2632 = vperm.xlu2 %4507, %v2437_v25  }
0x1a3b   :  { %2622 = vperm.xlu1 %4506, %v2437_v25   ;;  %4511 = vset.pattern.permute.xlu0 %v4731_v57 }
0x1a42   :  { %2717 = vrot.lane.b32.xlu2 %v4591_v24, %s4719_s17 }
0x1a43   :  { %4508 = vset.pattern.permute.xlu2 %v4722_v41  ;;  %4509 = vset.pattern.permute.xlu1 %v4722_v41 }
0x1a82   :  { %v2618_v43 = vpop.permute.xlu2 %2617 }
0x1a83   :  { %v2620_v55 = vmul.f32 %v2618_v43, %v4909_v20 }
0x1a8b   :  { %v2613_v34 = vpop.permute.xlu2 %2612 }
0x1a94   :  { %v2633_v9 = vpop.permute.xlu2 %2632 }
0x1a9a   :  { %v2608_v22 = vpop.permute.xlu1 %2607 }
0x1a9b   :  { %v2597_v39 = vpop.permute.xlu0 %2596  ;;  %v2610_v47 = vmul.f32 %v2608_v22, %v4907_v19 }
0x1a9c   :  { %v2599_v14 = vmul.f32 %v2597_v39, %v4905_v16 }
0x1a9d   :  { %v2615_v60 = vadd.f32 %v2613_v34, %v2610_v47  ;;  %v2718_v47 = vpop.permute.xlu2 %2717 }
0x1aa4   :  { %v2603_v45 = vpop.permute.xlu1 %2602  ;;  %v2628_v4 = vpop.permute.xlu0 %2627 }
0x1aa5   :  { %v2630_v33 = vmul.f32 %v2628_v4, %v4903_v15  ;;  %v2605_v30 = vadd.f32 %v2603_v45, %v2599_v14 }
0x1aa7   :  { %v2635_v61 = vadd.f32 %v2633_v9, %v2630_v33  ;;  %v2636_v10 = vmul.f32 %v2615_v60, %v2605_v30 }
0x1aad   :  { %v2623_v48 = vpop.permute.xlu1 %2622 }
0x1aae   :  { %v2625_v49 = vadd.f32 %v2623_v48, %v2620_v55 }
0x1ab0   :  { %v2637_v0 = vmul.f32 %v2635_v61, %v2625_v49 }
0x1ab2   :  { %v2638_v51 = vmul.f32 %v2637_v0, %v2636_v10 }
0x1ab4   :  { %4412 = vmatmul.msk.f32.vlgmr.msra.gmra.mxu0 %vm524_vm13, %v2638_v51 }
0x1ab5   :  { %3714 = vmatpush.msra.mxu0 %v5410_v29 }
0x1ab7   :  { %3715 = vmatpush.msra.mxu0 %v5413_v31 }
0x1b31   :  { %v2659_v32 = vpop.f32.mrf.mxu0 }
0x1b32   :  { %v2662_v58 = vmul.f32 %v2659_v32, %v2659_v32 }
0x1b34   :  { %2664 = vrot.lane.b32.xlu0 %v2662_v58, %s4732_s20 }
0x1ba6   :  { %v2665_v52 = vpop.permute.xlu0 %2664 }
0x1ba7   :  { %v2667_v11 = vadd.f32 %v2665_v52, %v2662_v58 }
0x1ba9   :  { %4413 = vmatmul.msk.f32.vlgmr.msrb.gmra.mxu3 %vm524_vm13, %v2667_v11 }
0x1baa   :  { %3743 = vmatpush.msrb.mxu3 %v5418_v40 }
0x1bac   :  { %3744 = vmatpush.msrb.mxu3 %v5421_v38 }
0x1c2c   :  { %v2688_v1 = vpop.f32.mrf.mxu3 }
0x1c2d   :  { %v2689_v42 = vadd.f32 %v5424_v2, %v2688_v1 }
0x1c2f   :  { %2692 = vrot.lane.b32.xlu1 %v2689_v42, %s4721_s19 }
0x1ca1   :  { %v2693_v53 = vpop.permute.xlu1 %2692 }
0x1ca2   :  { %v2695_v35 = vadd.f32 %v2693_v53, %v5307_v17  ;;  %v2771_v53 = vrot.slane %v5314_v63, 6 }
0x1ca4   :  { %v4414_v50 = vmul.f32 -1.442695, %v2695_v35 }
0x1ca6   :  { %4592 = vpow2.f32 %v4414_v50 }
0x1cac   :  { %v4593_v21 = vpop.eup %4592 }
0x1cad   :  { %v2699_v25 = vadd.f32 1.0, %v4593_v21 }
0x1caf   :  { %4594 = vrcp.f32 %v2699_v25  ;;  %v2711_v43 = vand.u32 2147483648, %v2699_v25  ;;  %v2709_v39 = vand.u32 2147483647, %v2699_v25  ;;  %vm2705_vm6 = vweird.f32 %v2699_v25 }
0x1cb1   :  { %v2712_v45 = vor.u32 1.1754944e-38, %v2711_v43  ;;  %vm2710_vm8 = vcmp.eq.f32.partialorder %v2709_v39, 8.507059e+37 }
0x1cb5   :  { %v4595_v6 = vpop.eup %4594 }
0x1cb6   :  { %v2701_v36 = vmul.f32 %v4595_v6, %v2699_v25  ;;  %vm2706_vm4 = vweird.f32 %v4595_v6 }
0x1cb7   :  { %vm2707_vm7 = vmor %vm2705_vm6, %vm2706_vm4 }
0x1cb8   :  { %v2702_v24 = vsub.f32 1.0, %v2701_v36 }
0x1cba   :  { %v2703_v22 = vmul.f32 %v4595_v6, %v2702_v24 }
0x1cbc   :  { %v2704_v34 = vadd.f32 %v4595_v6, %v2703_v22 }
0x1cbe   :  { %v2708_v4 = vsel %vm2707_vm7, %v4595_v6, %v2704_v34 }
0x1cbf   :  { %v2713_v17 = vsel %vm2710_vm8, %v2712_v45, %v2708_v4 }
0x1cc0   :  { %v2720_v14 = vmul.f32 %v2718_v47, %v2713_v17 }
0x1cc2   :  { %2722 = vrot.lane.b32.xlu0 %v2720_v14, %s4720_s18 }
0x1d34   :  { %v2723_v33 = vpop.permute.xlu0 %2722 }
0x1d35   :  { %4415 = vmatmul.msk.f32.vlgmr.msrb.gmra.mxu1 %vm80_vm5, %v2723_v33 }
0x1d36   :  { %3798 = vmatpush.msrb.mxu1 %v5291_v37 }
0x1d38   :  { %3799 = vmatpush.msrb.mxu1 %v5294_v23 }
0x1d3a   :  { %3800 = vmatpush.msrb.mxu1 %v5297_v28 }
0x1d3c   :  { %3801 = vmatpush.msrb.mxu1 %v5300_v5 }
0x1db2   :  { %v2743_v55 = vpop.f32.mrf.mxu1 }
0x1db3   :  { %v2747_v30 = vrot.slane %v2743_v55, 6 }
0x1db5   :  { %v5436_v9 = vadd.f32 %v2747_v30, %v5304_v18 }
0x1db7   :  { %v4416_v48 = vmul.f32 -1.442695, %v5436_v9 }
0x1db9   :  { %4596 = vpow2.f32 %v4416_v48 }
0x1dbf   :  { %v4597_v60 = vpop.eup %4596 }
0x1dc0   :  { %v2753_v61 = vadd.f32 1.0, %v4597_v60 }
0x1dc2   :  { %4598 = vrcp.f32 %v2753_v61  ;;  %v2765_v0 = vand.u32 2147483648, %v2753_v61  ;;  %v2763_v28 = vand.u32 2147483647, %v2753_v61  ;;  %vm2759_vm10 = vweird.f32 %v2753_v61 }
0x1dc4   :  { %v2766_v5 = vor.u32 1.1754944e-38, %v2765_v0  ;;  %vm2764_vm12 = vcmp.eq.f32.partialorder %v2763_v28, 8.507059e+37 }
0x1dc8   :  { %v4599_v49 = vpop.eup %4598 }
0x1dc9   :  { %v2755_v10 = vmul.f32 %v4599_v49, %v2753_v61  ;;  %vm2760_vm9 = vweird.f32 %v4599_v49 }
0x1dca   :  { %vm2761_vm11 = vmor %vm2759_vm10, %vm2760_vm9 }
0x1dcb   :  { %v2756_v37 = vsub.f32 1.0, %v2755_v10 }
0x1dcd   :  { %v2757_v23 = vmul.f32 %v4599_v49, %v2756_v37 }
0x1dcf   :  { %v2758_v51 = vadd.f32 %v4599_v49, %v2757_v23 }
0x1dd1   :  { %v2762_v32 = vsel %vm2761_vm11, %v4599_v49, %v2758_v51 }
0x1dd2   :  { %v2767_v58 = vsel %vm2764_vm12, %v2766_v5, %v2762_v32 }
0x1dd3   :  { %v2769_v52 = vmul.f32 2.0, %v2767_v58  ;;  %v2773_v35 = vmul.f32 %v2771_v53, %v2767_v58 }
0x1dd5   :  { %v4417_v11 = vadd.f32 -1.0, %v2769_v52 }
0x1dd7   :  { %2775 = vrot.lane.b32.xlu1 %v4417_v11, %s4719_s17 }
0x1e49   :  { %v2776_v1 = vpop.permute.xlu1 %2775 }
0x1e4a   :  { %v2778_v42 = vmul.f32 %v2776_v1, %v2767_v58 }
0x1e4c   :  { %2780 = vrot.lane.b32.xlu2 %v2778_v42, %s4720_s18 }
0x1ea6   :  { %v2781_v50 = vpop.permute.xlu2 %2780 }
0x1ea7   :  { %v5442_v21 = vadd.f32 %v2781_v50, %v2773_v35 }
0x1ea9   :  { %v2785_v25 = vrot.slane %v5442_v21, 2 }
0x1eab   :  { %2786 = vrot.lane.b32.xlu0 %v2785_v25, %s4721_s19 }
0x1f1d   :  { %v2787_v6 = vpop.permute.xlu0 %2786 }
0x1f1e   :  { %4418 = vmatmul.msk.f32.vlgmr.msrb.gmra.mxu2 %vm80_vm5, %v2787_v6 }
0x1f1f   :  { %3862 = vmatpush.msrb.mxu2 %v5319_v26 }
0x1f21   :  { %3863 = vmatpush.msrb.mxu2 %v5322_v12 }
0x1f23   :  { %3864 = vmatpush.msrb.mxu2 %v5325_v27 }
0x1f25   :  { %3865 = vmatpush.msrb.mxu2 %v5328_v46 }
0x1fa1   :  { %v2807_v63 = vpop.f32.mrf.mxu2 }
0x1fa2   :  { %v2808_v36 = vadd.f32 %v5331_v7, %v2807_v63 }
0x1fa4   :  { %4600 = vtanh.f32 %v2808_v36 }
0x1fa5   :  { %4602 = vtanh.f32 %v5442_v21 }
0x1faa   :  { %v4601_v24 = vpop.eup %4600 }
0x1fab   :  { %v5452_v43 = vmul.f32 1.5707964, %v4601_v24 }
0x1fad   :  { %v2815_v22 = vand.u32 2139095040, %v5452_v43  ;;  %v2812_v45 = vand.u32 2147483647, %v5452_v43  ;;  %vm2814_vm11 = vcmp.lt.s32.totalorder %v5452_v43, 0 }
0x1faf   :  { %v2816_v39 = vshrl.u32 %v2815_v22, 23  ;;  %v2819_v12 = vand.u32 8388607, %v2812_v45  ;;  %vm2813_vm12 = vcmp.le.f32.partialorder %v2812_v45, 0.7853982 }
0x1fb1   :  { %v4419_v34 = vadd.s32 4294967169, %v2816_v39  ;;  %v2820_v47 = vor.u32 8388608, %v2819_v12 }
0x1fb3   :  { %v2822_v26 = vadd.s32 1, %v4419_v34  ;;  %v5471_v5 = vshll.u32 %v2820_v47, 8 }
0x1fb5   :  { %vm2823_vm14 = vcmp.gt.s32.totalorder %v2822_v26, 0  ;;  %v2861_v50 = vand.u32 65535, %v5471_v5  ;;  %v2862_v25 = vshrl.u32 %v5471_v5, 16 }
0x1fb6   :  { %v2824_v27 = vsel %vm2823_vm14, %v2822_v26, 0 }
0x1fb7   :  { %v2826_v46 = vand.u32 31, %v2824_v27  ;;  %v5458_v7 = vshrl.u32 %v2824_v27, 5 }
0x1fb9   :  { %v2827_v4 = vsub.s32 32, %v2826_v46  ;;  %v2829_v17 = vshll.u32 %v4723_v54, %v2826_v46  ;;  %v2832_v14 = vshll.u32 %v4724_v56, %v2826_v46  ;;  %v2835_v30 = vshll.u32 %v4725_v59, %v2826_v46 }
0x1fba   :  { %v2838_v60 = vshll.u32 %v4726_v62, %v2826_v46  ;;  %v2841_v49 = vshll.u32 %v4727_v3, %v2826_v46  ;;  %vm2844_vm15 = vcmp.lt.s32.totalorder %v5458_v7, 1  ;;  %vm2847_vm1 = vcmp.lt.s32.totalorder %v5458_v7, 4 }
0x1fbb   :  { %v2830_v33 = vshrl.u32 %v4724_v56, %v2827_v4  ;;  %v2833_v55 = vshrl.u32 %v4725_v59, %v2827_v4  ;;  %v2836_v48 = vshrl.u32 %v4726_v62, %v2827_v4  ;;  %v2839_v61 = vshrl.u32 %v4727_v3, %v2827_v4 }
0x1fbc   :  { %v2842_v10 = vshrl.u32 %v4728_v8, %v2827_v4  ;;  %vm2846_vm0 = vcmp.lt.s32.totalorder %v5458_v7, 3  ;;  %vm2845_vm2 = vcmp.lt.s32.totalorder %v5458_v7, 2 }
0x1fbd   :  { %v2831_v37 = vor.u32 %v2830_v33, %v2829_v17  ;;  %v2834_v0 = vor.u32 %v2833_v55, %v2832_v14  ;;  %v2837_v23 = vor.u32 %v2836_v48, %v2835_v30  ;;  %v2840_v28 = vor.u32 %v2839_v61, %v2838_v60 }
0x1fbe   :  { %v2843_v51 = vor.u32 %v2842_v10, %v2841_v49 }
0x1fbf   :  { %v2852_v32 = vsel %vm2844_vm15, %v2831_v37, %v2834_v0  ;;  %v2856_v58 = vsel %vm2844_vm15, %v2834_v0, %v2837_v23  ;;  %v2853_v52 = vsel %vm2847_vm1, %v2840_v28, 920167782  ;;  %v2849_v10 = vsel %vm2847_vm1, %v2837_v23, 2102212464 }
0x1fc0   :  { %v2857_v11 = vsel %vm2847_vm1, %v2843_v51, 1326507024  ;;  %v2854_v1 = vsel %vm2846_vm0, %v2837_v23, %v2853_v52 }
0x1fc1   :  { %v2858_v42 = vsel %vm2846_vm0, %v2840_v28, %v2857_v11  ;;  %v2855_v53 = vsel %vm2845_vm2, %v2852_v32, %v2854_v1  ;;  %v2828_v32 = vshrl.u32 %v4723_v54, %v2827_v4 }
0x1fc2   :  { %v2859_v35 = vsel %vm2845_vm2, %v2856_v58, %v2858_v42  ;;  %v2885_v36 = vand.u32 65535, %v2855_v53  ;;  %v2886_v24 = vshrl.u32 %v2855_v53, 16 }
0x1fc3   :  { %v2863_v6 = vand.u32 65535, %v2859_v35  ;;  %v2864_v63 = vshrl.u32 %v2859_v35, 16  ;;  %v2848_v53 = vsel %vm2844_vm15, %v2828_v32, %v2831_v37  ;;  %v2850_v35 = vsel %vm2846_vm0, %v2834_v0, %v2849_v10 }
0x1fc4   :  { %v2888_v34 = vmul.u32 %v2886_v24, %v2861_v50  ;;  %v2889_v26 = vmul.u32 %v2885_v36, %v2862_v25  ;;  %v2887_v47 = vmul.u32 %v2885_v36, %v2861_v50  ;;  %v2890_v55 = vmul.u32 %v2886_v24, %v2862_v25 }
0x1fc5   :  { %v2866_v22 = vmul.u32 %v2864_v63, %v2861_v50  ;;  %v2867_v39 = vmul.u32 %v2863_v6, %v2862_v25  ;;  %v2865_v12 = vmul.u32 %v2863_v6, %v2861_v50  ;;  %v2868_v46 = vmul.u32 %v2864_v63, %v2862_v25 }
0x1fc6   :  { %v2891_v17 = vshll.u32 %v2888_v34, 16  ;;  %v2893_v48 = vshll.u32 %v2889_v26, 16  ;;  %v2892_v1 = vshrl.u32 %v2888_v34, 16  ;;  %v2894_v25 = vshrl.u32 %v2889_v26, 16 }
0x1fc7   :  { %v2869_v27 = vshll.u32 %v2866_v22, 16  ;;  %v2871_v14 = vshll.u32 %v2867_v39, 16  ;;  %v2870_v58 = vshrl.u32 %v2866_v22, 16  ;;  %v2872_v50 = vshrl.u32 %v2867_v39, 16 }
0x1fc8   :  { %vm2895_vm4 = vc.u32 %v2887_v47, %v2891_v17  ;;  %v2897_v60 = vadd.s32 %v2891_v17, %v2887_v47  ;;  %v2851_v4 = vsel %vm2845_vm2, %v2848_v53, %v2850_v35 }
0x1fc9   :  { %vm2873_vm3 = vc.u32 %v2865_v12, %v2869_v27  ;;  %v2875_v33 = vadd.s32 %v2869_v27, %v2865_v12  ;;  %v2896_v49 = vsel %vm2895_vm4, 1, %v4722_v41  ;;  %v2905_v34 = vmul.u32 %v5471_v5, %v2851_v4 }
0x1fca   :  { %v2874_v30 = vsel %vm2873_vm3, 1, %v4722_v41  ;;  %v2898_v51 = vadd.s32 %v2896_v49, %v2890_v55  ;;  %vm2899_vm7 = vc.u32 %v2897_v60, %v2893_v48  ;;  %v2901_v36 = vadd.s32 %v2897_v60, %v2893_v48 }
0x1fcb   :  { %v2876_v61 = vadd.s32 %v2874_v30, %v2868_v46  ;;  %vm2877_vm6 = vc.u32 %v2875_v33, %v2871_v14  ;;  %v2900_v11 = vsel %vm2899_vm7, 1, %v4722_v41  ;;  %vm2955_vm4 = vweird.f32 %v5452_v43 }
0x1fcc   :  { %v2878_v28 = vsel %vm2877_vm6, 1, %v4722_v41  ;;  %v2902_v42 = vadd.s32 %v2900_v11, %v2898_v51 }
0x1fcd   :  { %v2880_v52 = vadd.s32 %v2878_v28, %v2876_v61 }
0x1fce   :  { %v2903_v6 = vadd.s32 %v2902_v42, %v2892_v1 }
0x1fcf   :  { %v2881_v23 = vadd.s32 %v2880_v52, %v2870_v58 }
0x1fd0   :  { %v2904_v24 = vadd.s32 %v2903_v6, %v2894_v25 }
0x1fd1   :  { %v2882_v63 = vadd.s32 %v2881_v23, %v2872_v50 }
0x1fd2   :  { %v2908_v22 = vadd.s32 1, %v2904_v24 }
0x1fd3   :  { %vm2907_vm8 = vc.u32 %v2882_v63, %v2901_v36  ;;  %v2906_v7 = vadd.s32 %v2901_v36, %v2882_v63 }
0x1fd4   :  { %v2909_v12 = vsel %vm2907_vm8, %v2908_v22, %v2904_v24 }
0x1fd5   :  { %v2910_v27 = vadd.s32 %v2909_v12, %v2905_v34 }
0x1fd7   :  { %v2911_v37 = vadd.s32 536870912, %v2910_v27 }
0x1fd9   :  { %v2912_v46 = vshrl.u32 %v2911_v37, 30 }
0x1fdb   :  { %v2913_v47 = vshll.u32 %v2912_v46, 30  ;;  %v2936_v11 = vsub.s32 4, %v2912_v46 }
0x1fdd   :  { %v2914_v0 = vsub.s32 %v2910_v27, %v2913_v47  ;;  %v2937_v50 = vsel %vm2814_vm11, %v2936_v11, %v2912_v46 }
0x1fde   :  { %v2939_v6 = vsel %vm2813_vm12, 0, %v2937_v50 }
0x1fdf   :  { %vm2915_vm9 = vcmp.lt.s32.totalorder %v2914_v0, 0  ;;  %v2916_v39 = vsub.s32 0, %v2914_v0  ;;  %v3110_v22 = vadd.s32 3, %v2939_v6  ;;  %v2956_v37 = vand.u32 3, %v2939_v6 }
0x1fe1   :  { %v2917_v26 = vsel %vm2915_vm9, %v2916_v39, %v2914_v0  ;;  %v3111_v47 = vand.u32 3, %v3110_v22  ;;  %vm2957_vm14 = vcmp.lt.s32.totalorder %v2956_v37, 2  ;;  %vm2958_vm15 = vcmp.eq.s32.totalorder %v2956_v37, 0 }
0x1fe2   :  { %v2918_v17 = vclz %v2917_v26  ;;  %vm2961_vm1 = vcmp.eq.s32.totalorder %v2956_v37, 2 }
0x1fe3   :  { %vm3112_vm0 = vcmp.lt.s32.totalorder %v3111_v47, 2  ;;  %vm3113_vm2 = vcmp.eq.s32.totalorder %v3111_v47, 0  ;;  %vm3116_vm3 = vcmp.eq.s32.totalorder %v3111_v47, 2 }
0x1fe4   :  { %v4420_v14 = vadd.s32 4294967294, %v2918_v17 }
0x1fe6   :  { %vm4421_vm10 = vcmp.lt.s32.totalorder %v4420_v14, 0 }
0x1fe7   :  { %v2921_v33 = vsel %vm4421_vm10, 0, %v4420_v14 }
0x1fe8   :  { %v2922_v55 = vsub.s32 32, %v2921_v33  ;;  %v2926_v30 = vsub.s32 4294967266, %v2921_v33  ;;  %v2923_v48 = vshll.u32 %v2914_v0, %v2921_v33 }
0x1fea   :  { %v2924_v60 = vshrl.u32 %v2906_v7, %v2922_v55  ;;  %v2927_v61 = vadd.s32 127, %v2926_v30 }
0x1fec   :  { %v2925_v5 = vor.u32 %v2924_v60, %v2923_v48  ;;  %v2928_v49 = vshll.u32 %v2927_v61, 23 }
0x1fee   :  { %v2929_v10 = vor.u32 4788187, %v2928_v49  ;;  %v2932_v51 = vcvt.s32.f32 %v2925_v5 }
0x1ff0   :  { %v2930_v28 = vand.u32 2147483647, %v2929_v10 }
0x1ff2   :  { %v2933_v32 = vmul.f32 %v2932_v51, %v2930_v28 }
0x1ff4   :  { %v2934_v58 = vxor.u32 2147483648, %v2933_v32 }
0x1ff6   :  { %v2935_v52 = vsel %vm2814_vm11, %v2934_v58, %v2933_v32 }
0x1ff7   :  { %v2938_v1 = vsel %vm2813_vm12, %v5452_v43, %v2935_v52 }
0x1ff8   :  { %v2940_v42 = vmul.f32 %v2938_v1, %v2938_v1 }
0x1ffa   :  { %v2941_v53 = vmul.f32 -0.001358992, %v2940_v42  ;;  %v2948_v35 = vmul.f32 -0.00019511016, %v2940_v42 }
0x1ffc   :  { %v2942_v23 = vadd.f32 0.041655596, %v2941_v53  ;;  %v2949_v25 = vadd.f32 0.008332121, %v2948_v35 }
0x1ffe   :  { %v2943_v63 = vmul.f32 %v2942_v23, %v2940_v42  ;;  %v2950_v36 = vmul.f32 %v2949_v25, %v2940_v42 }
0x2000   :  { %v2944_v4 = vadd.f32 -0.4999988, %v2943_v63  ;;  %v2951_v24 = vadd.f32 -0.16666654, %v2950_v36 }
0x2002   :  { %v2945_v34 = vmul.f32 %v2944_v4, %v2940_v42  ;;  %v2952_v12 = vmul.f32 %v2951_v24, %v2940_v42  ;;  %v4603_v4 = vpop.eup %4602 }
0x2004   :  { %v2946_v27 = vadd.f32 1.0, %v2945_v34  ;;  %v2953_v45 = vadd.f32 1.0, %v2952_v12 }
0x2006   :  { %v2954_v0 = vmul.f32 %v2953_v45, %v2938_v1  ;;  %v2962_v39 = vxor.u32 2147483648, %v2946_v27 }
0x2008   :  { %v2959_v26 = vxor.u32 2147483648, %v2954_v0  ;;  %v2963_v17 = vsel %vm2961_vm1, %v2962_v39, %v2954_v0  ;;  %v3118_v33 = vsel %vm3116_vm3, %v2962_v39, %v2954_v0 }
0x200a   :  { %v2960_v46 = vsel %vm2958_vm15, %v2946_v27, %v2959_v26  ;;  %v3115_v14 = vsel %vm3113_vm2, %v2946_v27, %v2959_v26 }
0x200b   :  { %v2964_v7 = vsel %vm2957_vm14, %v2960_v46, %v2963_v17  ;;  %v3119_v55 = vsel %vm3112_vm0, %v3115_v14, %v3118_v33 }
0x200c   :  { %v2965_v30 = vsel %vm2955_vm4, nan, %v2964_v7  ;;  %v3120_v48 = vsel %vm2955_vm4, nan, %v3119_v55 }
0x200d   :  { %3130 = vperm.xlu2 %4508, %v2965_v30   ;;  %v3121_v60 = vsub.f32 %v3120_v48, %v2965_v30 }
0x200f   :  { %3145 = vperm.xlu0 %4511, %v3121_v60   ;;  %3124 = vperm.xlu1 %4509, %v3121_v60  }
0x2015   :  { %4510 = vset.pattern.permute.xlu2 %v4730_v13 }
0x2016   :  { %3135 = vperm.xlu2 %4510, %v3121_v60  }
0x2017   :  { %4515 = vset.pattern.permute.xlu0 %v4729_v44  ;;  %4512 = vset.pattern.permute.xlu1 %v4729_v44 }
0x2018   :  { %3160 = vperm.xlu0 %4515, %v2965_v30   ;;  %3155 = vperm.xlu1 %4512, %v3121_v60  }
0x201e   :  { %4514 = vset.pattern.permute.xlu2 %v4731_v57 }
0x201f   :  { %3150 = vperm.xlu2 %4514, %v2965_v30  }
0x2020   :  { %4513 = vset.pattern.permute.xlu1 %v4730_v13  ;;  %4517 = vset.pattern.permute.xlu0 %v4722_v41 }
0x2021   :  { %3140 = vperm.xlu1 %4513, %v2965_v30  }
0x2027   :  { %4516 = vset.pattern.permute.xlu2 %v4722_v41 }
0x2067   :  { %v3131_v43 = vpop.permute.xlu2 %3130 }
0x2070   :  { %v3136_v49 = vpop.permute.xlu2 %3135 }
0x2071   :  { %v3138_v52 = vmul.f32 %v3136_v49, %v4907_v19 }
0x2079   :  { %v3151_v1 = vpop.permute.xlu2 %3150 }
0x2081   :  { %v3125_v61 = vpop.permute.xlu1 %3124  ;;  %v3146_v5 = vpop.permute.xlu0 %3145 }
0x2082   :  { %v3148_v51 = vmul.f32 %v3146_v5, %v4909_v20  ;;  %v3127_v32 = vmul.f32 %v3125_v61, %v4905_v16 }
0x2084   :  { %v3153_v53 = vadd.f32 %v3151_v1, %v3148_v51  ;;  %v3133_v35 = vadd.f32 %v3131_v43, %v3127_v32 }
0x208a   :  { %v3156_v10 = vpop.permute.xlu1 %3155  ;;  %v3161_v58 = vpop.permute.xlu0 %3160 }
0x208b   :  { %v3158_v28 = vmul.f32 %v3156_v10, %v4903_v15 }
0x208d   :  { %v3163_v11 = vadd.f32 %v3161_v58, %v3158_v28 }
0x208f   :  { %v3165_v23 = vmul.f32 %v3163_v11, %v3153_v53 }
0x2093   :  { %v3141_v42 = vpop.permute.xlu1 %3140 }
0x2094   :  { %v3143_v50 = vadd.f32 %v3141_v42, %v3138_v52 }
0x2096   :  { %v3164_v25 = vmul.f32 %v3143_v50, %v3133_v35 }
0x2098   :  { %v3166_v6 = vmul.f32 %v3165_v23, %v3164_v25 }
0x209a   :  { %4425 = vmatmul.msk.f32.vlgmr.msrb.gmra.mxu0 %vm524_vm13, %v3166_v6  ;;  %v3301_v6 = vrot.slane %v5442_v21, 6 }
0x209b   :  { %4244 = vmatpush.msrb.mxu0 %v5410_v29 }
0x209d   :  { %4245 = vmatpush.msrb.mxu0 %v5413_v31 }
0x2117   :  { %v3187_v63 = vpop.f32.mrf.mxu0 }
0x2118   :  { %v3190_v36 = vmul.f32 %v3187_v63, %v3187_v63 }
0x211a   :  { %3192 = vrot.lane.b32.xlu1 %v3190_v36, %s4732_s20 }
0x2122   :  { %3246 = vrot.lane.b32.xlu1 %v4603_v4, %s4719_s17 }
0x218c   :  { %v3193_v24 = vpop.permute.xlu1 %3192 }
0x218d   :  { %v3195_v22 = vadd.f32 %v3193_v24, %v3190_v36 }
0x218f   :  { %4426 = vmatmul.msk.f32.vlgmr.msra.gmra.mxu3 %vm524_vm13, %v3195_v22 }
0x2190   :  { %4273 = vmatpush.msra.mxu3 %v5418_v40 }
0x2192   :  { %4274 = vmatpush.msra.mxu3 %v5421_v38 }
0x2194   :  { %v3247_v33 = vpop.permute.xlu1 %3246 }
0x2212   :  { %v3216_v29 = vpop.f32.mrf.mxu3 }
0x2213   :  { %v3217_v31 = vadd.f32 %v5424_v2, %v3216_v29 }
0x2215   :  { %v3220_v34 = vrot.slane %v3217_v31, 6  ;;  %v5550_v31 = vld [vmem:[#allocation2 + $0x50] ss:$0 sm:$0xff] }
0x2217   :  { %3221 = vrot.lane.b32.xlu2 %v3220_v34, %s4721_s19 }
0x2271   :  { %v3222_v12 = vpop.permute.xlu2 %3221 }
0x2272   :  { %v3224_v27 = vadd.f32 %v3222_v12, %v5436_v9 }
0x2274   :  { %v4427_v45 = vmul.f32 -1.442695, %v3224_v27 }
0x2276   :  { %4604 = vpow2.f32 %v4427_v45 }
0x227c   :  { %v4605_v37 = vpop.eup %4604 }
0x227d   :  { %v3228_v47 = vadd.f32 1.0, %v4605_v37 }
0x227f   :  { %4606 = vrcp.f32 %v3228_v47  ;;  %v3240_v40 = vand.u32 2147483648, %v3228_v47  ;;  %v3238_v38 = vand.u32 2147483647, %v3228_v47  ;;  %vm3234_vm7 = vweird.f32 %v3228_v47 }
0x2281   :  { %v3241_v2 = vor.u32 1.1754944e-38, %v3240_v40  ;;  %vm3239_vm9 = vcmp.eq.f32.partialorder %v3238_v38, 8.507059e+37 }
0x2285   :  { %v4607_v0 = vpop.eup %4606 }
0x2286   :  { %v3230_v39 = vmul.f32 %v4607_v0, %v3228_v47  ;;  %vm3235_vm6 = vweird.f32 %v4607_v0 }
0x2287   :  { %vm3236_vm8 = vmor %vm3234_vm7, %vm3235_vm6 }
0x2288   :  { %v3231_v26 = vsub.f32 1.0, %v3230_v39 }
0x228a   :  { %v3232_v46 = vmul.f32 %v4607_v0, %v3231_v26 }
0x228c   :  { %v3233_v17 = vadd.f32 %v4607_v0, %v3232_v46 }
0x228e   :  { %v3237_v14 = vsel %vm3236_vm8, %v4607_v0, %v3233_v17 }
0x228f   :  { %v3242_v9 = vsel %vm3239_vm9, %v3241_v2, %v3237_v14 }
0x2290   :  { %v3249_v7 = vmul.f32 %v3247_v33, %v3242_v9 }
0x2292   :  { %v3251_v55 = vrot.slane %v3249_v7, 2 }
0x2294   :  { %3252 = vrot.lane.b32.xlu2 %v3251_v55, %s4720_s18 }
0x22ee   :  { %v3253_v30 = vpop.permute.xlu2 %3252 }
0x22ef   :  { %4428 = vmatmul.msk.f32.vlgmr.msra.gmra.mxu1 %vm80_vm5, %v3253_v30 }
0x236c   :  { %v3273_v48 = vpop.f32.mrf.mxu1 }
0x236d   :  { %v3277_v60 = vrot.slane %v3273_v48, 4 }
0x236f   :  { %v5539_v43 = vadd.f32 %v3277_v60, %v5304_v18 }
0x2371   :  { %v4429_v61 = vmul.f32 -1.442695, %v5539_v43 }
0x2373   :  { %4608 = vpow2.f32 %v4429_v61 }
0x2379   :  { %v4609_v5 = vpop.eup %4608 }
0x237a   :  { %v3283_v49 = vadd.f32 1.0, %v4609_v5 }
0x237c   :  { %4610 = vrcp.f32 %v3283_v49  ;;  %v3295_v32 = vand.u32 2147483648, %v3283_v49  ;;  %v3293_v52 = vand.u32 2147483647, %v3283_v49  ;;  %vm3289_vm11 = vweird.f32 %v3283_v49 }
0x237e   :  { %v3296_v1 = vor.u32 1.1754944e-38, %v3295_v32  ;;  %vm3294_vm14 = vcmp.eq.f32.partialorder %v3293_v52, 8.507059e+37 }
0x2382   :  { %v4611_v10 = vpop.eup %4610 }
0x2383   :  { %v3285_v28 = vmul.f32 %v4611_v10, %v3283_v49  ;;  %vm3290_vm10 = vweird.f32 %v4611_v10 }
0x2384   :  { %vm3291_vm12 = vmor %vm3289_vm11, %vm3290_vm10 }
0x2385   :  { %v3286_v51 = vsub.f32 1.0, %v3285_v28 }
0x2387   :  { %v3287_v58 = vmul.f32 %v4611_v10, %v3286_v51 }
0x2389   :  { %v3288_v11 = vadd.f32 %v4611_v10, %v3287_v58 }
0x238b   :  { %v3292_v42 = vsel %vm3291_vm12, %v4611_v10, %v3288_v11 }
0x238c   :  { %v3297_v53 = vsel %vm3294_vm14, %v3296_v1, %v3292_v42 }
0x238d   :  { %v3299_v35 = vmul.f32 2.0, %v3297_v53  ;;  %v3303_v63 = vmul.f32 %v3301_v6, %v3297_v53 }
0x238f   :  { %v4430_v50 = vadd.f32 -1.0, %v3299_v35 }
0x2391   :  { %3305 = vrot.lane.b32.xlu0 %v4430_v50, %s4719_s17 }
0x2403   :  { %v3306_v23 = vpop.permute.xlu0 %3305 }
0x2404   :  { %v3308_v25 = vmul.f32 %v3306_v23, %v3297_v53 }
0x2406   :  { %3310 = vrot.lane.b32.xlu1 %v3308_v25, %s4720_s18 }
0x2478   :  { %v3311_v36 = vpop.permute.xlu1 %3310 }
0x2479   :  { %v5545_v4 = vadd.f32 %v3311_v36, %v3303_v63 }
0x247b   :  { %v3315_v24 = vrot.slane %v5545_v4, 4 }
0x247d   :  { %3316 = vrot.lane.b32.xlu2 %v3315_v24, %s4721_s19 }
0x24d7   :  { %v3317_v22 = vpop.permute.xlu2 %3316 }
0x24d8   :  { %4431 = vmatmul.msk.f32.vlgmr.msra.gmra.mxu2 %vm80_vm5, %v3317_v22 }
0x255b   :  { %v3337_v29 = vpop.f32.mrf.mxu2 }
0x255c   :  { %v3338_v34 = vadd.f32 %v5550_v31, %v3337_v29 }
0x255e   :  { %4612 = vtanh.f32 %v3338_v34 }
0x255f   :  { %4614 = vtanh.f32 %v5545_v4 }
0x2564   :  { %v4613_v12 = vpop.eup %4612 }
0x2565   :  { %v5553_v27 = vmul.f32 1.5707964, %v4613_v12 }
0x2567   :  { %v3345_v21 = vand.u32 2139095040, %v5553_v27  ;;  %v3342_v47 = vand.u32 2147483647, %v5553_v27  ;;  %vm3344_vm12 = vcmp.lt.s32.totalorder %v5553_v27, 0 }
0x2569   :  { %v3346_v45 = vshrl.u32 %v3345_v21, 23  ;;  %v3349_v39 = vand.u32 8388607, %v3342_v47  ;;  %vm3343_vm14 = vcmp.le.f32.partialorder %v3342_v47, 0.7853982 }
0x256b   :  { %v4432_v37 = vadd.s32 4294967169, %v3346_v45  ;;  %v3350_v38 = vor.u32 8388608, %v3349_v39 }
0x256d   :  { %v3352_v0 = vadd.s32 1, %v4432_v37  ;;  %v5572_v32 = vshll.u32 %v3350_v38, 8 }
0x256f   :  { %vm3353_vm15 = vcmp.gt.s32.totalorder %v3352_v0, 0  ;;  %v3391_v23 = vand.u32 65535, %v5572_v32  ;;  %v3392_v25 = vshrl.u32 %v5572_v32, 16 }
0x2570   :  { %v3354_v26 = vsel %vm3353_vm15, %v3352_v0, 0 }
0x2571   :  { %v3356_v40 = vand.u32 31, %v3354_v26  ;;  %v5559_v17 = vshrl.u32 %v3354_v26, 5 }
0x2573   :  { %v3357_v46 = vsub.s32 32, %v3356_v40  ;;  %v3359_v2 = vshll.u32 %v4723_v54, %v3356_v40  ;;  %v3362_v14 = vshll.u32 %v4724_v56, %v3356_v40  ;;  %v3365_v7 = vshll.u32 %v4725_v59, %v3356_v40 }
0x2574   :  { %v3368_v30 = vshll.u32 %v4726_v62, %v3356_v40  ;;  %v3371_v60 = vshll.u32 %v4727_v3, %v3356_v40  ;;  %vm3374_vm1 = vcmp.lt.s32.totalorder %v5559_v17, 1  ;;  %vm3377_vm0 = vcmp.lt.s32.totalorder %v5559_v17, 4 }
0x2575   :  { %v3360_v33 = vshrl.u32 %v4724_v56, %v3357_v46  ;;  %v3363_v9 = vshrl.u32 %v4725_v59, %v3357_v46  ;;  %v3366_v55 = vshrl.u32 %v4726_v62, %v3357_v46  ;;  %v3369_v48 = vshrl.u32 %v4727_v3, %v3357_v46 }
0x2576   :  { %v3372_v61 = vshrl.u32 %v4728_v8, %v3357_v46  ;;  %vm3376_vm2 = vcmp.lt.s32.totalorder %v5559_v17, 3  ;;  %vm3375_vm3 = vcmp.lt.s32.totalorder %v5559_v17, 2 }
0x2577   :  { %v3361_v5 = vor.u32 %v3360_v33, %v3359_v2  ;;  %v3364_v49 = vor.u32 %v3363_v9, %v3362_v14  ;;  %v3367_v10 = vor.u32 %v3366_v55, %v3365_v7  ;;  %v3370_v28 = vor.u32 %v3369_v48, %v3368_v30 }
0x2578   :  { %v3373_v51 = vor.u32 %v3372_v61, %v3371_v60  ;;  %v3358_v60 = vshrl.u32 %v4723_v54, %v3357_v46 }
0x2579   :  { %v3382_v58 = vsel %vm3374_vm1, %v3361_v5, %v3364_v49  ;;  %v3386_v52 = vsel %vm3374_vm1, %v3364_v49, %v3367_v10  ;;  %v3383_v11 = vsel %vm3377_vm0, %v3370_v28, 920167782  ;;  %v3379_v55 = vsel %vm3377_vm0, %v3367_v10, 2102212464 }
0x257a   :  { %v3387_v1 = vsel %vm3377_vm0, %v3373_v51, 1326507024  ;;  %v3384_v42 = vsel %vm3376_vm2, %v3367_v10, %v3383_v11  ;;  %v3378_v11 = vsel %vm3374_vm1, %v3358_v60, %v3361_v5 }
0x257b   :  { %v3388_v53 = vsel %vm3376_vm2, %v3370_v28, %v3387_v1  ;;  %v3385_v35 = vsel %vm3375_vm3, %v3382_v58, %v3384_v42  ;;  %v3380_v1 = vsel %vm3376_vm2, %v3364_v49, %v3379_v55 }
0x257c   :  { %v3389_v50 = vsel %vm3375_vm3, %v3386_v52, %v3388_v53  ;;  %v3415_v36 = vand.u32 65535, %v3385_v35  ;;  %v3416_v24 = vshrl.u32 %v3385_v35, 16  ;;  %v3381_v46 = vsel %vm3375_vm3, %v3378_v11, %v3380_v1 }
0x257d   :  { %v3393_v6 = vand.u32 65535, %v3389_v50  ;;  %v3394_v63 = vshrl.u32 %v3389_v50, 16 }
0x257e   :  { %v3418_v34 = vmul.u32 %v3416_v24, %v3391_v23  ;;  %v3419_v12 = vmul.u32 %v3415_v36, %v3392_v25  ;;  %v3417_v0 = vmul.u32 %v3415_v36, %v3391_v23  ;;  %v3420_v38 = vmul.u32 %v3416_v24, %v3392_v25 }
0x257f   :  { %v3396_v22 = vmul.u32 %v3394_v63, %v3391_v23  ;;  %v3397_v29 = vmul.u32 %v3393_v6, %v3392_v25  ;;  %v3395_v21 = vmul.u32 %v3393_v6, %v3391_v23  ;;  %v3398_v37 = vmul.u32 %v3394_v63, %v3392_v25 }
0x2580   :  { %v3421_v39 = vshll.u32 %v3418_v34, 16  ;;  %v3423_v14 = vshll.u32 %v3419_v12, 16  ;;  %v3422_v58 = vshrl.u32 %v3418_v34, 16  ;;  %v3424_v53 = vshrl.u32 %v3419_v12, 16 }
0x2581   :  { %v3399_v45 = vshll.u32 %v3396_v22, 16  ;;  %v3401_v26 = vshll.u32 %v3397_v29, 16  ;;  %v3400_v61 = vshrl.u32 %v3396_v22, 16  ;;  %v3402_v42 = vshrl.u32 %v3397_v29, 16 }
0x2582   :  { %vm3425_vm6 = vc.u32 %v3417_v0, %v3421_v39  ;;  %v3427_v33 = vadd.s32 %v3421_v39, %v3417_v0  ;;  %v3435_v63 = vmul.u32 %v5572_v32, %v3381_v46 }
0x2583   :  { %vm3403_vm4 = vc.u32 %v3395_v21, %v3399_v45  ;;  %v3405_v40 = vadd.s32 %v3399_v45, %v3395_v21  ;;  %v3426_v7 = vsel %vm3425_vm6, 1, %v4722_v41  ;;  %vm3485_vm6 = vweird.f32 %v5553_v27 }
0x2584   :  { %v3404_v2 = vsel %vm3403_vm4, 1, %v4722_v41  ;;  %v3428_v48 = vadd.s32 %v3426_v7, %v3420_v38  ;;  %vm3429_vm8 = vc.u32 %v3427_v33, %v3423_v14  ;;  %v3431_v23 = vadd.s32 %v3427_v33, %v3423_v14 }
0x2585   :  { %v3406_v9 = vadd.s32 %v3404_v2, %v3398_v37  ;;  %vm3407_vm7 = vc.u32 %v3405_v40, %v3401_v26  ;;  %v3430_v51 = vsel %vm3429_vm8, 1, %v4722_v41 }
0x2586   :  { %v3408_v30 = vsel %vm3407_vm7, 1, %v4722_v41  ;;  %v3432_v52 = vadd.s32 %v3430_v51, %v3428_v48 }
0x2587   :  { %v3410_v28 = vadd.s32 %v3408_v30, %v3406_v9 }
0x2588   :  { %v3433_v35 = vadd.s32 %v3432_v52, %v3422_v58 }
0x2589   :  { %v3411_v10 = vadd.s32 %v3410_v28, %v3400_v61 }
0x258a   :  { %v3434_v25 = vadd.s32 %v3433_v35, %v3424_v53 }
0x258b   :  { %v3412_v50 = vadd.s32 %v3411_v10, %v3402_v42 }
0x258c   :  { %v3438_v6 = vadd.s32 1, %v3434_v25 }
0x258d   :  { %vm3437_vm9 = vc.u32 %v3412_v50, %v3431_v23  ;;  %v3436_v17 = vadd.s32 %v3431_v23, %v3412_v50 }
0x258e   :  { %v3439_v36 = vsel %vm3437_vm9, %v3438_v6, %v3434_v25 }
0x258f   :  { %v3440_v24 = vadd.s32 %v3439_v36, %v3435_v63 }
0x2591   :  { %v3441_v5 = vadd.s32 536870912, %v3440_v24 }
0x2593   :  { %v3442_v22 = vshrl.u32 %v3441_v5, 30 }
0x2595   :  { %v3443_v34 = vshll.u32 %v3442_v22, 30  ;;  %v3466_v48 = vsub.s32 4, %v3442_v22 }
0x2597   :  { %v3444_v49 = vsub.s32 %v3440_v24, %v3443_v34  ;;  %v3467_v58 = vsel %vm3344_vm12, %v3466_v48, %v3442_v22 }
0x2598   :  { %v3469_v1 = vsel %vm3343_vm14, 0, %v3467_v58 }
0x2599   :  { %vm3445_vm10 = vcmp.lt.s32.totalorder %v3444_v49, 0  ;;  %v3446_v29 = vsub.s32 0, %v3444_v49  ;;  %v3640_v50 = vadd.s32 3, %v3469_v1  ;;  %v3486_v6 = vand.u32 3, %v3469_v1 }
0x259b   :  { %v3447_v12 = vsel %vm3445_vm10, %v3446_v29, %v3444_v49  ;;  %v3641_v63 = vand.u32 3, %v3640_v50  ;;  %vm3487_vm15 = vcmp.lt.s32.totalorder %v3486_v6, 2  ;;  %vm3488_vm1 = vcmp.eq.s32.totalorder %v3486_v6, 0 }
0x259c   :  { %v3448_v21 = vclz %v3447_v12  ;;  %vm3491_vm0 = vcmp.eq.s32.totalorder %v3486_v6, 2 }
0x259d   :  { %vm3642_vm2 = vcmp.lt.s32.totalorder %v3641_v63, 2  ;;  %vm3643_vm3 = vcmp.eq.s32.totalorder %v3641_v63, 0  ;;  %vm3646_vm4 = vcmp.eq.s32.totalorder %v3641_v63, 2 }
0x259e   :  { %v4433_v45 = vadd.s32 4294967294, %v3448_v21 }
0x25a0   :  { %vm4434_vm11 = vcmp.lt.s32.totalorder %v4433_v45, 0 }
0x25a1   :  { %v3451_v37 = vsel %vm4434_vm11, 0, %v4433_v45 }
0x25a2   :  { %v3452_v0 = vsub.s32 32, %v3451_v37  ;;  %v3456_v39 = vsub.s32 4294967266, %v3451_v37  ;;  %v3453_v26 = vshll.u32 %v3444_v49, %v3451_v37 }
0x25a4   :  { %v3454_v40 = vshrl.u32 %v3436_v17, %v3452_v0  ;;  %v3457_v38 = vadd.s32 127, %v3456_v39 }
0x25a6   :  { %v3455_v32 = vor.u32 %v3454_v40, %v3453_v26  ;;  %v3458_v2 = vshll.u32 %v3457_v38, 23 }
0x25a8   :  { %v3459_v14 = vor.u32 4788187, %v3458_v2  ;;  %v3462_v9 = vcvt.s32.f32 %v3455_v32 }
0x25aa   :  { %v3460_v33 = vand.u32 2147483647, %v3459_v14 }
0x25ac   :  { %v3463_v7 = vmul.f32 %v3462_v9, %v3460_v33 }
0x25ae   :  { %v3464_v55 = vxor.u32 2147483648, %v3463_v7 }
0x25b0   :  { %v3465_v30 = vsel %vm3344_vm12, %v3464_v55, %v3463_v7 }
0x25b1   :  { %v3468_v60 = vsel %vm3343_vm14, %v5553_v27, %v3465_v30  ;;  %v4615_v27 = vpop.eup %4614 }
0x25b2   :  { %v3470_v61 = vmul.f32 %v3468_v60, %v3468_v60 }
0x25b4   :  { %v3471_v28 = vmul.f32 -0.001358992, %v3470_v61  ;;  %v3478_v51 = vmul.f32 -0.00019511016, %v3470_v61 }
0x25b6   :  { %v3472_v52 = vadd.f32 0.041655596, %v3471_v28  ;;  %v3479_v11 = vadd.f32 0.008332121, %v3478_v51 }
0x25b8   :  { %v3473_v42 = vmul.f32 %v3472_v52, %v3470_v61  ;;  %v3480_v10 = vmul.f32 %v3479_v11, %v3470_v61 }
0x25ba   :  { %v3474_v53 = vadd.f32 -0.4999988, %v3473_v42  ;;  %v3481_v35 = vadd.f32 -0.16666654, %v3480_v10  ;;  %v5630_v10 = vld [vmem:[#allocation2 + $0x68] ss:$0 sm:$0xff] }
0x25bc   :  { %v3475_v23 = vmul.f32 %v3474_v53, %v3470_v61  ;;  %v3482_v46 = vmul.f32 %v3481_v35, %v3470_v61 }
0x25be   :  { %v3476_v25 = vadd.f32 1.0, %v3475_v23  ;;  %v3483_v47 = vadd.f32 1.0, %v3482_v46 }
0x25c0   :  { %v3484_v36 = vmul.f32 %v3483_v47, %v3468_v60  ;;  %v3492_v24 = vxor.u32 2147483648, %v3476_v25 }
0x25c2   :  { %v3489_v5 = vxor.u32 2147483648, %v3484_v36  ;;  %v3493_v34 = vsel %vm3491_vm0, %v3492_v24, %v3484_v36  ;;  %v3648_v29 = vsel %vm3646_vm4, %v3492_v24, %v3484_v36 }
0x25c4   :  { %v3490_v22 = vsel %vm3488_vm1, %v3476_v25, %v3489_v5  ;;  %v3645_v49 = vsel %vm3643_vm3, %v3476_v25, %v3489_v5 }
0x25c5   :  { %v3494_v12 = vsel %vm3487_vm15, %v3490_v22, %v3493_v34  ;;  %v3649_v21 = vsel %vm3642_vm2, %v3645_v49, %v3648_v29 }
0x25c6   :  { %v3495_v45 = vsel %vm3485_vm6, nan, %v3494_v12  ;;  %v3650_v37 = vsel %vm3485_vm6, nan, %v3649_v21 }
0x25c7   :  { %3660 = vperm.xlu2 %4516, %v3495_v45   ;;  %v3651_v17 = vsub.f32 %v3650_v37, %v3495_v45 }
0x25c9   :  { %3665 = vperm.xlu1 %4513, %v3651_v17   ;;  %3654 = vperm.xlu0 %4517, %v3651_v17  }
0x25cf   :  { %4519 = vset.pattern.permute.xlu2 %v4731_v57 }
0x25d0   :  { %3675 = vperm.xlu2 %4519, %v3651_v17  }
0x25d1   :  { %4520 = vset.pattern.permute.xlu1 %v4729_v44  ;;  %4518 = vset.pattern.permute.xlu0 %v4730_v13 }
0x25d2   :  { %3685 = vperm.xlu1 %4520, %v3651_v17   ;;  %3670 = vperm.xlu0 %4518, %v3495_v45  }
0x25d8   :  { %4522 = vset.pattern.permute.xlu2 %v4729_v44 }
0x25d9   :  { %3690 = vperm.xlu2 %4522, %v3495_v45  }
0x25da   :  { %4521 = vset.pattern.permute.xlu1 %v4731_v57  ;;  %3776 = vrot.lane.b32.xlu0 %v4615_v27, %s4719_s17 }
0x25db   :  { %3680 = vperm.xlu1 %4521, %v3495_v45  }
0x25e1   :  { %4523 = vset.pattern.permute.xlu2 %v4722_v41 }
0x25e3   :  { %4525 = vset.pattern.permute.xlu1 %v4730_v13 }
0x2621   :  { %v3661_v0 = vpop.permute.xlu2 %3660 }
0x262a   :  { %v3676_v40 = vpop.permute.xlu2 %3675 }
0x262b   :  { %v3678_v9 = vmul.f32 %v3676_v40, %v4909_v20 }
0x2633   :  { %v3691_v55 = vpop.permute.xlu2 %3690 }
0x263b   :  { %v3666_v39 = vpop.permute.xlu1 %3665  ;;  %v3655_v26 = vpop.permute.xlu0 %3654 }
0x263c   :  { %v3668_v2 = vmul.f32 %v3666_v39, %v4907_v19  ;;  %v3657_v14 = vmul.f32 %v3655_v26, %v4905_v16 }
0x263e   :  { %v3663_v48 = vadd.f32 %v3661_v0, %v3657_v14 }
0x2644   :  { %v3686_v38 = vpop.permute.xlu1 %3685  ;;  %v3671_v32 = vpop.permute.xlu0 %3670 }
0x2645   :  { %v3688_v33 = vmul.f32 %v3686_v38, %v4903_v15  ;;  %v3673_v7 = vadd.f32 %v3671_v32, %v3668_v2 }
0x2647   :  { %v3693_v60 = vadd.f32 %v3691_v55, %v3688_v33  ;;  %v3694_v61 = vmul.f32 %v3673_v7, %v3663_v48 }
0x264c   :  { %v3777_v12 = vpop.permute.xlu0 %3776 }
0x264d   :  { %v3681_v30 = vpop.permute.xlu1 %3680 }
0x264e   :  { %v3683_v13 = vadd.f32 %v3681_v30, %v3678_v9 }
0x2650   :  { %v3695_v28 = vmul.f32 %v3693_v60, %v3683_v13 }
0x2652   :  { %v3696_v51 = vmul.f32 %v3695_v28, %v3694_v61  ;;  %v3831_v28 = vrot.slane %v5545_v4, 6 }
0x2654   :  { %4438 = vmatmul.msk.f32.vlgmr.msra.gmra.mxu0 %vm524_vm13, %v3696_v51 }
0x26d1   :  { %v3717_v58 = vpop.f32.mrf.mxu0 }
0x26d2   :  { %v3720_v52 = vmul.f32 %v3717_v58, %v3717_v58 }
0x26d4   :  { %3722 = vrot.lane.b32.xlu1 %v3720_v52, %s4732_s20 }
0x2746   :  { %v3723_v11 = vpop.permute.xlu1 %3722 }
0x2747   :  { %v3725_v1 = vadd.f32 %v3723_v11, %v3720_v52 }
0x2749   :  { %4439 = vmatmul.msk.f32.vlgmr.msrb.gmra.mxu3 %vm524_vm13, %v3725_v1 }
0x27cc   :  { %v3746_v42 = vpop.f32.mrf.mxu3 }
0x27cd   :  { %v3747_v53 = vadd.f32 %v5630_v10, %v3746_v42 }
0x27cf   :  { %v3750_v35 = vrot.slane %v3747_v53, 4 }
0x27d1   :  { %3751 = vrot.lane.b32.xlu2 %v3750_v35, %s4721_s19 }
0x282b   :  { %v3752_v50 = vpop.permute.xlu2 %3751 }
0x282c   :  { %v3754_v23 = vadd.f32 %v3752_v50, %v5539_v43 }
0x282e   :  { %v4440_v46 = vmul.f32 -1.442695, %v3754_v23 }
0x2830   :  { %4616 = vpow2.f32 %v4440_v46 }
0x2836   :  { %v4617_v25 = vpop.eup %4616 }
0x2837   :  { %v3758_v47 = vadd.f32 1.0, %v4617_v25 }
0x2839   :  { %4618 = vrcp.f32 %v3758_v47  ;;  %v3770_v24 = vand.u32 2147483648, %v3758_v47  ;;  %v3768_v22 = vand.u32 2147483647, %v3758_v47  ;;  %vm3764_vm8 = vweird.f32 %v3758_v47 }
0x283b   :  { %v3771_v49 = vor.u32 1.1754944e-38, %v3770_v24  ;;  %vm3769_vm10 = vcmp.eq.f32.partialorder %v3768_v22, 8.507059e+37 }
0x283f   :  { %v4619_v6 = vpop.eup %4618 }
0x2840   :  { %v3760_v63 = vmul.f32 %v4619_v6, %v3758_v47  ;;  %vm3765_vm7 = vweird.f32 %v4619_v6 }
0x2841   :  { %vm3766_vm9 = vmor %vm3764_vm8, %vm3765_vm7 }
0x2842   :  { %v3761_v36 = vsub.f32 1.0, %v3760_v63 }
0x2844   :  { %v3762_v5 = vmul.f32 %v4619_v6, %v3761_v36 }
0x2846   :  { %v3763_v34 = vadd.f32 %v4619_v6, %v3762_v5 }
0x2848   :  { %v3767_v29 = vsel %vm3766_vm9, %v4619_v6, %v3763_v34 }
0x2849   :  { %v3772_v43 = vsel %vm3769_vm10, %v3771_v49, %v3767_v29 }
0x284a   :  { %v3779_v21 = vmul.f32 %v3777_v12, %v3772_v43 }
0x284c   :  { %v3781_v45 = vrot.slane %v3779_v21, 4 }
0x284e   :  { %3782 = vrot.lane.b32.xlu1 %v3781_v45, %s4720_s18 }
0x28c0   :  { %v3783_v37 = vpop.permute.xlu1 %3782 }
0x28c1   :  { %4441 = vmatmul.msk.f32.vlgmr.msrb.gmra.mxu1 %vm80_vm5, %v3783_v37 }
0x293e   :  { %v3803_v17 = vpop.f32.mrf.mxu1 }
0x293f   :  { %v3807_v27 = vrot.slane %v3803_v17, 2 }
0x2941   :  { %v5638_v0 = vadd.f32 %v3807_v27, %v5304_v18 }
0x2943   :  { %v4442_v39 = vmul.f32 -1.442695, %v5638_v0 }
0x2945   :  { %4620 = vpow2.f32 %v4442_v39 }
0x294b   :  { %v4621_v26 = vpop.eup %4620 }
0x294c   :  { %v3813_v40 = vadd.f32 1.0, %v4621_v26 }
0x294e   :  { %4622 = vrcp.f32 %v3813_v40  ;;  %v3825_v14 = vand.u32 2147483648, %v3813_v40  ;;  %v3823_v9 = vand.u32 2147483647, %v3813_v40  ;;  %vm3819_vm12 = vweird.f32 %v3813_v40 }
0x2950   :  { %v3826_v55 = vor.u32 1.1754944e-38, %v3825_v14  ;;  %vm3824_vm15 = vcmp.eq.f32.partialorder %v3823_v9, 8.507059e+37 }
0x2954   :  { %v4623_v38 = vpop.eup %4622 }
0x2955   :  { %v3815_v32 = vmul.f32 %v4623_v38, %v3813_v40  ;;  %vm3820_vm11 = vweird.f32 %v4623_v38 }
0x2956   :  { %vm3821_vm14 = vmor %vm3819_vm12, %vm3820_vm11 }
0x2957   :  { %v3816_v2 = vsub.f32 1.0, %v3815_v32 }
0x2959   :  { %v3817_v33 = vmul.f32 %v4623_v38, %v3816_v2 }
0x295b   :  { %v3818_v7 = vadd.f32 %v4623_v38, %v3817_v33 }
0x295d   :  { %v3822_v30 = vsel %vm3821_vm14, %v4623_v38, %v3818_v7 }
0x295e   :  { %v3827_v18 = vsel %vm3824_vm15, %v3826_v55, %v3822_v30 }
0x295f   :  { %v3829_v48 = vmul.f32 2.0, %v3827_v18  ;;  %v3833_v51 = vmul.f32 %v3831_v28, %v3827_v18 }
0x2961   :  { %v4443_v60 = vadd.f32 -1.0, %v3829_v48 }
0x2963   :  { %3835 = vrot.lane.b32.xlu2 %v4443_v60, %s4719_s17 }
0x29bd   :  { %v3836_v13 = vpop.permute.xlu2 %3835 }
0x29be   :  { %v3838_v61 = vmul.f32 %v3836_v13, %v3827_v18 }
0x29c0   :  { %3840 = vrot.lane.b32.xlu0 %v3838_v61, %s4720_s18 }
0x2a32   :  { %v3841_v58 = vpop.permute.xlu0 %3840 }
0x2a33   :  { %v5644_v52 = vadd.f32 %v3841_v58, %v3833_v51 }
0x2a35   :  { %v3845_v11 = vrot.slane %v5644_v52, 6 }
0x2a37   :  { %3846 = vrot.lane.b32.xlu1 %v3845_v11, %s4721_s19 }
0x2aa9   :  { %v3847_v1 = vpop.permute.xlu1 %3846 }
0x2aaa   :  { %4444 = vmatmul.msk.f32.vlgmr.msrb.gmra.mxu2 %vm80_vm5, %v3847_v1 }
0x2b2d   :  { %v3867_v42 = vpop.f32.mrf.mxu2 }
0x2b2e   :  { %v3868_v53 = vadd.f32 %v5550_v31, %v3867_v42 }
0x2b30   :  { %4624 = vtanh.f32 %v3868_v53 }
0x2b31   :  { %4626 = vtanh.f32 %v5644_v52 }
0x2b36   :  { %v4625_v35 = vpop.eup %4624 }
0x2b37   :  { %v5650_v50 = vmul.f32 1.5707964, %v4625_v35 }
0x2b39   :  { %v3875_v4 = vand.u32 2139095040, %v5650_v50  ;;  %v3872_v25 = vand.u32 2147483647, %v5650_v50  ;;  %vm3874_vm12 = vcmp.lt.s32.totalorder %v5650_v50, 0 }
0x2b3b   :  { %v3876_v23 = vshrl.u32 %v3875_v4, 23  ;;  %v3879_v6 = vand.u32 8388607, %v3872_v25  ;;  %vm3873_vm14 = vcmp.le.f32.partialorder %v3872_v25, 0.7853982 }
0x2b3d   :  { %v4445_v46 = vadd.s32 4294967169, %v3876_v23  ;;  %v3880_v5 = vor.u32 8388608, %v3879_v6 }
0x2b3f   :  { %v3882_v47 = vadd.s32 1, %v4445_v46 }
0x2b41   :  { %vm3883_vm1 = vcmp.gt.s32.totalorder %v3882_v47, 0 }
0x2b42   :  { %v3884_v63 = vsel %vm3883_vm1, %v3882_v47, 0 }
0x2b43   :  { %v3886_v36 = vand.u32 31, %v3884_v63  ;;  %v5656_v31 = vshrl.u32 %v3884_v63, 5 }
0x2b45   :  { %v3887_v24 = vsub.s32 32, %v3886_v36  ;;  %v3889_v22 = vshll.u32 %v4723_v54, %v3886_v36  ;;  %v3892_v34 = vshll.u32 %v4724_v56, %v3886_v36  ;;  %v3895_v12 = vshll.u32 %v4725_v59, %v3886_v36 }
0x2b46   :  { %v3898_v21 = vshll.u32 %v4726_v62, %v3886_v36  ;;  %v3901_v37 = vshll.u32 %v4727_v3, %v3886_v36  ;;  %vm3904_vm5 = vcmp.lt.s32.totalorder %v5656_v31, 1  ;;  %vm3907_vm0 = vcmp.lt.s32.totalorder %v5656_v31, 4 }
0x2b47   :  { %v3890_v49 = vshrl.u32 %v4724_v56, %v3887_v24  ;;  %v3893_v29 = vshrl.u32 %v4725_v59, %v3887_v24  ;;  %v3896_v43 = vshrl.u32 %v4726_v62, %v3887_v24  ;;  %v3899_v45 = vshrl.u32 %v4727_v3, %v3887_v24 }
0x2b48   :  { %v3902_v17 = vshrl.u32 %v4728_v8, %v3887_v24  ;;  %v5669_v56 = vshll.u32 %v3880_v5, 8  ;;  %vm3906_vm2 = vcmp.lt.s32.totalorder %v5656_v31, 3  ;;  %vm3905_vm3 = vcmp.lt.s32.totalorder %v5656_v31, 2 }
0x2b49   :  { %v3891_v27 = vor.u32 %v3890_v49, %v3889_v22  ;;  %v3894_v39 = vor.u32 %v3893_v29, %v3892_v34  ;;  %v3897_v26 = vor.u32 %v3896_v43, %v3895_v12  ;;  %v3900_v40 = vor.u32 %v3899_v45, %v3898_v21 }
0x2b4a   :  { %v3903_v38 = vor.u32 %v3902_v17, %v3901_v37  ;;  %v3921_v9 = vand.u32 65535, %v5669_v56  ;;  %v3922_v7 = vshrl.u32 %v5669_v56, 16  ;;  %v3888_v34 = vshrl.u32 %v4723_v54, %v3887_v24 }
0x2b4b   :  { %v3912_v59 = vsel %vm3904_vm5, %v3891_v27, %v3894_v39  ;;  %v3916_v62 = vsel %vm3904_vm5, %v3894_v39, %v3897_v26  ;;  %v3913_v3 = vsel %vm3907_vm0, %v3900_v40, 920167782  ;;  %v3909_v36 = vsel %vm3907_vm0, %v3897_v26, 2102212464 }
0x2b4c   :  { %v3917_v8 = vsel %vm3907_vm0, %v3903_v38, 1326507024  ;;  %v3914_v32 = vsel %vm3906_vm2, %v3897_v26, %v3913_v3  ;;  %v3908_v45 = vsel %vm3904_vm5, %v3888_v34, %v3891_v27  ;;  %v3910_v37 = vsel %vm3906_vm2, %v3894_v39, %v3909_v36 }
0x2b4d   :  { %v3918_v2 = vsel %vm3906_vm2, %v3900_v40, %v3917_v8  ;;  %v3915_v14 = vsel %vm3905_vm3, %v3912_v59, %v3914_v32  ;;  %v3911_v54 = vsel %vm3905_vm3, %v3908_v45, %v3910_v37 }
0x2b4e   :  { %v3919_v33 = vsel %vm3905_vm3, %v3916_v62, %v3918_v2  ;;  %v3945_v18 = vand.u32 65535, %v3915_v14  ;;  %v3946_v48 = vshrl.u32 %v3915_v14, 16  ;;  %v3965_v8 = vmul.u32 %v5669_v56, %v3911_v54 }
0x2b4f   :  { %v3923_v55 = vand.u32 65535, %v3919_v33  ;;  %v3924_v30 = vshrl.u32 %v3919_v33, 16 }
0x2b50   :  { %v3948_v61 = vmul.u32 %v3946_v48, %v3921_v9  ;;  %v3949_v28 = vmul.u32 %v3945_v18, %v3922_v7  ;;  %v3947_v1 = vmul.u32 %v3945_v18, %v3921_v9  ;;  %v3950_v4 = vmul.u32 %v3946_v48, %v3922_v7 }
0x2b51   :  { %v3926_v60 = vmul.u32 %v3924_v30, %v3921_v9  ;;  %v3927_v13 = vmul.u32 %v3923_v55, %v3922_v7  ;;  %v3925_v51 = vmul.u32 %v3923_v55, %v3921_v9  ;;  %v3928_v11 = vmul.u32 %v3924_v30, %v3922_v7 }
0x2b52   :  { %v3951_v42 = vshll.u32 %v3948_v61, 16  ;;  %v3953_v46 = vshll.u32 %v3949_v28, 16  ;;  %v3952_v43 = vshrl.u32 %v3948_v61, 16  ;;  %v3954_v40 = vshrl.u32 %v3949_v28, 16 }
0x2b53   :  { %v3929_v58 = vshll.u32 %v3926_v60, 16  ;;  %v3931_v53 = vshll.u32 %v3927_v13, 16  ;;  %v3930_v49 = vshrl.u32 %v3926_v60, 16  ;;  %v3932_v17 = vshrl.u32 %v3927_v13, 16 }
0x2b54   :  { %vm3955_vm6 = vc.u32 %v3947_v1, %v3951_v42  ;;  %v3957_v47 = vadd.s32 %v3951_v42, %v3947_v1 }
0x2b55   :  { %vm3933_vm4 = vc.u32 %v3925_v51, %v3929_v58  ;;  %v3935_v35 = vadd.s32 %v3929_v58, %v3925_v51  ;;  %v3956_v63 = vsel %vm3955_vm6, 1, %v4722_v41 }
0x2b56   :  { %v3934_v23 = vsel %vm3933_vm4, 1, %v4722_v41  ;;  %v3958_v22 = vadd.s32 %v3956_v63, %v3950_v4  ;;  %vm3959_vm8 = vc.u32 %v3957_v47, %v3953_v46  ;;  %v3961_v62 = vadd.s32 %v3957_v47, %v3953_v46 }
0x2b57   :  { %v3936_v6 = vadd.s32 %v3934_v23, %v3928_v11  ;;  %vm3937_vm7 = vc.u32 %v3935_v35, %v3931_v53  ;;  %v3960_v12 = vsel %vm3959_vm8, 1, %v4722_v41  ;;  %vm4015_vm4 = vweird.f32 %v5650_v50 }
0x2b58   :  { %v3938_v5 = vsel %vm3937_vm7, 1, %v4722_v41  ;;  %v3962_v21 = vadd.s32 %v3960_v12, %v3958_v22 }
0x2b59   :  { %v3940_v29 = vadd.s32 %v3938_v5, %v3936_v6 }
0x2b5a   :  { %v3963_v38 = vadd.s32 %v3962_v21, %v3952_v43 }
0x2b5b   :  { %v3941_v26 = vadd.s32 %v3940_v29, %v3930_v49 }
0x2b5c   :  { %v3964_v24 = vadd.s32 %v3963_v38, %v3954_v40 }
0x2b5d   :  { %v3942_v59 = vadd.s32 %v3941_v26, %v3932_v17 }
0x2b5e   :  { %v3968_v3 = vadd.s32 1, %v3964_v24 }
0x2b5f   :  { %vm3967_vm9 = vc.u32 %v3942_v59, %v3961_v62  ;;  %v3966_v31 = vadd.s32 %v3961_v62, %v3942_v59 }
0x2b60   :  { %v3969_v32 = vsel %vm3967_vm9, %v3968_v3, %v3964_v24  ;;  %vm4320_vm9 = vcmask 261126  }
0x2b61   :  { %v3970_v2 = vadd.s32 %v3969_v32, %v3965_v8 }
0x2b63   :  { %v3971_v27 = vadd.s32 536870912, %v3970_v2 }
0x2b65   :  { %v3972_v14 = vshrl.u32 %v3971_v27, 30 }
0x2b67   :  { %v3973_v33 = vshll.u32 %v3972_v14, 30  ;;  %v3996_v4 = vsub.s32 4, %v3972_v14 }
0x2b69   :  { %v3974_v39 = vsub.s32 %v3970_v2, %v3973_v33  ;;  %v3997_v63 = vsel %vm3874_vm12, %v3996_v4, %v3972_v14 }
0x2b6a   :  { %v3999_v22 = vsel %vm3873_vm14, 0, %v3997_v63 }
0x2b6b   :  { %vm3975_vm10 = vcmp.lt.s32.totalorder %v3974_v39, 0  ;;  %v3976_v9 = vsub.s32 0, %v3974_v39  ;;  %v4170_v43 = vadd.s32 3, %v3999_v22  ;;  %v4016_v17 = vand.u32 3, %v3999_v22 }
0x2b6d   :  { %v3977_v7 = vsel %vm3975_vm10, %v3976_v9, %v3974_v39  ;;  %v4171_v26 = vand.u32 3, %v4170_v43  ;;  %vm4017_vm15 = vcmp.lt.s32.totalorder %v4016_v17, 2  ;;  %vm4018_vm1 = vcmp.eq.s32.totalorder %v4016_v17, 0 }
0x2b6e   :  { %v3978_v55 = vclz %v3977_v7  ;;  %vm4021_vm5 = vcmp.eq.s32.totalorder %v4016_v17, 2 }
0x2b6f   :  { %vm4172_vm0 = vcmp.lt.s32.totalorder %v4171_v26, 2  ;;  %vm4173_vm2 = vcmp.eq.s32.totalorder %v4171_v26, 0  ;;  %vm4176_vm3 = vcmp.eq.s32.totalorder %v4171_v26, 2 }
0x2b70   :  { %v4446_v30 = vadd.s32 4294967294, %v3978_v55 }
0x2b72   :  { %vm4447_vm11 = vcmp.lt.s32.totalorder %v4446_v30, 0 }
0x2b73   :  { %v3981_v18 = vsel %vm4447_vm11, 0, %v4446_v30 }
0x2b74   :  { %v3982_v48 = vsub.s32 32, %v3981_v18  ;;  %v3986_v60 = vsub.s32 4294967266, %v3981_v18  ;;  %v3983_v13 = vshll.u32 %v3974_v39, %v3981_v18 }
0x2b76   :  { %v3984_v61 = vshrl.u32 %v3966_v31, %v3982_v48  ;;  %v3987_v28 = vadd.s32 127, %v3986_v60 }
0x2b78   :  { %v3985_v56 = vor.u32 %v3984_v61, %v3983_v13  ;;  %v3988_v51 = vshll.u32 %v3987_v28, 23 }
0x2b7a   :  { %v3989_v58 = vor.u32 4788187, %v3988_v51  ;;  %v3992_v1 = vcvt.s32.f32 %v3985_v56 }
0x2b7c   :  { %v3990_v11 = vand.u32 2147483647, %v3989_v58 }
0x2b7e   :  { %v3993_v42 = vmul.f32 %v3992_v1, %v3990_v11 }
0x2b80   :  { %v3994_v53 = vxor.u32 2147483648, %v3993_v42 }
0x2b82   :  { %v3995_v35 = vsel %vm3874_vm12, %v3994_v53, %v3993_v42 }
0x2b83   :  { %v3998_v23 = vsel %vm3873_vm14, %v5650_v50, %v3995_v35  ;;  %v4627_v50 = vpop.eup %4626 }
0x2b84   :  { %v4000_v46 = vmul.f32 %v3998_v23, %v3998_v23 }
0x2b86   :  { %v4001_v47 = vmul.f32 -0.001358992, %v4000_v46  ;;  %v4008_v6 = vmul.f32 -0.00019511016, %v4000_v46 }
0x2b88   :  { %v4002_v36 = vadd.f32 0.041655596, %v4001_v47  ;;  %v4009_v5 = vadd.f32 0.008332121, %v4008_v6 }
0x2b8a   :  { %v4003_v34 = vmul.f32 %v4002_v36, %v4000_v46  ;;  %v4010_v49 = vmul.f32 %v4009_v5, %v4000_v46 }
0x2b8c   :  { %v4004_v29 = vadd.f32 -0.4999988, %v4003_v34  ;;  %v4011_v12 = vadd.f32 -0.16666654, %v4010_v49 }
0x2b8e   :  { %v4005_v21 = vmul.f32 %v4004_v29, %v4000_v46  ;;  %v4012_v45 = vmul.f32 %v4011_v12, %v4000_v46 }
0x2b90   :  { %v4006_v37 = vadd.f32 1.0, %v4005_v21  ;;  %v4013_v25 = vadd.f32 1.0, %v4012_v45 }
0x2b92   :  { %v4014_v40 = vmul.f32 %v4013_v25, %v3998_v23  ;;  %v4022_v38 = vxor.u32 2147483648, %v4006_v37  ;;  %v4535_v25 = vld [vmem:[#allocation2 + $0x90] ss:$0 sm:$0xff] }
0x2b94   :  { %v4019_v59 = vxor.u32 2147483648, %v4014_v40  ;;  %v4023_v54 = vsel %vm4021_vm5, %v4022_v38, %v4014_v40  ;;  %v4178_v3 = vsel %vm4176_vm3, %v4022_v38, %v4014_v40 }
0x2b96   :  { %v4020_v62 = vsel %vm4018_vm1, %v4006_v37, %v4019_v59  ;;  %v4175_v24 = vsel %vm4173_vm2, %v4006_v37, %v4019_v59 }
0x2b97   :  { %v4024_v8 = vsel %vm4017_vm15, %v4020_v62, %v4023_v54  ;;  %v4179_v32 = vsel %vm4172_vm0, %v4175_v24, %v4178_v3 }
0x2b98   :  { %v4025_v2 = vsel %vm4015_vm4, nan, %v4024_v8  ;;  %v4180_v27 = vsel %vm4015_vm4, nan, %v4179_v32 }
0x2b99   :  { %4200 = vperm.xlu1 %4525, %v4025_v2   ;;  %v4181_v14 = vsub.f32 %v4180_v27, %v4025_v2 }
0x2b9b   :  { %4195 = vperm.xlu0 %4518, %v4181_v14   ;;  %4184 = vperm.xlu2 %4523, %v4181_v14  }
0x2ba1   :  { %4526 = vset.pattern.permute.xlu1 %v4731_v57 }
0x2ba2   :  { %4205 = vperm.xlu1 %4526, %v4181_v14  }
0x2ba3   :  { %4524 = vset.pattern.permute.xlu0 %v4722_v41  ;;  %4527 = vset.pattern.permute.xlu2 %v4729_v44 }
0x2ba4   :  { %4190 = vperm.xlu0 %4524, %v4025_v2   ;;  %4215 = vperm.xlu2 %4527, %v4181_v14  }
0x2baa   :  { %4529 = vset.pattern.permute.xlu1 %v4729_v44 }
0x2bab   :  { %4220 = vperm.xlu1 %4529, %v4025_v2  }
0x2bac   :  { %4528 = vset.pattern.permute.xlu2 %v4731_v57 }
0x2bad   :  { %4210 = vperm.xlu2 %4528, %v4025_v2  }
0x2bb3   :  { %4306 = vrot.lane.b32.xlu1 %v4627_v50, %s4719_s17 }
0x2bb5   :  { %4530 = vset.pattern.permute.xlu2 %v4722_v41 }
0x2bf5   :  { %v4185_v33 = vpop.permute.xlu2 %4184 }
0x2bf6   :  { %v4187_v18 = vmul.f32 %v4185_v33, %v4905_v16 }
0x2bfe   :  { %v4216_v7 = vpop.permute.xlu2 %4215 }
0x2bff   :  { %v4218_v57 = vmul.f32 %v4216_v7, %v4903_v15  ;;  %v4534_v15 = vld [vmem:[#allocation2 + $0x88] ss:$0 sm:$0xff] }
0x2c07   :  { %v4211_v48 = vpop.permute.xlu2 %4210 }
0x2c0b   :  { %v4201_v39 = vpop.permute.xlu1 %4200 }
0x2c0d   :  { %v4196_v9 = vpop.permute.xlu0 %4195 }
0x2c0e   :  { %v4198_v44 = vmul.f32 %v4196_v9, %v4907_v19 }
0x2c10   :  { %v4203_v13 = vadd.f32 %v4201_v39, %v4198_v44 }
0x2c14   :  { %v4206_v55 = vpop.permute.xlu1 %4205 }
0x2c15   :  { %v4208_v52 = vmul.f32 %v4206_v55, %v4909_v20 }
0x2c16   :  { %v4191_v30 = vpop.permute.xlu0 %4190 }
0x2c17   :  { %v4193_v31 = vadd.f32 %v4191_v30, %v4187_v18  ;;  %v4213_v61 = vadd.f32 %v4211_v48, %v4208_v52 }
0x2c19   :  { %v4224_v28 = vmul.f32 %v4203_v13, %v4193_v31 }
0x2c1d   :  { %v4221_v60 = vpop.permute.xlu1 %4220 }
0x2c1e   :  { %v4223_v41 = vadd.f32 %v4221_v60, %v4218_v57 }
0x2c20   :  { %v4225_v56 = vmul.f32 %v4223_v41, %v4213_v61 }
0x2c22   :  { %v4226_v51 = vmul.f32 %v4225_v56, %v4224_v28 }
0x2c24   :  { %4451 = vmatmul.msk.f32.vlgmr.msrb.gmra.mxu0 %vm524_vm13, %v4226_v51 }
0x2c25   :  { %v4307_v29 = vpop.permute.xlu1 %4306 }
0x2ca1   :  { %v4247_v58 = vpop.f32.mrf.mxu0 }
0x2ca2   :  { %v4250_v11 = vmul.f32 %v4247_v58, %v4247_v58 }
0x2ca4   :  { %4252 = vrot.lane.b32.xlu2 %v4250_v11, %s4732_s20 }
0x2cac   :  { %4312 = vrot.lane.b32.xlu2 %v4534_v15, %s4721_s19 }
0x2cfe   :  { %v4253_v16 = vpop.permute.xlu2 %4252 }
0x2cff   :  { %v4255_v19 = vadd.f32 %v4253_v16, %v4250_v11 }
0x2d01   :  { %4452 = vmatmul.msk.f32.vlgmr.msra.gmra.mxu3 %vm524_vm13, %v4255_v19 }
0x2d06   :  { %v4313_v12 = vpop.permute.xlu2 %4312 }
0x2d84   :  { %v4276_v20 = vpop.f32.mrf.mxu3 }
0x2d85   :  { %v4277_v1 = vadd.f32 %v5630_v10, %v4276_v20 }
0x2d87   :  { %v4280_v42 = vrot.slane %v4277_v1, 2 }
0x2d89   :  { %4281 = vrot.lane.b32.xlu0 %v4280_v42, %s4721_s19 }
0x2dfb   :  { %v4282_v53 = vpop.permute.xlu0 %4281 }
0x2dfc   :  { %v4284_v35 = vadd.f32 %v4282_v53, %v5638_v0 }
0x2dfe   :  { %v4453_v4 = vmul.f32 -1.442695, %v4284_v35 }
0x2e00   :  { %4628 = vpow2.f32 %v4453_v4 }
0x2e06   :  { %v4629_v23 = vpop.eup %4628 }
0x2e07   :  { %v4288_v46 = vadd.f32 1.0, %v4629_v23 }
0x2e09   :  { %4630 = vrcp.f32 %v4288_v46  ;;  %v4300_v36 = vand.u32 2147483648, %v4288_v46  ;;  %v4298_v22 = vand.u32 2147483647, %v4288_v46  ;;  %vm4294_vm6 = vweird.f32 %v4288_v46 }
0x2e0b   :  { %v4301_v10 = vor.u32 1.1754944e-38, %v4300_v36  ;;  %vm4299_vm8 = vcmp.eq.f32.partialorder %v4298_v22, 8.507059e+37 }
0x2e0f   :  { %v4631_v47 = vpop.eup %4630 }
0x2e10   :  { %v4290_v6 = vmul.f32 %v4631_v47, %v4288_v46  ;;  %vm4295_vm13 = vweird.f32 %v4631_v47 }
0x2e11   :  { %vm4296_vm7 = vmor %vm4294_vm6, %vm4295_vm13 }
0x2e12   :  { %v4291_v63 = vsub.f32 1.0, %v4290_v6 }
0x2e14   :  { %v4292_v5 = vmul.f32 %v4631_v47, %v4291_v63 }
0x2e16   :  { %v4293_v34 = vadd.f32 %v4631_v47, %v4292_v5 }
0x2e18   :  { %v4297_v49 = vsel %vm4296_vm7, %v4631_v47, %v4293_v34 }
0x2e19   :  { %v4302_v0 = vsel %vm4299_vm8, %v4301_v10, %v4297_v49 }
0x2e1a   :  { %v4309_v43 = vmul.f32 %v4307_v29, %v4302_v0 }
0x2e1c   :  { %v4315_v21 = vmul.f32 %v4313_v12, %v4309_v43 }
0x2e1e   :  { %4317 = vrot.lane.b32.xlu0 %v4315_v21, %s4720_s18 }
0x2e90   :  { %v4318_v45 = vpop.permute.xlu0 %4317 }
0x2e91   :  { %v4321_v37 = vsel %vm4320_vm9, %v4318_v45, 0.0 }
0x2e92   :  { %4322 = vadd.xlane.f32.xlu1 %v4321_v37 }
0x2f05   :  { %v4323_v17 = vpop.xlane.xlu1 %4322 }
0x2f06   :  { %v4325_v26 = vadd.f32 %v4535_v25, %v4323_v17 }
0x2f08   :  { %4328 = vperm.xlu2 %4530, %v4325_v26  }
0x2f62   :  { %v4329_v40 = vpop.permute.xlu2 %4328 }
0x2f63   :  { %4331 = vst [vmem:[#allocation5 - $0x6] sm:$0xc0] %v4329_v40 }
0x2f64   :  { %4342 = dma.vmem_to_hbm [thread:$0]  %s4338_s23, 32, %s4340_s26, [#allocation4]  }
0x2f65   :  { %4713 = dma.done.wait [#allocation4], 32  }
0x2f66   :  { %4714 = vsyncadd [#allocation4], 4294967264 }
0x2f67   :  { %4347 = vsyncpa [#allocation3], 1 }
0x2f68   :  { %4348 = vsyncpa [#allocation4], 1 }

</bundles_post_ra>
